<compile_context>
chip_gen: v7x
topology: tpu7x:2x2x1
jax: 0.10.0
libtpu: 0.0.40
codegen_flags: <defaults>
</compile_context>

<pallas_src>
import functools
import math

import jax
import jax.numpy as jnp
from jax.experimental import pallas as pl
from jax.experimental.pallas import tpu as pltpu


# ----------------------------------------------------------------------------
# Fused kernel: one batch image per grid step.
#   x_ref   : (1, H, W, C)      input image (NHWC)
#   w1_ref  : (3, 3*C, C)       conv1 weights, kx folded into the K axis
#   b1_ref  : (1, C)
#   w2_ref  : (3, 3*C, C)       conv2 weights, kx folded into the K axis
#   b2_ref  : (1, C)
#   band_ref: (C, C)            banded matrix encoding the ECA 1-D channel conv
#   o_ref   : (1, H, W, C)      x + r * sigmoid(conv1d(mean_hw(r)))
#   pad_ref : (H+2, W+2, C) f32 VMEM scratch (zero halo shared by both convs)
#   acc_ref : (H*W, C)      f32 VMEM scratch (conv accumulator)
# ----------------------------------------------------------------------------
def _resblock_kernel(x_ref, w1_ref, b1_ref, w2_ref, b2_ref, band_ref,
                     o_ref, pad_ref, acc_ref, *, H, W, C):

    def conv3x3(w_ref, b_ref):
        # 3 matmuls with K = 3*C (kx taps folded into the contraction).
        acc_ref[...] = jnp.broadcast_to(
            b_ref[...].astype(jnp.float32), (H * W, C))
        for ky in range(3):
            patch = jnp.concatenate(
                [pad_ref[ky:ky + H, 0:W, :],
                 pad_ref[ky:ky + H, 1:W + 1, :],
                 pad_ref[ky:ky + H, 2:W + 2, :]], axis=-1)      # (H, W, 3C)
            acc_ref[...] += jnp.dot(
                patch.reshape(H * W, 3 * C), w_ref[ky],
                preferred_element_type=jnp.float32)
        return acc_ref[...]                                      # (H*W, C) f32

    x = x_ref[0].astype(jnp.float32)                             # (H, W, C)

    # --- conv1 + ReLU (zero-padded x) ---
    pad_ref[...] = jnp.zeros_like(pad_ref)
    pad_ref[1:H + 1, 1:W + 1, :] = x
    h = jnp.maximum(conv3x3(w1_ref, b1_ref), 0.0)                # (H*W, C)

    # --- conv2 (zero-padded h; halo rows/cols of pad_ref are still zero) ---
    pad_ref[1:H + 1, 1:W + 1, :] = h.reshape(H, W, C)
    r = conv3x3(w2_ref, b2_ref)                                  # (H*W, C) f32

    # --- ECA: global average pool + 1-D channel conv (band matmul) + sigmoid
    v = jnp.sum(r, axis=0, keepdims=True) * (1.0 / float(H * W))  # (1, C)
    gate = jax.nn.sigmoid(
        jnp.dot(v, band_ref[...], preferred_element_type=jnp.float32))

    # --- residual add ---
    out = x + r.reshape(H, W, C) * gate.reshape(1, 1, C)
    o_ref[...] = out[None].astype(o_ref.dtype)


# ----------------------------------------------------------------------------
# Parameter setup glue (plain JAX)
# ----------------------------------------------------------------------------
def _eca_kernel_size(channels, gamma=2, b=1):
    ks = int(abs((math.log(channels, 2) + b) / gamma))
    return ks if ks % 2 else ks + 1


def _make_band_matrix(eca_w, C):
    """conv1d(kernel k, pad (k-1)//2) over channels as a (C, C) matmul."""
    k = eca_w.shape[0]
    pad = (k - 1) // 2
    i = jnp.arange(C)[:, None]
    c = jnp.arange(C)[None, :]
    d = i - c + pad
    valid = (d >= 0) & (d < k)
    return jnp.where(valid, eca_w[jnp.clip(d, 0, k - 1)], 0.0).astype(
        jnp.float32)


def init_params(key, channels):
    k1, k2, k3, k4, k5 = jax.random.split(key, 5)
    w1 = 0.1 * jax.random.normal(k1, (3, 3, channels, channels), jnp.float32)
    b1 = 0.1 * jax.random.normal(k2, (channels,), jnp.float32)
    w2 = 0.1 * jax.random.normal(k3, (3, 3, channels, channels), jnp.float32)
    b2 = 0.1 * jax.random.normal(k4, (channels,), jnp.float32)
    ks = _eca_kernel_size(channels)
    eca_w = 0.5 * jax.random.normal(k5, (ks,), jnp.float32)
    return (w1, b1, w2, b2, eca_w)


# ----------------------------------------------------------------------------
# Wrapper (NCHW in / NCHW out, matching the PyTorch module)
# ----------------------------------------------------------------------------
def residual_block_apply(x_nchw, params):
    w1, b1, w2, b2, eca_w = params
    x = jnp.transpose(x_nchw, (0, 2, 3, 1))  # -> NHWC
    B, H, W, C = x.shape

    # Fold kx into the contraction axis: (3, 3, Cin, Cout) -> (3, 3*Cin, Cout)
    w1f = w1.reshape(3, 3 * C, C)
    w2f = w2.reshape(3, 3 * C, C)
    band = _make_band_matrix(eca_w, C)

    kernel = functools.partial(_resblock_kernel, H=H, W=W, C=C)

    flops = 2 * 2 * B * H * W * (9 * C) * C + 2 * B * C * C
    bytes_accessed = (2 * B * H * W * C + 2 * 3 * 3 * C * C + 2 * C
                      + C * C) * 4
    cost = pl.CostEstimate(flops=flops, transcendentals=B * C,
                           bytes_accessed=bytes_accessed)

    out = pl.pallas_call(
        kernel,
        out_shape=jax.ShapeDtypeStruct((B, H, W, C), x.dtype),
        grid=(B,),
        in_specs=[
            pl.BlockSpec((1, H, W, C), lambda b: (b, 0, 0, 0)),   # x (image)
            pl.BlockSpec((3, 3 * C, C), lambda b: (0, 0, 0)),     # w1 folded
            pl.BlockSpec((1, C), lambda b: (0, 0)),               # b1
            pl.BlockSpec((3, 3 * C, C), lambda b: (0, 0, 0)),     # w2 folded
            pl.BlockSpec((1, C), lambda b: (0, 0)),               # b2
            pl.BlockSpec((C, C), lambda b: (0, 0)),               # ECA band
        ],
        out_specs=pl.BlockSpec((1, H, W, C), lambda b: (b, 0, 0, 0)),
        scratch_shapes=[
            pltpu.VMEM((H + 2, W + 2, C), jnp.float32),   # zero-halo buffer
            pltpu.VMEM((H * W, C), jnp.float32),          # conv accumulator
        ],
        compiler_params=pltpu.CompilerParams(
            # batch axis shards across TensorCores (megacore) for free
            dimension_semantics=("parallel",),
            # plenty for these tiles incl. double-buffering; safely below
            # v7x's 64 MiB physical VMEM
            vmem_limit_bytes=32 * 1024 * 1024,
        ),
        cost_estimate=cost,
    )(x, w1f, b1.reshape(1, C), w2f, b2.reshape(1, C), band)

    return jnp.transpose(out, (0, 3, 1, 2))  # -> NCHW


# ----------------------------------------------------------------------------
# Pure-JAX reference (for correctness check)
# ----------------------------------------------------------------------------
def residual_block_ref(x_nchw, params):
    w1, b1, w2, b2, eca_w = params

    def conv(inp, w, b):
        out = jax.lax.conv_general_dilated(
            inp, w, (1, 1), "SAME",
            dimension_numbers=("NCHW", "HWIO", "NCHW"))
        return out + b[None, :, None, None]

    h = jax.nn.relu(conv(x_nchw, w1, b1))
    r = conv(h, w2, b2)
    v = jnp.mean(r, axis=(2, 3))                       # (B, C)
    k = eca_w.shape[0]
    pad = (k - 1) // 2
    vp = jnp.pad(v, ((0, 0), (pad, pad)))
    C = v.shape[1]
    cols = [jnp.sum(eca_w * jax.lax.dynamic_slice_in_dim(vp, c, k, axis=1),
                    axis=1) for c in range(C)]
    gate = jax.nn.sigmoid(jnp.stack(cols, axis=1))     # (B, C)
    return x_nchw + r * gate[:, :, None, None]


if __name__ == "__main__":
    B, C, H, W = 2, 8, 16, 16
    key = jax.random.PRNGKey(0)
    kx, kp = jax.random.split(key)
    x = jax.random.normal(kx, (B, C, H, W), jnp.float32)
    params = init_params(kp, C)

    out = jax.block_until_ready(residual_block_apply(x, params))
    ref = jax.block_until_ready(residual_block_ref(x, params))

    assert out.shape == (B, C, H, W)
    assert jnp.max(jnp.abs(out - ref)) < 1e-4, "mismatch vs reference"
    print("KERNEL_OK")
</pallas_src>

<mosaic_0001>
module attributes {stable_mosaic.version = 11 : i64} {
  func.func @_resblock_kernel(%arg0: i32, %arg1: memref<1x16x16x8xf32, #tpu.memory_space<vmem>>, %arg2: memref<3x24x8xf32, #tpu.memory_space<vmem>>, %arg3: memref<1x8xf32, #tpu.memory_space<vmem>>, %arg4: memref<3x24x8xf32, #tpu.memory_space<vmem>>, %arg5: memref<1x8xf32, #tpu.memory_space<vmem>>, %arg6: memref<8x8xf32, #tpu.memory_space<vmem>>, %arg7: memref<1x16x16x8xf32, #tpu.memory_space<vmem>>, %arg8: memref<18x18x8xf32, #tpu.memory_space<vmem>>, %arg9: memref<256x8xf32, #tpu.memory_space<vmem>>) attributes {dimension_semantics = [#tpu.dimension_semantics<parallel>], iteration_bounds = array<i64: 2>, scalar_prefetch = 0 : i64, scratch_operands = 2 : i64, tpu.core_type = #tpu.core_type<tc>, window_params = [{transform_indices = @transform_0, window_bounds = array<i64: 1, 16, 16, 8>}, {pipeline_mode = #tpu.pipeline_mode<synchronous>, transform_indices = @transform_1, window_bounds = array<i64: 3, 24, 8>}, {pipeline_mode = #tpu.pipeline_mode<synchronous>, transform_indices = @transform_2, window_bounds = array<i64: 1, 8>}, {pipeline_mode = #tpu.pipeline_mode<synchronous>, transform_indices = @transform_3, window_bounds = array<i64: 3, 24, 8>}, {pipeline_mode = #tpu.pipeline_mode<synchronous>, transform_indices = @transform_4, window_bounds = array<i64: 1, 8>}, {pipeline_mode = #tpu.pipeline_mode<synchronous>, transform_indices = @transform_5, window_bounds = array<i64: 8, 8>}, {transform_indices = @transform_6, window_bounds = array<i64: 1, 16, 16, 8>}]} {
    %c0 = arith.constant 0 : index
    %c0_0 = arith.constant 0 : index
    %c0_1 = arith.constant 0 : index
    %c0_2 = arith.constant 0 : index
    %0 = vector.load %arg1[%c0, %c0_0, %c0_1, %c0_2] : memref<1x16x16x8xf32, #tpu.memory_space<vmem>>, vector<1x16x16x8xf32>
    %1 = vector.shape_cast %0 : vector<1x16x16x8xf32> to vector<16x16x8xf32>
    %cst = arith.constant 0.000000e+00 : f32
    %2 = vector.broadcast %cst : f32 to vector<18x18x8xf32>
    %c0_3 = arith.constant 0 : index
    %c0_4 = arith.constant 0 : index
    %c0_5 = arith.constant 0 : index
    %3 = vector.load %arg8[%c0_3, %c0_4, %c0_5] : memref<18x18x8xf32, #tpu.memory_space<vmem>>, vector<18x18x8xf32>
    tpu.vector_store %arg8[%c0_3, %c0_4, %c0_5], %2 {strides = array<i32>} : memref<18x18x8xf32, #tpu.memory_space<vmem>>, vector<18x18x8xf32>,
    %c1 = arith.constant 1 : index
    %c1_6 = arith.constant 1 : index
    %c0_7 = arith.constant 0 : index
    %4 = vector.load %arg8[%c1, %c1_6, %c0_7] : memref<18x18x8xf32, #tpu.memory_space<vmem>>, vector<16x16x8xf32>
    tpu.vector_store %arg8[%c1, %c1_6, %c0_7], %1 {strides = array<i32>} : memref<18x18x8xf32, #tpu.memory_space<vmem>>, vector<16x16x8xf32>,
    %c0_8 = arith.constant 0 : index
    %c0_9 = arith.constant 0 : index
    %5 = vector.load %arg3[%c0_8, %c0_9] : memref<1x8xf32, #tpu.memory_space<vmem>>, vector<1x8xf32>
    %6 = vector.shape_cast %5 : vector<1x8xf32> to vector<1x8xf32>
    %7 = vector.broadcast %6 : vector<1x8xf32> to vector<256x8xf32>
    %c0_10 = arith.constant 0 : index
    %c0_11 = arith.constant 0 : index
    %8 = vector.load %arg9[%c0_10, %c0_11] : memref<256x8xf32, #tpu.memory_space<vmem>>, vector<256x8xf32>
    tpu.vector_store %arg9[%c0_10, %c0_11], %7 {strides = array<i32>} : memref<256x8xf32, #tpu.memory_space<vmem>>, vector<256x8xf32>,
    %c0_12 = arith.constant 0 : index
    %c0_13 = arith.constant 0 : index
    %c0_14 = arith.constant 0 : index
    %9 = vector.load %arg8[%c0_12, %c0_13, %c0_14] : memref<18x18x8xf32, #tpu.memory_space<vmem>>, vector<16x16x8xf32>
    %c0_15 = arith.constant 0 : index
    %c1_16 = arith.constant 1 : index
    %c0_17 = arith.constant 0 : index
    %10 = vector.load %arg8[%c0_15, %c1_16, %c0_17] : memref<18x18x8xf32, #tpu.memory_space<vmem>>, vector<16x16x8xf32>
    %c0_18 = arith.constant 0 : index
    %c2 = arith.constant 2 : index
    %c0_19 = arith.constant 0 : index
    %11 = vector.load %arg8[%c0_18, %c2, %c0_19] : memref<18x18x8xf32, #tpu.memory_space<vmem>>, vector<16x16x8xf32>
    %12 = tpu.concatenate %9, %10, %11 in 2 : vector<16x16x8xf32>, vector<16x16x8xf32>, vector<16x16x8xf32> -> vector<16x16x24xf32>
    %c0_20 = arith.constant 0 : index
    %c0_21 = arith.constant 0 : index
    %13 = vector.load %arg9[%c0_20, %c0_21] : memref<256x8xf32, #tpu.memory_space<vmem>>, vector<256x8xf32>
    %14 = vector.shape_cast %12 : vector<16x16x24xf32> to vector<256x24xf32>
    %c0_22 = arith.constant 0 : index
    %c0_23 = arith.constant 0 : index
    %c0_24 = arith.constant 0 : index
    %15 = vector.load %arg2[%c0_22, %c0_23, %c0_24] : memref<3x24x8xf32, #tpu.memory_space<vmem>>, vector<1x24x8xf32>
    %16 = vector.shape_cast %15 : vector<1x24x8xf32> to vector<24x8xf32>
    %cst_25 = arith.constant dense<0.000000e+00> : vector<256x8xf32>
    %17 = tpu.matmul %14, %16, %cst_25 {dimension_numbers = #tpu.dot_dimension_numbers<[1], [0], [0], [1], [0, 0, 1, 1], [], []>} : vector<256x24xf32>, vector<24x8xf32>, vector<256x8xf32> -> vector<256x8xf32>
    %18 = arith.addf %13, %17 : vector<256x8xf32>
    %c0_26 = arith.constant 0 : index
    %c0_27 = arith.constant 0 : index
    %19 = vector.load %arg9[%c0_26, %c0_27] : memref<256x8xf32, #tpu.memory_space<vmem>>, vector<256x8xf32>
    tpu.vector_store %arg9[%c0_26, %c0_27], %18 {strides = array<i32>} : memref<256x8xf32, #tpu.memory_space<vmem>>, vector<256x8xf32>,
    %c1_28 = arith.constant 1 : index
    %c0_29 = arith.constant 0 : index
    %c0_30 = arith.constant 0 : index
    %20 = vector.load %arg8[%c1_28, %c0_29, %c0_30] : memref<18x18x8xf32, #tpu.memory_space<vmem>>, vector<16x16x8xf32>
    %c1_31 = arith.constant 1 : index
    %c1_32 = arith.constant 1 : index
    %c0_33 = arith.constant 0 : index
    %21 = vector.load %arg8[%c1_31, %c1_32, %c0_33] : memref<18x18x8xf32, #tpu.memory_space<vmem>>, vector<16x16x8xf32>
    %c1_34 = arith.constant 1 : index
    %c2_35 = arith.constant 2 : index
    %c0_36 = arith.constant 0 : index
    %22 = vector.load %arg8[%c1_34, %c2_35, %c0_36] : memref<18x18x8xf32, #tpu.memory_space<vmem>>, vector<16x16x8xf32>
    %23 = tpu.concatenate %20, %21, %22 in 2 : vector<16x16x8xf32>, vector<16x16x8xf32>, vector<16x16x8xf32> -> vector<16x16x24xf32>
    %c0_37 = arith.constant 0 : index
    %c0_38 = arith.constant 0 : index
    %24 = vector.load %arg9[%c0_37, %c0_38] : memref<256x8xf32, #tpu.memory_space<vmem>>, vector<256x8xf32>
    %25 = vector.shape_cast %23 : vector<16x16x24xf32> to vector<256x24xf32>
    %c1_39 = arith.constant 1 : index
    %c0_40 = arith.constant 0 : index
    %c0_41 = arith.constant 0 : index
    %26 = vector.load %arg2[%c1_39, %c0_40, %c0_41] : memref<3x24x8xf32, #tpu.memory_space<vmem>>, vector<1x24x8xf32>
    %27 = vector.shape_cast %26 : vector<1x24x8xf32> to vector<24x8xf32>
    %cst_42 = arith.constant dense<0.000000e+00> : vector<256x8xf32>
    %28 = tpu.matmul %25, %27, %cst_42 {dimension_numbers = #tpu.dot_dimension_numbers<[1], [0], [0], [1], [0, 0, 1, 1], [], []>} : vector<256x24xf32>, vector<24x8xf32>, vector<256x8xf32> -> vector<256x8xf32>
    %29 = arith.addf %24, %28 : vector<256x8xf32>
    %c0_43 = arith.constant 0 : index
    %c0_44 = arith.constant 0 : index
    %30 = vector.load %arg9[%c0_43, %c0_44] : memref<256x8xf32, #tpu.memory_space<vmem>>, vector<256x8xf32>
    tpu.vector_store %arg9[%c0_43, %c0_44], %29 {strides = array<i32>} : memref<256x8xf32, #tpu.memory_space<vmem>>, vector<256x8xf32>,
    %c2_45 = arith.constant 2 : index
    %c0_46 = arith.constant 0 : index
    %c0_47 = arith.constant 0 : index
    %31 = vector.load %arg8[%c2_45, %c0_46, %c0_47] : memref<18x18x8xf32, #tpu.memory_space<vmem>>, vector<16x16x8xf32>
    %c2_48 = arith.constant 2 : index
    %c1_49 = arith.constant 1 : index
    %c0_50 = arith.constant 0 : index
    %32 = vector.load %arg8[%c2_48, %c1_49, %c0_50] : memref<18x18x8xf32, #tpu.memory_space<vmem>>, vector<16x16x8xf32>
    %c2_51 = arith.constant 2 : index
    %c2_52 = arith.constant 2 : index
    %c0_53 = arith.constant 0 : index
    %33 = vector.load %arg8[%c2_51, %c2_52, %c0_53] : memref<18x18x8xf32, #tpu.memory_space<vmem>>, vector<16x16x8xf32>
    %34 = tpu.concatenate %31, %32, %33 in 2 : vector<16x16x8xf32>, vector<16x16x8xf32>, vector<16x16x8xf32> -> vector<16x16x24xf32>
    %c0_54 = arith.constant 0 : index
    %c0_55 = arith.constant 0 : index
    %35 = vector.load %arg9[%c0_54, %c0_55] : memref<256x8xf32, #tpu.memory_space<vmem>>, vector<256x8xf32>
    %36 = vector.shape_cast %34 : vector<16x16x24xf32> to vector<256x24xf32>
    %c2_56 = arith.constant 2 : index
    %c0_57 = arith.constant 0 : index
    %c0_58 = arith.constant 0 : index
    %37 = vector.load %arg2[%c2_56, %c0_57, %c0_58] : memref<3x24x8xf32, #tpu.memory_space<vmem>>, vector<1x24x8xf32>
    %38 = vector.shape_cast %37 : vector<1x24x8xf32> to vector<24x8xf32>
    %cst_59 = arith.constant dense<0.000000e+00> : vector<256x8xf32>
    %39 = tpu.matmul %36, %38, %cst_59 {dimension_numbers = #tpu.dot_dimension_numbers<[1], [0], [0], [1], [0, 0, 1, 1], [], []>} : vector<256x24xf32>, vector<24x8xf32>, vector<256x8xf32> -> vector<256x8xf32>
    %40 = arith.addf %35, %39 : vector<256x8xf32>
    %c0_60 = arith.constant 0 : index
    %c0_61 = arith.constant 0 : index
    %41 = vector.load %arg9[%c0_60, %c0_61] : memref<256x8xf32, #tpu.memory_space<vmem>>, vector<256x8xf32>
    tpu.vector_store %arg9[%c0_60, %c0_61], %40 {strides = array<i32>} : memref<256x8xf32, #tpu.memory_space<vmem>>, vector<256x8xf32>,
    %c0_62 = arith.constant 0 : index
    %c0_63 = arith.constant 0 : index
    %42 = vector.load %arg9[%c0_62, %c0_63] : memref<256x8xf32, #tpu.memory_space<vmem>>, vector<256x8xf32>
    %cst_64 = arith.constant 0.000000e+00 : f32
    %43 = vector.broadcast %cst_64 : f32 to vector<256x8xf32>
    %44 = arith.maximumf %42, %43 : vector<256x8xf32>
    %45 = vector.shape_cast %44 : vector<256x8xf32> to vector<16x16x8xf32>
    %c1_65 = arith.constant 1 : index
    %c1_66 = arith.constant 1 : index
    %c0_67 = arith.constant 0 : index
    %46 = vector.load %arg8[%c1_65, %c1_66, %c0_67] : memref<18x18x8xf32, #tpu.memory_space<vmem>>, vector<16x16x8xf32>
    tpu.vector_store %arg8[%c1_65, %c1_66, %c0_67], %45 {strides = array<i32>} : memref<18x18x8xf32, #tpu.memory_space<vmem>>, vector<16x16x8xf32>,
    %c0_68 = arith.constant 0 : index
    %c0_69 = arith.constant 0 : index
    %47 = vector.load %arg5[%c0_68, %c0_69] : memref<1x8xf32, #tpu.memory_space<vmem>>, vector<1x8xf32>
    %48 = vector.shape_cast %47 : vector<1x8xf32> to vector<1x8xf32>
    %49 = vector.broadcast %48 : vector<1x8xf32> to vector<256x8xf32>
    %c0_70 = arith.constant 0 : index
    %c0_71 = arith.constant 0 : index
    %50 = vector.load %arg9[%c0_70, %c0_71] : memref<256x8xf32, #tpu.memory_space<vmem>>, vector<256x8xf32>
    tpu.vector_store %arg9[%c0_70, %c0_71], %49 {strides = array<i32>} : memref<256x8xf32, #tpu.memory_space<vmem>>, vector<256x8xf32>,
    %c0_72 = arith.constant 0 : index
    %c0_73 = arith.constant 0 : index
    %c0_74 = arith.constant 0 : index
    %51 = vector.load %arg8[%c0_72, %c0_73, %c0_74] : memref<18x18x8xf32, #tpu.memory_space<vmem>>, vector<16x16x8xf32>
    %c0_75 = arith.constant 0 : index
    %c1_76 = arith.constant 1 : index
    %c0_77 = arith.constant 0 : index
    %52 = vector.load %arg8[%c0_75, %c1_76, %c0_77] : memref<18x18x8xf32, #tpu.memory_space<vmem>>, vector<16x16x8xf32>
    %c0_78 = arith.constant 0 : index
    %c2_79 = arith.constant 2 : index
    %c0_80 = arith.constant 0 : index
    %53 = vector.load %arg8[%c0_78, %c2_79, %c0_80] : memref<18x18x8xf32, #tpu.memory_space<vmem>>, vector<16x16x8xf32>
    %54 = tpu.concatenate %51, %52, %53 in 2 : vector<16x16x8xf32>, vector<16x16x8xf32>, vector<16x16x8xf32> -> vector<16x16x24xf32>
    %c0_81 = arith.constant 0 : index
    %c0_82 = arith.constant 0 : index
    %55 = vector.load %arg9[%c0_81, %c0_82] : memref<256x8xf32, #tpu.memory_space<vmem>>, vector<256x8xf32>
    %56 = vector.shape_cast %54 : vector<16x16x24xf32> to vector<256x24xf32>
    %c0_83 = arith.constant 0 : index
    %c0_84 = arith.constant 0 : index
    %c0_85 = arith.constant 0 : index
    %57 = vector.load %arg4[%c0_83, %c0_84, %c0_85] : memref<3x24x8xf32, #tpu.memory_space<vmem>>, vector<1x24x8xf32>
    %58 = vector.shape_cast %57 : vector<1x24x8xf32> to vector<24x8xf32>
    %cst_86 = arith.constant dense<0.000000e+00> : vector<256x8xf32>
    %59 = tpu.matmul %56, %58, %cst_86 {dimension_numbers = #tpu.dot_dimension_numbers<[1], [0], [0], [1], [0, 0, 1, 1], [], []>} : vector<256x24xf32>, vector<24x8xf32>, vector<256x8xf32> -> vector<256x8xf32>
    %60 = arith.addf %55, %59 : vector<256x8xf32>
    %c0_87 = arith.constant 0 : index
    %c0_88 = arith.constant 0 : index
    %61 = vector.load %arg9[%c0_87, %c0_88] : memref<256x8xf32, #tpu.memory_space<vmem>>, vector<256x8xf32>
    tpu.vector_store %arg9[%c0_87, %c0_88], %60 {strides = array<i32>} : memref<256x8xf32, #tpu.memory_space<vmem>>, vector<256x8xf32>,
    %c1_89 = arith.constant 1 : index
    %c0_90 = arith.constant 0 : index
    %c0_91 = arith.constant 0 : index
    %62 = vector.load %arg8[%c1_89, %c0_90, %c0_91] : memref<18x18x8xf32, #tpu.memory_space<vmem>>, vector<16x16x8xf32>
    %c1_92 = arith.constant 1 : index
    %c1_93 = arith.constant 1 : index
    %c0_94 = arith.constant 0 : index
    %63 = vector.load %arg8[%c1_92, %c1_93, %c0_94] : memref<18x18x8xf32, #tpu.memory_space<vmem>>, vector<16x16x8xf32>
    %c1_95 = arith.constant 1 : index
    %c2_96 = arith.constant 2 : index
    %c0_97 = arith.constant 0 : index
    %64 = vector.load %arg8[%c1_95, %c2_96, %c0_97] : memref<18x18x8xf32, #tpu.memory_space<vmem>>, vector<16x16x8xf32>
    %65 = tpu.concatenate %62, %63, %64 in 2 : vector<16x16x8xf32>, vector<16x16x8xf32>, vector<16x16x8xf32> -> vector<16x16x24xf32>
    %c0_98 = arith.constant 0 : index
    %c0_99 = arith.constant 0 : index
    %66 = vector.load %arg9[%c0_98, %c0_99] : memref<256x8xf32, #tpu.memory_space<vmem>>, vector<256x8xf32>
    %67 = vector.shape_cast %65 : vector<16x16x24xf32> to vector<256x24xf32>
    %c1_100 = arith.constant 1 : index
    %c0_101 = arith.constant 0 : index
    %c0_102 = arith.constant 0 : index
    %68 = vector.load %arg4[%c1_100, %c0_101, %c0_102] : memref<3x24x8xf32, #tpu.memory_space<vmem>>, vector<1x24x8xf32>
    %69 = vector.shape_cast %68 : vector<1x24x8xf32> to vector<24x8xf32>
    %cst_103 = arith.constant dense<0.000000e+00> : vector<256x8xf32>
    %70 = tpu.matmul %67, %69, %cst_103 {dimension_numbers = #tpu.dot_dimension_numbers<[1], [0], [0], [1], [0, 0, 1, 1], [], []>} : vector<256x24xf32>, vector<24x8xf32>, vector<256x8xf32> -> vector<256x8xf32>
    %71 = arith.addf %66, %70 : vector<256x8xf32>
    %c0_104 = arith.constant 0 : index
    %c0_105 = arith.constant 0 : index
    %72 = vector.load %arg9[%c0_104, %c0_105] : memref<256x8xf32, #tpu.memory_space<vmem>>, vector<256x8xf32>
    tpu.vector_store %arg9[%c0_104, %c0_105], %71 {strides = array<i32>} : memref<256x8xf32, #tpu.memory_space<vmem>>, vector<256x8xf32>,
    %c2_106 = arith.constant 2 : index
    %c0_107 = arith.constant 0 : index
    %c0_108 = arith.constant 0 : index
    %73 = vector.load %arg8[%c2_106, %c0_107, %c0_108] : memref<18x18x8xf32, #tpu.memory_space<vmem>>, vector<16x16x8xf32>
    %c2_109 = arith.constant 2 : index
    %c1_110 = arith.constant 1 : index
    %c0_111 = arith.constant 0 : index
    %74 = vector.load %arg8[%c2_109, %c1_110, %c0_111] : memref<18x18x8xf32, #tpu.memory_space<vmem>>, vector<16x16x8xf32>
    %c2_112 = arith.constant 2 : index
    %c2_113 = arith.constant 2 : index
    %c0_114 = arith.constant 0 : index
    %75 = vector.load %arg8[%c2_112, %c2_113, %c0_114] : memref<18x18x8xf32, #tpu.memory_space<vmem>>, vector<16x16x8xf32>
    %76 = tpu.concatenate %73, %74, %75 in 2 : vector<16x16x8xf32>, vector<16x16x8xf32>, vector<16x16x8xf32> -> vector<16x16x24xf32>
    %c0_115 = arith.constant 0 : index
    %c0_116 = arith.constant 0 : index
    %77 = vector.load %arg9[%c0_115, %c0_116] : memref<256x8xf32, #tpu.memory_space<vmem>>, vector<256x8xf32>
    %78 = vector.shape_cast %76 : vector<16x16x24xf32> to vector<256x24xf32>
    %c2_117 = arith.constant 2 : index
    %c0_118 = arith.constant 0 : index
    %c0_119 = arith.constant 0 : index
    %79 = vector.load %arg4[%c2_117, %c0_118, %c0_119] : memref<3x24x8xf32, #tpu.memory_space<vmem>>, vector<1x24x8xf32>
    %80 = vector.shape_cast %79 : vector<1x24x8xf32> to vector<24x8xf32>
    %cst_120 = arith.constant dense<0.000000e+00> : vector<256x8xf32>
    %81 = tpu.matmul %78, %80, %cst_120 {dimension_numbers = #tpu.dot_dimension_numbers<[1], [0], [0], [1], [0, 0, 1, 1], [], []>} : vector<256x24xf32>, vector<24x8xf32>, vector<256x8xf32> -> vector<256x8xf32>
    %82 = arith.addf %77, %81 : vector<256x8xf32>
    %c0_121 = arith.constant 0 : index
    %c0_122 = arith.constant 0 : index
    %83 = vector.load %arg9[%c0_121, %c0_122] : memref<256x8xf32, #tpu.memory_space<vmem>>, vector<256x8xf32>
    tpu.vector_store %arg9[%c0_121, %c0_122], %82 {strides = array<i32>} : memref<256x8xf32, #tpu.memory_space<vmem>>, vector<256x8xf32>,
    %c0_123 = arith.constant 0 : index
    %c0_124 = arith.constant 0 : index
    %84 = vector.load %arg9[%c0_123, %c0_124] : memref<256x8xf32, #tpu.memory_space<vmem>>, vector<256x8xf32>
    %cst_125 = arith.constant dense<0.000000e+00> : vector<8xf32>
    %85 = vector.multi_reduction <add>, %84, %cst_125 [0] : vector<256x8xf32> to vector<8xf32>
    %86 = vector.shape_cast %85 : vector<8xf32> to vector<1x8xf32>
    %cst_126 = arith.constant 3.906250e-03 : f32
    %87 = vector.broadcast %cst_126 : f32 to vector<1x8xf32>
    %88 = arith.mulf %86, %87 : vector<1x8xf32>
    %c0_127 = arith.constant 0 : index
    %c0_128 = arith.constant 0 : index
    %89 = vector.load %arg6[%c0_127, %c0_128] : memref<8x8xf32, #tpu.memory_space<vmem>>, vector<8x8xf32>
    %cst_129 = arith.constant dense<0.000000e+00> : vector<1x8xf32>
    %90 = tpu.matmul %88, %89, %cst_129 {dimension_numbers = #tpu.dot_dimension_numbers<[1], [0], [0], [1], [0, 0, 1, 1], [], []>} : vector<1x8xf32>, vector<8x8xf32>, vector<1x8xf32> -> vector<1x8xf32>
    %91 = arith.negf %90 : vector<1x8xf32>
    %92 = math.exp %91 : vector<1x8xf32>
    %cst_130 = arith.constant 1.000000e+00 : f32
    %93 = vector.broadcast %cst_130 : f32 to vector<1x8xf32>
    %94 = arith.addf %93, %92 : vector<1x8xf32>
    %95 = arith.divf %93, %94 : vector<1x8xf32>
    %96 = vector.shape_cast %84 : vector<256x8xf32> to vector<16x16x8xf32>
    %97 = vector.shape_cast %95 : vector<1x8xf32> to vector<1x1x8xf32>
    %98 = vector.broadcast %97 : vector<1x1x8xf32> to vector<16x16x8xf32>
    %99 = arith.mulf %96, %98 : vector<16x16x8xf32>
    %100 = arith.addf %1, %99 : vector<16x16x8xf32>
    %101 = vector.shape_cast %100 : vector<16x16x8xf32> to vector<1x16x16x8xf32>
    %c0_131 = arith.constant 0 : index
    %c0_132 = arith.constant 0 : index
    %c0_133 = arith.constant 0 : index
    %c0_134 = arith.constant 0 : index
    %102 = vector.load %arg7[%c0_131, %c0_132, %c0_133, %c0_134] : memref<1x16x16x8xf32, #tpu.memory_space<vmem>>, vector<1x16x16x8xf32>
    tpu.vector_store %arg7[%c0_131, %c0_132, %c0_133, %c0_134], %101 {strides = array<i32>} : memref<1x16x16x8xf32, #tpu.memory_space<vmem>>, vector<1x16x16x8xf32>,
    return
  }
  func.func @transform_0(%arg0: i32) -> (i32, i32, i32, i32) {
    %c0_i32 = arith.constant 0 : i32
    %c0_i32_0 = arith.constant 0 : i32
    %c0_i32_1 = arith.constant 0 : i32
    %c0_i32_2 = arith.constant 0 : i32
    return %arg0, %c0_i32, %c0_i32_0, %c0_i32_1 : i32, i32, i32, i32
  }
  func.func @transform_1(%arg0: i32) -> (i32, i32, i32) {
    %c0_i32 = arith.constant 0 : i32
    %c0_i32_0 = arith.constant 0 : i32
    %c0_i32_1 = arith.constant 0 : i32
    %c0_i32_2 = arith.constant 0 : i32
    return %c0_i32, %c0_i32_0, %c0_i32_1 : i32, i32, i32
  }
  func.func @transform_2(%arg0: i32) -> (i32, i32) {
    %c0_i32 = arith.constant 0 : i32
    %c0_i32_0 = arith.constant 0 : i32
    %c0_i32_1 = arith.constant 0 : i32
    return %c0_i32, %c0_i32_0 : i32, i32
  }
  func.func @transform_3(%arg0: i32) -> (i32, i32, i32) {
    %c0_i32 = arith.constant 0 : i32
    %c0_i32_0 = arith.constant 0 : i32
    %c0_i32_1 = arith.constant 0 : i32
    %c0_i32_2 = arith.constant 0 : i32
    return %c0_i32, %c0_i32_0, %c0_i32_1 : i32, i32, i32
  }
  func.func @transform_4(%arg0: i32) -> (i32, i32) {
    %c0_i32 = arith.constant 0 : i32
    %c0_i32_0 = arith.constant 0 : i32
    %c0_i32_1 = arith.constant 0 : i32
    return %c0_i32, %c0_i32_0 : i32, i32
  }
  func.func @transform_5(%arg0: i32) -> (i32, i32) {
    %c0_i32 = arith.constant 0 : i32
    %c0_i32_0 = arith.constant 0 : i32
    %c0_i32_1 = arith.constant 0 : i32
    return %c0_i32, %c0_i32_0 : i32, i32
  }
  func.func @transform_6(%arg0: i32) -> (i32, i32, i32, i32) {
    %c0_i32 = arith.constant 0 : i32
    %c0_i32_0 = arith.constant 0 : i32
    %c0_i32_1 = arith.constant 0 : i32
    %c0_i32_2 = arith.constant 0 : i32
    return %arg0, %c0_i32, %c0_i32_0, %c0_i32_1 : i32, i32, i32, i32
  }
}

</mosaic_0001>

<bundles_post_ra>
// kernel: tpu_custom_call.1
= control target key start
LH: loop header
LB: loop body
LE: loop exit
PB: predicated region body
PF: predicated region fallthrough
CT: control target
= control target key end

     0   :  { %s6765_s21 = smov 0   ;;  %s9336_s0 = inlined_call_operand.vmem [shape: f32[2,16,16,8], index: 0, kind: input, shape index: {}]   ;;  %s9337_s1 = inlined_call_operand.vmem [shape: f32[3,24,8], index: 1, kind: input, shape index: {}]   ;;  %s9338_s2 = inlined_call_operand.vmem [shape: f32[1,8], index: 2, kind: input, shape index: {}]   ;;  %s9339_s3 = inlined_call_operand.vmem [shape: f32[3,24,8], index: 3, kind: input, shape index: {}]   ;;  %s9340_s4 = inlined_call_operand.vmem [shape: f32[1,8], index: 4, kind: input, shape index: {}]   ;;  %s9341_s5 = inlined_call_operand.vmem [shape: f32[8,8], index: 5, kind: input, shape index: {}]   ;;  %s9342_s6 = inlined_call_operand.vmem [shape: f32[2,16,16,8], index: 6, kind: output, shape index: {}]  }
   0x1 LB: > { %s5907_s22 = sadd.s32 4294967295, %s6724_s21   ;;  %p5911_p0 = scmp.ge.s32.totalorder %s6724_s21, 1  ;;  %s6724_s21 = sphi %s6765_s21, %s16_s21  }
   0x2   : > { %p212_p1 = scmp.lt.s32.totalorder %s6724_s21, 3 }
   0x4   : > { %p213_p2 = pnand %p5911_p0, %p212_p1 }
   0x6   : > { %216 = sbr.rel (%p213_p2) target bundleno = 1643 (0x66b), region = 44 }
   0xd   : > { %vm284_vm0 = vcmask 64512   ;;  %vm287_vm1 = vcmask 58368   ;;  %v861_v0 = vld [vmem:[%s9337_s1] sm:$0xff]  ;;  %v9343_v1 = vmov 0.0   ;;  %p242_p3 = scmp.lt.s32.totalorder %s5907_s22, 1  ;;  %v862_v2 = vld [vmem:[%s9337_s1 + $0x8] sm:$0xff] }
   0xe   : > { %285 = vst.msk [vmem:[#allocation2] sm:$0xff] %vm284_vm0, %v9343_v1  ;;  %286 = vst.msk [vmem:[#allocation2 + $0x8] sm:$0xff] %vm284_vm0, %v9343_v1  ;;  %v6669_v3 = vpack.c.bf16 %v862_v2, %v861_v0  ;;  %v863_v4 = vld [vmem:[%s9337_s1 + $0x10] sm:$0xff]  ;;  %s6727_s9 = smov 16   ;;  %s6728_s10 = smov 8   ;;  %vm796_vm2 = vcmask 130048  }
   0xf   : > { %289 = vst.msk [vmem:[#allocation2 + $0x18] sm:$0xff] %vm284_vm0, %v9343_v1  ;;  %290 = vst.msk [vmem:[#allocation2 + $0x20] sm:$0xff] %vm284_vm0, %v9343_v1  ;;  %s9464_s22 = smov (!%p242_p3, %s5907_s22), 1  ;;  %vm864_vm3 = vcmask 195584   ;;  %vm6729_vm4 = vmmov 0  }
  0x10   : > { %292 = vst.msk [vmem:[#allocation2 + $0x30] sm:$0xff] %vm284_vm0, %v9343_v1  ;;  %293 = vst.msk [vmem:[#allocation2 + $0x38] sm:$0xff] %vm284_vm0, %v9343_v1  ;;  %6670 = vmatprep.subr.bf16.mxu0 %v6669_v3  ;;  %s6126_s29 = sshll.u32 %s9464_s22, 8 }
  0x11   : > { %295 = vst.msk [vmem:[#allocation2 + $0x48] sm:$0xff] %vm284_vm0, %v9343_v1  ;;  %296 = vst.msk [vmem:[#allocation2 + $0x50] sm:$0xff] %vm284_vm0, %v9343_v1  ;;  %6672 = vmatpush3.bf16.msra.mxu0 %v6669_v3  ;;  %s6902_s8 = scalar_lea.vmem %s9336_s0, %s6126_s29  ;;  %s9234_s7 = scalar_lea.vmem %s9342_s6, %s6126_s29 }
  0x12   : > { %298 = vst.msk [vmem:[#allocation2 + $0x60] sm:$0xff] %vm284_vm0, %v9343_v1  ;;  %299 = vst.msk [vmem:[#allocation2 + $0x68] sm:$0xff] %vm284_vm0, %v9343_v1  ;;  %6344 = vmatprep.subr.mxu0 %v863_v4  ;;  %v6905_v5 = vld [vmem:[%s6902_s8 + $0x8] sm:$0xff]  ;;  %v6908_v6 = vld [vmem:[%s6902_s8] sm:$0xff] }
  0x13   : > { %301 = vst.msk [vmem:[#allocation2 + $0x78] sm:$0xff] %vm284_vm0, %v9343_v1  ;;  %302 = vst.msk [vmem:[#allocation2 + $0x80] sm:$0xff] %vm284_vm0, %v9343_v1  ;;  %v6911_v7 = vld [vmem:[%s6902_s8 + $0x18] sm:$0xff]  ;;  %v6922_v12 = vld [vmem:[%s6902_s8 + $0x10] sm:$0xff] }
  0x14   : > { %304 = vst.msk [vmem:[#allocation2 + $0x90] sm:$0xff] %vm284_vm0, %v9343_v1  ;;  %305 = vst.msk [vmem:[#allocation2 + $0x98] sm:$0xff] %vm284_vm0, %v9343_v1  ;;  %v6925_v13 = vld [vmem:[%s6902_s8 + $0x28] sm:$0xff]  ;;  %v6932_v14 = vld [vmem:[%s6902_s8 + $0x20] sm:$0xff] }
  0x15   : > { %307 = vst.msk [vmem:[#allocation2 + $0xa8] sm:$0xff] %vm284_vm0, %v9343_v1  ;;  %308 = vst.msk [vmem:[#allocation2 + $0xb0] sm:$0xff] %vm284_vm0, %v9343_v1  ;;  %v476_v8 = vld [vmem:[#allocation2 + $0x2] sm:$0xff]  ;;  %v6935_v15 = vld [vmem:[%s6902_s8 + $0x38] sm:$0xff]  ;;  %6345 = vmatpush3.msra.mxu0 %v863_v4 }
  0x16   : > { %310 = vst.msk [vmem:[#allocation2 + $0xc0] sm:$0xff] %vm284_vm0, %v9343_v1  ;;  %311 = vst.msk [vmem:[#allocation2 + $0xc8] sm:$0xff] %vm284_vm0, %v9343_v1  ;;  %v444_v9 = vld [vmem:[#allocation2 + $0x1] sm:$0xff]  ;;  %668 = vrot.lane.b32.xlu1 %v476_v8, %s6727_s9  ;;  %v6938_v16 = vld [vmem:[%s6902_s8 + $0x30] sm:$0xff] }
  0x17   : > { %313 = vst.msk [vmem:[#allocation2 + $0xd8] sm:$0xff] %vm284_vm0, %v9343_v1  ;;  %314 = vst.msk [vmem:[#allocation2 + $0xe0] sm:$0xff] %vm284_vm0, %v9343_v1  ;;  %540 = vrot.lane.b32.xlu0 %v444_v9, %s6728_s10  ;;  %v6947_v17 = vld [vmem:[%s6902_s8 + $0x48] sm:$0xff]  ;;  %v6950_v18 = vld [vmem:[%s6902_s8 + $0x40] sm:$0xff] }
  0x18   : > { %316 = vst.msk [vmem:[#allocation2 + $0xf0] sm:$0xff] %vm284_vm0, %v9343_v1  ;;  %317 = vst.msk [vmem:[#allocation2 + $0xf8] sm:$0xff] %vm284_vm0, %v9343_v1  ;;  %v6953_v19 = vld [vmem:[%s6902_s8 + $0x58] sm:$0xff]  ;;  %v6962_v20 = vld [vmem:[%s6902_s8 + $0x50] sm:$0xff] }
  0x19   : > { %319 = vst.msk [vmem:[#allocation2 + $0x108] sm:$0xff] %vm284_vm0, %v9343_v1  ;;  %320 = vst.msk [vmem:[#allocation2 + $0x110] sm:$0xff] %vm284_vm0, %v9343_v1  ;;  %v6965_v21 = vld [vmem:[%s6902_s8 + $0x68] sm:$0xff]  ;;  %v6968_v22 = vld [vmem:[%s6902_s8 + $0x60] sm:$0xff] }
  0x1a   : > { %322 = vst.msk [vmem:[#allocation2 + $0x120] sm:$0xff] %vm284_vm0, %v9343_v1  ;;  %323 = vst.msk [vmem:[#allocation2 + $0x128] sm:$0xff] %vm284_vm0, %v9343_v1  ;;  %v6979_v23 = vld [vmem:[%s6902_s8 + $0x78] sm:$0xff]  ;;  %v6982_v24 = vld [vmem:[%s6902_s8 + $0x70] sm:$0xff] }
  0x1b   : > { %325 = vst.msk [vmem:[#allocation2 + $0x138] sm:$0xff] %vm284_vm0, %v9343_v1  ;;  %326 = vst.msk [vmem:[#allocation2 + $0x140] sm:$0xff] %vm284_vm0, %v9343_v1  ;;  %v6989_v25 = vld [vmem:[%s6902_s8 + $0x88] sm:$0xff]  ;;  %v6992_v26 = vld [vmem:[%s6902_s8 + $0x80] sm:$0xff] }
  0x1c   : > { %328 = vst.msk [vmem:[#allocation2 + $0x150] sm:$0xff] %vm284_vm0, %v9343_v1  ;;  %329 = vst.msk [vmem:[#allocation2 + $0x158] sm:$0xff] %vm284_vm0, %v9343_v1  ;;  %v6995_v27 = vld [vmem:[%s6902_s8 + $0x98] sm:$0xff]  ;;  %v7032_v36 = vld [vmem:[%s6902_s8 + $0x90] sm:$0xff] }
  0x1d   : > { %331 = vst.msk [vmem:[#allocation2 + $0x168] sm:$0xff] %vm284_vm0, %v9343_v1  ;;  %332 = vst.msk [vmem:[#allocation2 + $0x170] sm:$0xff] %vm284_vm0, %v9343_v1  ;;  %v7039_v38 = vld [vmem:[%s6902_s8 + $0xa8] sm:$0xff]  ;;  %v7042_v39 = vld [vmem:[%s6902_s8 + $0xa0] sm:$0xff] }
  0x1e   : > { %334 = vst.msk [vmem:[#allocation2 + $0x180] sm:$0xff] %vm284_vm0, %v9343_v1  ;;  %335 = vst.msk [vmem:[#allocation2 + $0x188] sm:$0xff] %vm284_vm0, %v9343_v1  ;;  %v7045_v40 = vld [vmem:[%s6902_s8 + $0xb8] sm:$0xff]  ;;  %v7060_v42 = vld [vmem:[%s6902_s8 + $0xb0] sm:$0xff] }
  0x1f   : > { %337 = vst.msk [vmem:[#allocation2 + $0x198] sm:$0xff] %vm284_vm0, %v9343_v1  ;;  %338 = vst.msk [vmem:[#allocation2 + $0x1a0] sm:$0xff] %vm284_vm0, %v9343_v1  ;;  %v7063_v43 = vld [vmem:[%s6902_s8 + $0xc8] sm:$0xff]  ;;  %v7070_v44 = vld [vmem:[%s6902_s8 + $0xc0] sm:$0xff] }
  0x20   : > { %288 = vst.msk [vmem:[#allocation2 + $0x10] sm:$0x3] %vm287_vm1, %v9343_v1  ;;  %291 = vst.msk [vmem:[#allocation2 + $0x28] sm:$0x3] %vm287_vm1, %v9343_v1  ;;  %v7073_v45 = vld [vmem:[%s6902_s8 + $0xd0] sm:$0xff]  ;;  %v7076_v46 = vld [vmem:[%s6902_s8 + $0xd8] sm:$0xff] }
  0x21   : > { %294 = vst.msk [vmem:[#allocation2 + $0x40] sm:$0x3] %vm287_vm1, %v9343_v1  ;;  %297 = vst.msk [vmem:[#allocation2 + $0x58] sm:$0x3] %vm287_vm1, %v9343_v1  ;;  %v7085_v47 = vld [vmem:[%s6902_s8 + $0xe0] sm:$0xff]  ;;  %v7088_v48 = vld [vmem:[%s6902_s8 + $0xe8] sm:$0xff] }
  0x22   : > { %300 = vst.msk [vmem:[#allocation2 + $0x70] sm:$0x3] %vm287_vm1, %v9343_v1  ;;  %303 = vst.msk [vmem:[#allocation2 + $0x88] sm:$0x3] %vm287_vm1, %v9343_v1 }
  0x23   : > { %306 = vst.msk [vmem:[#allocation2 + $0xa0] sm:$0x3] %vm287_vm1, %v9343_v1  ;;  %309 = vst.msk [vmem:[#allocation2 + $0xb8] sm:$0x3] %vm287_vm1, %v9343_v1 }
  0x24   : > { %312 = vst.msk [vmem:[#allocation2 + $0xd0] sm:$0x3] %vm287_vm1, %v9343_v1  ;;  %315 = vst.msk [vmem:[#allocation2 + $0xe8] sm:$0x3] %vm287_vm1, %v9343_v1 }
  0x25   : > { %318 = vst.msk [vmem:[#allocation2 + $0x100] sm:$0x3] %vm287_vm1, %v9343_v1  ;;  %321 = vst.msk [vmem:[#allocation2 + $0x118] sm:$0x3] %vm287_vm1, %v9343_v1 }
  0x26   : > { %324 = vst.msk [vmem:[#allocation2 + $0x130] sm:$0x3] %vm287_vm1, %v9343_v1  ;;  %327 = vst.msk [vmem:[#allocation2 + $0x148] sm:$0x3] %vm287_vm1, %v9343_v1 }
  0x27   : > { %330 = vst.msk [vmem:[#allocation2 + $0x160] sm:$0x3] %vm287_vm1, %v9343_v1  ;;  %333 = vst.msk [vmem:[#allocation2 + $0x178] sm:$0x3] %vm287_vm1, %v9343_v1  ;;  %v477_v10 = vld [vmem:[#allocation2 + $0xa] sm:$0xff] }
  0x28   : > { %336 = vst.msk [vmem:[#allocation2 + $0x190] sm:$0x3] %vm287_vm1, %v9343_v1  ;;  %339 = vst.msk [vmem:[#allocation2 + $0x1a8] sm:$0x3] %vm287_vm1, %v9343_v1  ;;  %v445_v11 = vld [vmem:[#allocation2 + $0x9] sm:$0xff]  ;;  %670 = vrot.lane.b32.xlu1 %v477_v10, %s6727_s9 }
  0x29   : > { %9384 = vst [vmem:[#allocation4_spill] sm:$0xff] %v6905_v5  ;;  %9385 = vst [vmem:[#allocation5_spill] sm:$0xff] %v6908_v6  ;;  %542 = vrot.lane.b32.xlu0 %v445_v11, %s6728_s10 }
  0x2a   : > { %9386 = vst [vmem:[#allocation6_spill] sm:$0xff] %v6911_v7  ;;  %342 = vst.msk [vmem:[#allocation2 + $0x21] sm:$0xff] %vm284_vm0, %v6905_v5 }
  0x2b   : > { %341 = vst.msk [vmem:[#allocation2 + $0x19] sm:$0xff] %vm284_vm0, %v6908_v6  ;;  %344 = vst.msk [vmem:[#allocation2 + $0x39] sm:$0xff] %vm284_vm0, %v6911_v7 }
  0x2c   : > { %9387 = vst [vmem:[#allocation7_spill] sm:$0xff] %v6922_v12  ;;  %9388 = vst [vmem:[#allocation8_spill] sm:$0xff] %v6925_v13 }
  0x2d   : > { %343 = vst.msk [vmem:[#allocation2 + $0x31] sm:$0xff] %vm284_vm0, %v6922_v12  ;;  %346 = vst.msk [vmem:[#allocation2 + $0x51] sm:$0xff] %vm284_vm0, %v6925_v13 }
  0x2e   : > { %9389 = vst [vmem:[#allocation9_spill] sm:$0xff] %v6932_v14  ;;  %9390 = vst [vmem:[#allocation10_spill] sm:$0xff] %v6935_v15 }
  0x2f   : > { %9391 = vst [vmem:[#allocation11_spill] sm:$0xff] %v6938_v16  ;;  %345 = vst.msk [vmem:[#allocation2 + $0x49] sm:$0xff] %vm284_vm0, %v6932_v14 }
  0x30   : > { %348 = vst.msk [vmem:[#allocation2 + $0x69] sm:$0xff] %vm284_vm0, %v6935_v15  ;;  %347 = vst.msk [vmem:[#allocation2 + $0x61] sm:$0xff] %vm284_vm0, %v6938_v16 }
  0x31   : > { %9392 = vst [vmem:[#allocation12_spill] sm:$0xff] %v6947_v17  ;;  %9393 = vst [vmem:[#allocation13_spill] sm:$0xff] %v6950_v18  ;;  %v6997_v28 = vld [vmem:[#allocation2 + $0x21] sm:$0xff] }
  0x32   : > { %9394 = vst [vmem:[#allocation14_spill] sm:$0xff] %v6953_v19  ;;  %350 = vst.msk [vmem:[#allocation2 + $0x81] sm:$0xff] %vm284_vm0, %v6947_v17  ;;  %v6999_v29 = vld [vmem:[#allocation2 + $0x19] sm:$0xff]  ;;  %546 = vrot.lane.b32.xlu1 %v6997_v28, %s6728_s10  ;;  %v7011_v30 = vld [vmem:[#allocation2 + $0x22] sm:$0xff] }
  0x33   : > { %349 = vst.msk [vmem:[#allocation2 + $0x79] sm:$0xff] %vm284_vm0, %v6950_v18  ;;  %352 = vst.msk [vmem:[#allocation2 + $0x99] sm:$0xff] %vm284_vm0, %v6953_v19  ;;  %544 = vrot.lane.b32.xlu0 %v6999_v29, %s6728_s10  ;;  %v7013_v31 = vld [vmem:[#allocation2 + $0x1a] sm:$0xff]  ;;  %v5951_v18 = vld [vmem:[%s9337_s1 + $0x28] sm:$0xff] }
  0x34   : > { %9395 = vst [vmem:[#allocation15_spill] sm:$0xff] %v6962_v20  ;;  %9396 = vst [vmem:[#allocation16_spill] sm:$0xff] %v6965_v21  ;;  %v7019_v32 = vld [vmem:[#allocation2 + $0x39] sm:$0xff]  ;;  %v7021_v33 = vld [vmem:[#allocation2 + $0x31] sm:$0xff] }
  0x35   : > { %9397 = vst [vmem:[#allocation17_spill] sm:$0xff] %v6968_v22  ;;  %351 = vst.msk [vmem:[#allocation2 + $0x91] sm:$0xff] %vm284_vm0, %v6962_v20  ;;  %v7027_v34 = vld [vmem:[#allocation2 + $0x3a] sm:$0xff]  ;;  %v7029_v35 = vld [vmem:[#allocation2 + $0x32] sm:$0xff] }
  0x36   : > { %354 = vst.msk [vmem:[#allocation2 + $0xb1] sm:$0xff] %vm284_vm0, %v6965_v21  ;;  %353 = vst.msk [vmem:[#allocation2 + $0xa9] sm:$0xff] %vm284_vm0, %v6968_v22  ;;  %674 = vrot.lane.b32.xlu1 %v7011_v30, %s6727_s9  ;;  %v7034_v37 = vld [vmem:[#allocation2 + $0x51] sm:$0xff]  ;;  %v7051_v41 = vld [vmem:[#allocation2 + $0x49] sm:$0xff] }
  0x37   : > { %9398 = vst [vmem:[#allocation18_spill] sm:$0xff] %v6979_v23  ;;  %9399 = vst [vmem:[#allocation19_spill] sm:$0xff] %v6982_v24  ;;  %672 = vrot.lane.b32.xlu0 %v7013_v31, %s6727_s9  ;;  %v7098_v49 = vld [vmem:[#allocation2 + $0x52] sm:$0xff]  ;;  %v7100_v50 = vld [vmem:[#allocation2 + $0x4a] sm:$0xff] }
  0x38   : > { %356 = vst.msk [vmem:[#allocation2 + $0xc9] sm:$0xff] %vm284_vm0, %v6979_v23  ;;  %355 = vst.msk [vmem:[#allocation2 + $0xc1] sm:$0xff] %vm284_vm0, %v6982_v24  ;;  %v7106_v51 = vld [vmem:[#allocation2 + $0x69] sm:$0xff]  ;;  %v7108_v52 = vld [vmem:[#allocation2 + $0x61] sm:$0xff] }
  0x39   : > { %9400 = vst [vmem:[#allocation20_spill] sm:$0xff] %v6989_v25  ;;  %9401 = vst [vmem:[#allocation21_spill] sm:$0xff] %v6992_v26  ;;  %v7114_v53 = vld [vmem:[#allocation2 + $0x6a] sm:$0xff]  ;;  %v7116_v54 = vld [vmem:[#allocation2 + $0x62] sm:$0xff] }
  0x3a   : > { %9402 = vst [vmem:[#allocation22_spill] sm:$0xff] %v6995_v27  ;;  %358 = vst.msk [vmem:[#allocation2 + $0xe1] sm:$0xff] %vm284_vm0, %v6989_v25  ;;  %550 = vrot.lane.b32.xlu1 %v7019_v32, %s6728_s10  ;;  %v7122_v55 = vld [vmem:[#allocation2 + $0x81] sm:$0xff]  ;;  %v7124_v56 = vld [vmem:[#allocation2 + $0x79] sm:$0xff] }
  0x3b   : > { %357 = vst.msk [vmem:[#allocation2 + $0xd9] sm:$0xff] %vm284_vm0, %v6992_v26  ;;  %360 = vst.msk [vmem:[#allocation2 + $0xf9] sm:$0xff] %vm284_vm0, %v6995_v27  ;;  %548 = vrot.lane.b32.xlu0 %v7021_v33, %s6728_s10  ;;  %v7130_v57 = vld [vmem:[#allocation2 + $0x82] sm:$0xff]  ;;  %v7132_v58 = vld [vmem:[#allocation2 + $0x7a] sm:$0xff] }
  0x3c   : > { %9403 = vst [vmem:[#allocation23_spill] sm:$0xff] %v7032_v36  ;;  %359 = vst.msk [vmem:[#allocation2 + $0xf1] sm:$0xff] %vm284_vm0, %v7032_v36  ;;  %v7138_v59 = vld [vmem:[#allocation2 + $0x99] sm:$0xff]  ;;  %v7140_v60 = vld [vmem:[#allocation2 + $0x91] sm:$0xff] }
  0x3d   : > { %9404 = vst [vmem:[#allocation24_spill] sm:$0xff] %v7039_v38  ;;  %9405 = vst [vmem:[#allocation25_spill] sm:$0xff] %v7042_v39  ;;  %v7146_v61 = vld [vmem:[#allocation2 + $0x9a] sm:$0xff]  ;;  %v7148_v62 = vld [vmem:[#allocation2 + $0x92] sm:$0xff] }
  0x3e   : > { %9406 = vst [vmem:[#allocation26_spill] sm:$0xff] %v7045_v40  ;;  %678 = vrot.lane.b32.xlu1 %v7027_v34, %s6727_s9  ;;  %362 = vst.msk [vmem:[#allocation2 + $0x111] sm:$0xff] %vm284_vm0, %v7039_v38  ;;  %v7154_v63 = vld [vmem:[#allocation2 + $0xb1] sm:$0xff]  ;;  %v7156_v0 = vld [vmem:[#allocation2 + $0xa9] sm:$0xff] }
  0x3f   : > { %676 = vrot.lane.b32.xlu0 %v7029_v35, %s6727_s9  ;;  %361 = vst.msk [vmem:[#allocation2 + $0x109] sm:$0xff] %vm284_vm0, %v7042_v39  ;;  %364 = vst.msk [vmem:[#allocation2 + $0x129] sm:$0xff] %vm284_vm0, %v7045_v40  ;;  %v7162_v2 = vld [vmem:[#allocation2 + $0xb2] sm:$0xff]  ;;  %v7164_v3 = vld [vmem:[#allocation2 + $0xaa] sm:$0xff] }
  0x40   : > { %9407 = vst [vmem:[#allocation27_spill] sm:$0xff] %v7060_v42  ;;  %9408 = vst [vmem:[#allocation28_spill] sm:$0xff] %v7063_v43  ;;  %v7170_v4 = vld [vmem:[#allocation2 + $0xc9] sm:$0xff]  ;;  %v7172_v8 = vld [vmem:[#allocation2 + $0xc1] sm:$0xff] }
  0x41   : > { %363 = vst.msk [vmem:[#allocation2 + $0x121] sm:$0xff] %vm284_vm0, %v7060_v42  ;;  %366 = vst.msk [vmem:[#allocation2 + $0x141] sm:$0xff] %vm284_vm0, %v7063_v43  ;;  %v7178_v9 = vld [vmem:[#allocation2 + $0xca] sm:$0xff]  ;;  %v7180_v10 = vld [vmem:[#allocation2 + $0xc2] sm:$0xff] }
  0x42   : > { %9409 = vst [vmem:[#allocation29_spill] sm:$0xff] %v7070_v44  ;;  %9410 = vst [vmem:[#allocation30_spill] sm:$0xff] %v7073_v45  ;;  %554 = vrot.lane.b32.xlu1 %v7034_v37, %s6728_s10  ;;  %v7186_v11 = vld [vmem:[#allocation2 + $0xe1] sm:$0xff]  ;;  %v7188_v1 = vld [vmem:[#allocation2 + $0xd9] sm:$0xff] }
  0x43   : > { %9411 = vst [vmem:[#allocation31_spill] sm:$0xff] %v7076_v46  ;;  %365 = vst.msk [vmem:[#allocation2 + $0x139] sm:$0xff] %vm284_vm0, %v7070_v44  ;;  %552 = vrot.lane.b32.xlu0 %v7051_v41, %s6728_s10  ;;  %v7210_v43 = vld [vmem:[#allocation2 + $0xfa] sm:$0xff]  ;;  %v7212_v44 = vld [vmem:[#allocation2 + $0xf2] sm:$0xff] }
  0x44   : > { %367 = vst.msk [vmem:[#allocation2 + $0x151] sm:$0xff] %vm284_vm0, %v7073_v45  ;;  %368 = vst.msk [vmem:[#allocation2 + $0x159] sm:$0xff] %vm284_vm0, %v7076_v46  ;;  %v7202_v46 = vld [vmem:[#allocation2 + $0xf9] sm:$0xff]  ;;  %v7204_v45 = vld [vmem:[#allocation2 + $0xf1] sm:$0xff] }
  0x45   : > { %9412 = vst [vmem:[#allocation32_spill] sm:$0xff] %v7085_v47  ;;  %9413 = vst [vmem:[#allocation33_spill] sm:$0xff] %v7088_v48  ;;  %v7218_v40 = vld [vmem:[#allocation2 + $0x111] sm:$0xff]  ;;  %v5950_v24 = vld [vmem:[%s9337_s1 + $0x20] sm:$0xff] }
  0x46   : > { %369 = vst.msk [vmem:[#allocation2 + $0x169] sm:$0xff] %vm284_vm0, %v7085_v47  ;;  %370 = vst.msk [vmem:[#allocation2 + $0x171] sm:$0xff] %vm284_vm0, %v7088_v48  ;;  %682 = vrot.lane.b32.xlu1 %v7098_v49, %s6727_s9  ;;  %v7194_v48 = vld [vmem:[#allocation2 + $0xe2] sm:$0xff]  ;;  %v7196_v47 = vld [vmem:[#allocation2 + $0xda] sm:$0xff] }
  0x47   : > { %680 = vrot.lane.b32.xlu0 %v7100_v50, %s6727_s9  ;;  %v7220_v42 = vld [vmem:[#allocation2 + $0x109] sm:$0xff]  ;;  %v7226_v38 = vld [vmem:[#allocation2 + $0x112] sm:$0xff]  ;;  %v7365_v5 = vld [vmem:[#allocation2 + $0x80] sm:$0xff] }
  0x48   : > { %v7228_v39 = vld [vmem:[#allocation2 + $0x10a] sm:$0xff]  ;;  %v7236_v36 = vld [vmem:[#allocation2 + $0x121] sm:$0xff]  ;;  %v5949_v23 = vld [vmem:[%s9337_s1 + $0x18] sm:$0xff] }
  0x49   : > { %v7234_v27 = vld [vmem:[#allocation2 + $0x129] sm:$0xff]  ;;  %v471_v21 = vld [vmem:[#allocation2 + $0x141] sm:$0xff]  ;;  %v6673_v19 = vpack.c.bf16 %v5950_v24, %v5949_v23 }
  0x4a   : > { %558 = vrot.lane.b32.xlu1 %v7106_v51, %s6728_s10  ;;  %v7242_v25 = vld [vmem:[#allocation2 + $0x12a] sm:$0xff]  ;;  %v7244_v26 = vld [vmem:[#allocation2 + $0x122] sm:$0xff]  ;;  %v7256_v22 = vld [vmem:[#allocation2 + $0x139] sm:$0xff] }
  0x4b   : > { %556 = vrot.lane.b32.xlu0 %v7108_v52, %s6728_s10  ;;  %6674 = vmatprep.subr.bf16.mxu1 %v6673_v19  ;;  %v503_v20 = vld [vmem:[#allocation2 + $0x142] sm:$0xff]  ;;  %v502_v17 = vld [vmem:[#allocation2 + $0x13a] sm:$0xff]  ;;  %v472_v23 = vld [vmem:[#allocation2 + $0x151] sm:$0xff] }
  0x4c   : > { %6676 = vmatpush3.bf16.msra.mxu1 %v6673_v19  ;;  %v7320_v12 = vld [vmem:[#allocation2 + $0x48] sm:$0xff] }
  0x4d   : > { %6398 = vmatprep.subr.mxu1 %v5951_v18  ;;  %v506_v14 = vld [vmem:[#allocation2 + $0x16a] sm:$0xff] }
  0x4e   : > { %686 = vrot.lane.b32.xlu1 %v7114_v53, %s6727_s9 }
  0x4f   : > { %684 = vrot.lane.b32.xlu0 %v7116_v54, %s6727_s9 }
  0x50   : > { %6399 = vmatpush3.msra.mxu1 %v5951_v18  ;;  %v413_v18 = vld [vmem:[#allocation2 + $0x8] sm:$0xff] }
  0x52   : > { %562 = vrot.lane.b32.xlu1 %v7122_v55, %s6728_s10 }
  0x53   : > { %560 = vrot.lane.b32.xlu0 %v7124_v56, %s6728_s10 }
  0x56   : > { %690 = vrot.lane.b32.xlu1 %v7130_v57, %s6727_s9 }
  0x57   : > { %688 = vrot.lane.b32.xlu0 %v7132_v58, %s6727_s9 }
  0x5a   : > { %566 = vrot.lane.b32.xlu1 %v7138_v59, %s6728_s10 }
  0x5b   : > { %564 = vrot.lane.b32.xlu0 %v7140_v60, %s6728_s10 }
  0x5e   : > { %694 = vrot.lane.b32.xlu1 %v7146_v61, %s6727_s9 }
  0x5f   : > { %692 = vrot.lane.b32.xlu0 %v7148_v62, %s6727_s9 }
  0x62   : > { %570 = vrot.lane.b32.xlu1 %v7154_v63, %s6728_s10 }
  0x63   : > { %568 = vrot.lane.b32.xlu0 %v7156_v0, %s6728_s10 }
  0x66   : > { %698 = vrot.lane.b32.xlu1 %v7162_v2, %s6727_s9 }
  0x67   : > { %696 = vrot.lane.b32.xlu0 %v7164_v3, %s6727_s9 }
  0x6a   : > { %574 = vrot.lane.b32.xlu1 %v7170_v4, %s6728_s10 }
  0x6b   : > { %572 = vrot.lane.b32.xlu0 %v7172_v8, %s6728_s10 }
  0x6e   : > { %702 = vrot.lane.b32.xlu1 %v7178_v9, %s6727_s9 }
  0x6f   : > { %700 = vrot.lane.b32.xlu0 %v7180_v10, %s6727_s9 }
  0x72   : > { %578 = vrot.lane.b32.xlu1 %v7186_v11, %s6728_s10 }
  0x73   : > { %576 = vrot.lane.b32.xlu0 %v7188_v1, %s6728_s10 }
  0x76   : > { %706 = vrot.lane.b32.xlu1 %v7194_v48, %s6727_s9 }
  0x77   : > { %704 = vrot.lane.b32.xlu0 %v7196_v47, %s6727_s9 }
  0x7a   : > { %582 = vrot.lane.b32.xlu1 %v7202_v46, %s6728_s10 }
  0x7b   : > { %580 = vrot.lane.b32.xlu0 %v7204_v45, %s6728_s10 }
  0x7e   : > { %710 = vrot.lane.b32.xlu1 %v7210_v43, %s6727_s9 }
  0x7f   : > { %708 = vrot.lane.b32.xlu0 %v7212_v44, %s6727_s9 }
  0x82   : > { %586 = vrot.lane.b32.xlu1 %v7218_v40, %s6728_s10 }
  0x83   : > { %584 = vrot.lane.b32.xlu0 %v7220_v42, %s6728_s10 }
  0x86   : > { %714 = vrot.lane.b32.xlu1 %v7226_v38, %s6727_s9 }
  0x87   : > { %712 = vrot.lane.b32.xlu0 %v7228_v39, %s6727_s9 }
  0x88   : > { %v669_v19 = vpop.permute.xlu1 %668 }
  0x89   : > { %v541_v24 = vpop.permute.xlu0 %540 }
  0x8a   : > { %590 = vrot.lane.b32.xlu1 %v7234_v27, %s6728_s10 }
  0x8b   : > { %588 = vrot.lane.b32.xlu0 %v7236_v36, %s6728_s10 }
  0x8e   : > { %718 = vrot.lane.b32.xlu1 %v7242_v25, %s6727_s9 }
  0x8f   : > { %716 = vrot.lane.b32.xlu0 %v7244_v26, %s6727_s9 }
  0x92   : > { %594 = vrot.lane.b32.xlu1 %v471_v21, %s6728_s10  ;;  %v412_v21 = vld [vmem:[#allocation2] sm:$0xff] }
  0x93   : > { %592 = vrot.lane.b32.xlu0 %v7256_v22, %s6728_s10  ;;  %v764_v15 = vsel %vm284_vm0, %v412_v21, %v541_v24  ;;  %v7282_v24 = vld [vmem:[#allocation2 + $0x20] sm:$0xff] }
  0x96   : > { %722 = vrot.lane.b32.xlu1 %v503_v20, %s6727_s9  ;;  %v473_v20 = vld [vmem:[#allocation2 + $0x159] sm:$0xff] }
  0x97   : > { %720 = vrot.lane.b32.xlu0 %v502_v17, %s6727_s9  ;;  %v797_v17 = vsel %vm796_vm2, %v764_v15, %v669_v19 }
  0x98   : > { %6346 = vmatprep.mubr.msk.f32.mxu0 %vm864_vm3, %v797_v17  ;;  %v7284_v17 = vld [vmem:[#allocation2 + $0x18] sm:$0xff] }
  0x9a   : > { %1380 = vrot.lane.b32.xlu1 %v6997_v28, %s6728_s10  ;;  %v671_v28 = vpop.permute.xlu1 %670 }
  0x9b   : > { %1378 = vrot.lane.b32.xlu0 %v6999_v29, %s6728_s10  ;;  %v543_v29 = vpop.permute.xlu0 %542 }
  0x9c   : > { %v765_v16 = vsel %vm284_vm0, %v413_v18, %v543_v29 }
  0x9d   : > { %v798_v21 = vsel %vm796_vm2, %v765_v16, %v671_v28 }
  0x9e   : > { %596 = vrot.lane.b32.xlu1 %v472_v23, %s6728_s10  ;;  %6347 = vmatmul.mubr.msk.f32.vlgmr.msra.gmra.mrb[0].mxu0 %vm864_vm3, %v798_v21  ;;  %v504_v23 = vld [vmem:[#allocation2 + $0x152] sm:$0xff]  ;;  %v474_v21 = vld [vmem:[#allocation2 + $0x169] sm:$0xff] }
  0x9f   : > { %1506 = vrot.lane.b32.xlu0 %v7013_v31, %s6727_s9  ;;  %v505_v31 = vld [vmem:[#allocation2 + $0x15a] sm:$0xff] }
  0xa2   : > { %598 = vrot.lane.b32.xlu1 %v473_v20, %s6728_s10 }
  0xa3   : > { %1508 = vrot.lane.b32.xlu0 %v7011_v30, %s6727_s9 }
  0xa4   : > { %v547_v15 = vpop.permute.xlu1 %546 }
  0xa5   : > { %v545_v19 = vpop.permute.xlu0 %544  ;;  %v767_v18 = vsel %vm284_vm0, %v7282_v24, %v547_v15  ;;  %v7300_v15 = vld [vmem:[#allocation2 + $0x38] sm:$0xff] }
  0xa6   : > { %726 = vrot.lane.b32.xlu1 %v505_v31, %s6727_s9  ;;  %v766_v16 = vsel %vm284_vm0, %v7284_v17, %v545_v19  ;;  %v7302_v19 = vld [vmem:[#allocation2 + $0x30] sm:$0xff] }
  0xa7   : > { %724 = vrot.lane.b32.xlu0 %v504_v23, %s6727_s9 }
  0xa8   : > { %v675_v30 = vpop.permute.xlu1 %674 }
  0xa9   : > { %v673_v20 = vpop.permute.xlu0 %672  ;;  %v800_v28 = vsel %vm796_vm2, %v767_v18, %v675_v30  ;;  %v475_v18 = vld [vmem:[#allocation2 + $0x171] sm:$0xff] }
  0xaa   : > { %v799_v29 = vsel %vm796_vm2, %v766_v16, %v673_v20  ;;  %1384 = vrot.lane.b32.xlu1 %v7019_v32, %s6728_s10 }
  0xab   : > { %1382 = vrot.lane.b32.xlu0 %v7021_v33, %s6728_s10  ;;  %6349 = vmatprep.mubr.msk.f32.mxu0 %vm864_vm3, %v799_v29 }
  0xac   : > { %6350 = vmatmul.mubr.msk.f32.gmra.mrb[2].mxu0 %vm864_vm3, %v800_v28  ;;  %v551_v31 = vpop.permute.xlu1 %550 }
  0xad   : > { %v549_v23 = vpop.permute.xlu0 %548  ;;  %v769_v16 = vsel %vm284_vm0, %v7300_v15, %v551_v31 }
  0xae   : > { %600 = vrot.lane.b32.xlu1 %v474_v21, %s6728_s10  ;;  %v768_v30 = vsel %vm284_vm0, %v7302_v19, %v549_v23  ;;  %v507_v21 = vld [vmem:[#allocation2 + $0x172] sm:$0xff] }
  0xaf   : > { %1510 = vrot.lane.b32.xlu0 %v7029_v35, %s6727_s9  ;;  %v7318_v23 = vld [vmem:[#allocation2 + $0x50] sm:$0xff] }
  0xb0   : > { %v679_v20 = vpop.permute.xlu1 %678 }
  0xb1   : > { %v677_v28 = vpop.permute.xlu0 %676  ;;  %v802_v29 = vsel %vm796_vm2, %v769_v16, %v679_v20 }
  0xb2   : > { %v801_v13 = vsel %vm796_vm2, %v768_v30, %v677_v28  ;;  %602 = vrot.lane.b32.xlu1 %v475_v18, %s6728_s10  ;;  %v5984_v18 = vld [vmem:[%s9337_s1 + $0x30] sm:$0xff] }
  0xb3   : > { %1512 = vrot.lane.b32.xlu0 %v7027_v34, %s6727_s9  ;;  %6352 = vmatprep.mubr.msk.f32.mxu0 %vm864_vm3, %v801_v13  ;;  %v5985_v13 = vld [vmem:[%s9337_s1 + $0x38] sm:$0xff] }
  0xb4   : > { %6353 = vmatmul.mubr.msk.f32.gmra.mrb[4].mxu0 %vm864_vm3, %v802_v29  ;;  %v555_v31 = vpop.permute.xlu1 %554  ;;  %v6677_v16 = vpack.c.bf16 %v5985_v13, %v5984_v18  ;;  %v7345_v13 = vld [vmem:[#allocation2 + $0x68] sm:$0xff] }
  0xb5   : > { %v553_v7 = vpop.permute.xlu0 %552  ;;  %v771_v30 = vsel %vm284_vm0, %v7318_v23, %v555_v31 }
  0xb6   : > { %730 = vrot.lane.b32.xlu1 %v507_v21, %s6727_s9  ;;  %v770_v20 = vsel %vm284_vm0, %v7320_v12, %v553_v7  ;;  %6678 = vmatprep.subr.bf16.mxu0 %v6677_v16  ;;  %v5986_v7 = vld [vmem:[%s9337_s1 + $0x40] sm:$0xff] }
  0xb7   : > { %728 = vrot.lane.b32.xlu0 %v506_v14, %s6727_s9  ;;  %6680 = vmatpush3.bf16.msra.mxu0 %v6677_v16 }
  0xb8   : > { %v683_v28 = vpop.permute.xlu1 %682  ;;  %6452 = vmatprep.subr.mxu0 %v5986_v7 }
  0xb9   : > { %v681_v29 = vpop.permute.xlu0 %680  ;;  %v804_v21 = vsel %vm796_vm2, %v771_v30, %v683_v28  ;;  %v7347_v30 = vld [vmem:[#allocation2 + $0x60] sm:$0xff] }
  0xba   : > { %v803_v14 = vsel %vm796_vm2, %v770_v20, %v681_v29  ;;  %1388 = vrot.lane.b32.xlu1 %v7034_v37, %s6728_s10 }
  0xbb   : > { %1386 = vrot.lane.b32.xlu0 %v7051_v41, %s6728_s10  ;;  %6355 = vmatprep.mubr.msk.f32.mxu0 %vm864_vm3, %v803_v14 }
  0xbc   : > { %6356 = vmatmul.mubr.msk.f32.gmra.mrb[6].mxu0 %vm864_vm3, %v804_v21  ;;  %v559_v31 = vpop.permute.xlu1 %558 }
  0xbd   : > { %v557_v18 = vpop.permute.xlu0 %556  ;;  %6453 = vmatpush3.msra.mxu0 %v5986_v7  ;;  %v773_v16 = vsel %vm284_vm0, %v7345_v13, %v559_v31 }
  0xbe   : > { %1516 = vrot.lane.b32.xlu1 %v7098_v49, %s6727_s9  ;;  %v772_v20 = vsel %vm284_vm0, %v7347_v30, %v557_v18  ;;  %v7367_v18 = vld [vmem:[#allocation2 + $0x78] sm:$0xff] }
  0xbf   : > { %1514 = vrot.lane.b32.xlu0 %v7100_v50, %s6727_s9 }
  0xc0   : > { %v687_v28 = vpop.permute.xlu1 %686 }
  0xc1   : > { %v685_v29 = vpop.permute.xlu0 %684  ;;  %v806_v21 = vsel %vm796_vm2, %v773_v16, %v687_v28 }
  0xc2   : > { %v805_v14 = vsel %vm796_vm2, %v772_v20, %v685_v29  ;;  %2218 = vrot.lane.b32.xlu1 %v7019_v32, %s6728_s10 }
  0xc3   : > { %2216 = vrot.lane.b32.xlu0 %v7021_v33, %s6728_s10  ;;  %6358 = vmatprep.mubr.msk.f32.mxu0 %vm864_vm3, %v805_v14  ;;  %v7385_v14 = vld [vmem:[#allocation2 + $0x98] sm:$0xff] }
  0xc4   : > { %6359 = vmatmul.mubr.msk.f32.gmra.mrb[8].mxu0 %vm864_vm3, %v806_v21  ;;  %v563_v7 = vpop.permute.xlu1 %562 }
  0xc5   : > { %v561_v31 = vpop.permute.xlu0 %560  ;;  %v775_v32 = vsel %vm284_vm0, %v7365_v5, %v563_v7  ;;  %v7387_v7 = vld [vmem:[#allocation2 + $0x90] sm:$0xff] }
  0xc6   : > { %1390 = vrot.lane.b32.xlu1 %v7108_v52, %s6728_s10  ;;  %v774_v33 = vsel %vm284_vm0, %v7367_v18, %v561_v31 }
  0xc7   : > { %2344 = vrot.lane.b32.xlu0 %v7029_v35, %s6727_s9 }
  0xc8   : > { %v691_v16 = vpop.permute.xlu1 %690 }
  0xc9   : > { %v689_v20 = vpop.permute.xlu0 %688  ;;  %v808_v28 = vsel %vm796_vm2, %v775_v32, %v691_v16 }
  0xca   : > { %v807_v29 = vsel %vm796_vm2, %v774_v33, %v689_v20  ;;  %1392 = vrot.lane.b32.xlu1 %v7106_v51, %s6728_s10 }
  0xcb   : > { %2346 = vrot.lane.b32.xlu0 %v7027_v34, %s6727_s9  ;;  %6361 = vmatprep.mubr.msk.f32.mxu0 %vm864_vm3, %v807_v29 }
  0xcc   : > { %6362 = vmatmul.mubr.msk.f32.gmra.mrb[10].mxu0 %vm864_vm3, %v808_v28  ;;  %v567_v35 = vpop.permute.xlu1 %566 }
  0xcd   : > { %v565_v21 = vpop.permute.xlu0 %564  ;;  %v777_v31 = vsel %vm284_vm0, %v7385_v14, %v567_v35  ;;  %v7405_v35 = vld [vmem:[#allocation2 + $0xb0] sm:$0xff] }
  0xce   : > { %1520 = vrot.lane.b32.xlu1 %v7114_v53, %s6727_s9  ;;  %v776_v34 = vsel %vm284_vm0, %v7387_v7, %v565_v21  ;;  %v7407_v21 = vld [vmem:[#allocation2 + $0xa8] sm:$0xff] }
  0xcf   : > { %1518 = vrot.lane.b32.xlu0 %v7116_v54, %s6727_s9 }
  0xd0   : > { %v695_v32 = vpop.permute.xlu1 %694 }
  0xd1   : > { %v693_v33 = vpop.permute.xlu0 %692  ;;  %v810_v16 = vsel %vm796_vm2, %v777_v31, %v695_v32 }
  0xd2   : > { %v809_v20 = vsel %vm796_vm2, %v776_v34, %v693_v33  ;;  %2222 = vrot.lane.b32.xlu1 %v7034_v37, %s6728_s10 }
  0xd3   : > { %2220 = vrot.lane.b32.xlu0 %v7051_v41, %s6728_s10  ;;  %6364 = vmatprep.mubr.msk.f32.mxu0 %vm864_vm3, %v809_v20  ;;  %v7425_v20 = vld [vmem:[#allocation2 + $0xc8] sm:$0xff] }
  0xd4   : > { %6365 = vmatmul.mubr.msk.f32.gmra.mrb[12].mxu0 %vm864_vm3, %v810_v16  ;;  %v571_v28 = vpop.permute.xlu1 %570 }
  0xd5   : > { %v569_v29 = vpop.permute.xlu0 %568  ;;  %v779_v37 = vsel %vm284_vm0, %v7405_v35, %v571_v28  ;;  %v7427_v28 = vld [vmem:[#allocation2 + $0xc0] sm:$0xff] }
  0xd6   : > { %1394 = vrot.lane.b32.xlu1 %v7124_v56, %s6728_s10  ;;  %v778_v41 = vsel %vm284_vm0, %v7407_v21, %v569_v29 }
  0xd7   : > { %2348 = vrot.lane.b32.xlu0 %v7100_v50, %s6727_s9 }
  0xd8   : > { %v699_v31 = vpop.permute.xlu1 %698 }
  0xd9   : > { %v697_v34 = vpop.permute.xlu0 %696  ;;  %v812_v32 = vsel %vm796_vm2, %v779_v37, %v699_v31 }
  0xda   : > { %v811_v33 = vsel %vm796_vm2, %v778_v41, %v697_v34  ;;  %1396 = vrot.lane.b32.xlu1 %v7122_v55, %s6728_s10 }
  0xdb   : > { %2350 = vrot.lane.b32.xlu0 %v7098_v49, %s6727_s9  ;;  %6367 = vmatprep.mubr.msk.f32.mxu0 %vm864_vm3, %v811_v33 }
  0xdc   : > { %6368 = vmatmul.mubr.msk.f32.gmra.mrb[14].mxu0 %vm864_vm3, %v812_v32  ;;  %v575_v50 = vpop.permute.xlu1 %574 }
  0xdd   : > { %v573_v16 = vpop.permute.xlu0 %572  ;;  %v781_v29 = vsel %vm284_vm0, %v7425_v20, %v575_v50  ;;  %v7445_v50 = vld [vmem:[#allocation2 + $0xe0] sm:$0xff] }
  0xde   : > { %1524 = vrot.lane.b32.xlu1 %v7130_v57, %s6727_s9  ;;  %v780_v49 = vsel %vm284_vm0, %v7427_v28, %v573_v16  ;;  %v7447_v16 = vld [vmem:[#allocation2 + $0xd8] sm:$0xff] }
  0xdf   : > { %1522 = vrot.lane.b32.xlu0 %v7132_v58, %s6727_s9 }
  0xe0   : > { %v703_v37 = vpop.permute.xlu1 %702 }
  0xe1   : > { %v701_v41 = vpop.permute.xlu0 %700  ;;  %v814_v31 = vsel %vm796_vm2, %v781_v29, %v703_v37 }
  0xe2   : > { %v813_v34 = vsel %vm796_vm2, %v780_v49, %v701_v41  ;;  %2226 = vrot.lane.b32.xlu1 %v7106_v51, %s6728_s10 }
  0xe3   : > { %2224 = vrot.lane.b32.xlu0 %v7108_v52, %s6728_s10  ;;  %6370 = vmatprep.mubr.msk.f32.mxu0 %vm864_vm3, %v813_v34  ;;  %v433_v34 = vld [vmem:[#allocation2 + $0xf8] sm:$0xff] }
  0xe4   : > { %6371 = vmatmul.mubr.msk.f32.gmra.mrb[16].mxu0 %vm864_vm3, %v814_v31  ;;  %v579_v32 = vpop.permute.xlu1 %578 }
  0xe5   : > { %v577_v33 = vpop.permute.xlu0 %576  ;;  %v783_v51 = vsel %vm284_vm0, %v7445_v50, %v579_v32  ;;  %v432_v32 = vld [vmem:[#allocation2 + $0xf0] sm:$0xff] }
  0xe6   : > { %1398 = vrot.lane.b32.xlu1 %v7140_v60, %s6728_s10  ;;  %v782_v52 = vsel %vm284_vm0, %v7447_v16, %v577_v33  ;;  %v5916_v33 = vld [vmem:[%s9338_s2] ss:$0 sm:$0xff] }
  0xe7   : > { %2352 = vrot.lane.b32.xlu0 %v7116_v54, %s6727_s9  ;;  %381 = vst.msk [vmem:[#allocation3 + $0x8] sm:$0xff] %vm284_vm0, %v5916_v33  ;;  %380 = vst.msk [vmem:[#allocation3] sm:$0xff] %vm284_vm0, %v5916_v33 }
  0xe8   : > { %v707_v29 = vpop.permute.xlu1 %706  ;;  %382 = vst.msk [vmem:[#allocation3 + $0x10] sm:$0xff] %vm284_vm0, %v5916_v33  ;;  %383 = vst.msk [vmem:[#allocation3 + $0x18] sm:$0xff] %vm284_vm0, %v5916_v33 }
  0xe9   : > { %v705_v49 = vpop.permute.xlu0 %704  ;;  %v816_v37 = vsel %vm796_vm2, %v783_v51, %v707_v29  ;;  %384 = vst.msk [vmem:[#allocation3 + $0x20] sm:$0xff] %vm284_vm0, %v5916_v33  ;;  %385 = vst.msk [vmem:[#allocation3 + $0x28] sm:$0xff] %vm284_vm0, %v5916_v33 }
  0xea   : > { %v815_v41 = vsel %vm796_vm2, %v782_v52, %v705_v49  ;;  %1400 = vrot.lane.b32.xlu1 %v7138_v59, %s6728_s10  ;;  %386 = vst.msk [vmem:[#allocation3 + $0x30] sm:$0xff] %vm284_vm0, %v5916_v33  ;;  %387 = vst.msk [vmem:[#allocation3 + $0x38] sm:$0xff] %vm284_vm0, %v5916_v33 }
  0xeb   : > { %2354 = vrot.lane.b32.xlu0 %v7114_v53, %s6727_s9  ;;  %6373 = vmatprep.mubr.msk.f32.mxu0 %vm864_vm3, %v815_v41  ;;  %388 = vst.msk [vmem:[#allocation3 + $0x40] sm:$0xff] %vm284_vm0, %v5916_v33  ;;  %389 = vst.msk [vmem:[#allocation3 + $0x48] sm:$0xff] %vm284_vm0, %v5916_v33 }
  0xec   : > { %6374 = vmatmul.mubr.msk.f32.gmra.mrb[18].mxu0 %vm864_vm3, %v816_v37  ;;  %v583_v54 = vpop.permute.xlu1 %582  ;;  %390 = vst.msk [vmem:[#allocation3 + $0x50] sm:$0xff] %vm284_vm0, %v5916_v33  ;;  %391 = vst.msk [vmem:[#allocation3 + $0x58] sm:$0xff] %vm284_vm0, %v5916_v33 }
  0xed   : > { %v581_v31 = vpop.permute.xlu0 %580  ;;  %v785_v53 = vsel %vm284_vm0, %v433_v34, %v583_v54  ;;  %392 = vst.msk [vmem:[#allocation3 + $0x60] sm:$0xff] %vm284_vm0, %v5916_v33  ;;  %393 = vst.msk [vmem:[#allocation3 + $0x68] sm:$0xff] %vm284_vm0, %v5916_v33  ;;  %v434_v34 = vld [vmem:[#allocation2 + $0x108] sm:$0xff] }
  0xee   : > { %1528 = vrot.lane.b32.xlu1 %v7146_v61, %s6727_s9  ;;  %v784_v51 = vsel %vm284_vm0, %v432_v32, %v581_v31  ;;  %394 = vst.msk [vmem:[#allocation3 + $0x70] sm:$0xff] %vm284_vm0, %v5916_v33  ;;  %395 = vst.msk [vmem:[#allocation3 + $0x78] sm:$0xff] %vm284_vm0, %v5916_v33  ;;  %v435_v31 = vld [vmem:[#allocation2 + $0x110] sm:$0xff] }
  0xef   : > { %1526 = vrot.lane.b32.xlu0 %v7148_v62, %s6727_s9  ;;  %396 = vst.msk [vmem:[#allocation3 + $0x80] sm:$0xff] %vm284_vm0, %v5916_v33  ;;  %397 = vst.msk [vmem:[#allocation3 + $0x88] sm:$0xff] %vm284_vm0, %v5916_v33 }
  0xf0   : > { %v711_v52 = vpop.permute.xlu1 %710  ;;  %398 = vst.msk [vmem:[#allocation3 + $0x90] sm:$0xff] %vm284_vm0, %v5916_v33  ;;  %399 = vst.msk [vmem:[#allocation3 + $0x98] sm:$0xff] %vm284_vm0, %v5916_v33 }
  0xf1   : > { %v709_v29 = vpop.permute.xlu0 %708  ;;  %400 = vst.msk [vmem:[#allocation3 + $0xa0] sm:$0xff] %vm284_vm0, %v5916_v33  ;;  %401 = vst.msk [vmem:[#allocation3 + $0xa8] sm:$0xff] %vm284_vm0, %v5916_v33  ;;  %v818_v49 = vsel %vm796_vm2, %v785_v53, %v711_v52 }
  0xf2   : > { %402 = vst.msk [vmem:[#allocation3 + $0xb0] sm:$0xff] %vm284_vm0, %v5916_v33  ;;  %403 = vst.msk [vmem:[#allocation3 + $0xb8] sm:$0xff] %vm284_vm0, %v5916_v33  ;;  %v817_v37 = vsel %vm796_vm2, %v784_v51, %v709_v29  ;;  %2230 = vrot.lane.b32.xlu1 %v7122_v55, %s6728_s10  ;;  %v437_v29 = vld [vmem:[#allocation2 + $0x128] sm:$0xff] }
  0xf3   : > { %404 = vst.msk [vmem:[#allocation3 + $0xc0] sm:$0xff] %vm284_vm0, %v5916_v33  ;;  %405 = vst.msk [vmem:[#allocation3 + $0xc8] sm:$0xff] %vm284_vm0, %v5916_v33  ;;  %2228 = vrot.lane.b32.xlu0 %v7124_v56, %s6728_s10  ;;  %6376 = vmatprep.mubr.msk.f32.mxu0 %vm864_vm3, %v817_v37 }
  0xf4   : > { %406 = vst.msk [vmem:[#allocation3 + $0xd0] sm:$0xff] %vm284_vm0, %v5916_v33  ;;  %407 = vst.msk [vmem:[#allocation3 + $0xd8] sm:$0xff] %vm284_vm0, %v5916_v33  ;;  %6377 = vmatmul.mubr.msk.f32.gmra.mrb[20].mxu0 %vm864_vm3, %v818_v49  ;;  %v587_v41 = vpop.permute.xlu1 %586  ;;  %v436_v49 = vld [vmem:[#allocation2 + $0x120] sm:$0xff] }
  0xf5   : > { %408 = vst.msk [vmem:[#allocation3 + $0xe0] sm:$0xff] %vm284_vm0, %v5916_v33  ;;  %409 = vst.msk [vmem:[#allocation3 + $0xe8] sm:$0xff] %vm284_vm0, %v5916_v33  ;;  %v585_v54 = vpop.permute.xlu0 %584  ;;  %v787_v32 = vsel %vm284_vm0, %v435_v31, %v587_v41 }
  0xf6   : > { %410 = vst.msk [vmem:[#allocation3 + $0xf0] sm:$0xff] %vm284_vm0, %v5916_v33  ;;  %411 = vst.msk [vmem:[#allocation3 + $0xf8] sm:$0xff] %vm284_vm0, %v5916_v33  ;;  %1402 = vrot.lane.b32.xlu1 %v7156_v0, %s6728_s10  ;;  %v786_v55 = vsel %vm284_vm0, %v434_v34, %v585_v54 }
  0xf7   : > { %2356 = vrot.lane.b32.xlu0 %v7132_v58, %s6727_s9 }
  0xf8   : > { %v715_v33 = vpop.permute.xlu1 %714 }
  0xf9   : > { %v713_v56 = vpop.permute.xlu0 %712  ;;  %v820_v53 = vsel %vm796_vm2, %v787_v32, %v715_v33  ;;  %v439_v33 = vld [vmem:[#allocation2 + $0x140] sm:$0xff] }
  0xfa   : > { %v819_v51 = vsel %vm796_vm2, %v786_v55, %v713_v56  ;;  %1404 = vrot.lane.b32.xlu1 %v7154_v63, %s6728_s10  ;;  %v438_v56 = vld [vmem:[#allocation2 + $0x138] sm:$0xff] }
  0xfb   : > { %2358 = vrot.lane.b32.xlu0 %v7130_v57, %s6727_s9  ;;  %6379 = vmatprep.mubr.msk.f32.mxu0 %vm864_vm3, %v819_v51 }
  0xfc   : > { %6380 = vmatmul.mubr.msk.f32.gmra.mrb[22].mxu0 %vm864_vm3, %v820_v53  ;;  %v591_v58 = vpop.permute.xlu1 %590 }
  0xfd   : > { %v589_v52 = vpop.permute.xlu0 %588  ;;  %v789_v37 = vsel %vm284_vm0, %v437_v29, %v591_v58  ;;  %v7555_v29 = vld [vmem:[%s6902_s8 + $0xf0] sm:$0xff] }
  0xfe   : > { %1532 = vrot.lane.b32.xlu1 %v7162_v2, %s6727_s9  ;;  %v788_v41 = vsel %vm284_vm0, %v436_v49, %v589_v52  ;;  %9414 = vst [vmem:[#allocation34_spill] sm:$0xff] %v7555_v29  ;;  %371 = vst.msk [vmem:[#allocation2 + $0x181] sm:$0xff] %vm284_vm0, %v7555_v29 }
  0xff   : > { %1530 = vrot.lane.b32.xlu0 %v7164_v3, %s6727_s9 }
 0x100   : > { %v719_v54 = vpop.permute.xlu1 %718 }
 0x101   : > { %v717_v57 = vpop.permute.xlu0 %716  ;;  %v822_v31 = vsel %vm796_vm2, %v789_v37, %v719_v54 }
 0x102   : > { %v821_v34 = vsel %vm796_vm2, %v788_v41, %v717_v57  ;;  %2234 = vrot.lane.b32.xlu1 %v7138_v59, %s6728_s10 }
 0x103   : > { %2232 = vrot.lane.b32.xlu0 %v7140_v60, %s6728_s10  ;;  %6382 = vmatprep.mubr.msk.f32.mxu0 %vm864_vm3, %v821_v34 }
 0x104   : > { %6383 = vmatmul.mubr.msk.f32.gmra.mrb[24].mxu0 %vm864_vm3, %v822_v31  ;;  %v595_v32 = vpop.permute.xlu1 %594 }
 0x105   : > { %v593_v55 = vpop.permute.xlu0 %592  ;;  %v791_v59 = vsel %vm284_vm0, %v439_v33, %v595_v32  ;;  %v441_v33 = vld [vmem:[#allocation2 + $0x158] sm:$0xff] }
 0x106   : > { %1406 = vrot.lane.b32.xlu1 %v7172_v8, %s6728_s10  ;;  %v790_v60 = vsel %vm284_vm0, %v438_v56, %v593_v55  ;;  %v440_v55 = vld [vmem:[#allocation2 + $0x150] sm:$0xff] }
 0x107   : > { %2360 = vrot.lane.b32.xlu0 %v7148_v62, %s6727_s9  ;;  %v7561_v62 = vld [vmem:[%s6902_s8 + $0xf8] sm:$0xff] }
 0x108   : > { %v723_v53 = vpop.permute.xlu1 %722  ;;  %9415 = vst [vmem:[#allocation35_spill] sm:$0xff] %v7561_v62  ;;  %372 = vst.msk [vmem:[#allocation2 + $0x189] sm:$0xff] %vm284_vm0, %v7561_v62 }
 0x109   : > { %v721_v51 = vpop.permute.xlu0 %720  ;;  %v824_v58 = vsel %vm796_vm2, %v791_v59, %v723_v53 }
 0x10a   : > { %v823_v52 = vsel %vm796_vm2, %v790_v60, %v721_v51  ;;  %1408 = vrot.lane.b32.xlu1 %v7170_v4, %s6728_s10 }
 0x10b   : > { %2362 = vrot.lane.b32.xlu0 %v7146_v61, %s6727_s9  ;;  %6385 = vmatprep.mubr.msk.f32.mxu0 %vm864_vm3, %v823_v52 }
 0x10c   : > { %6386 = vmatmul.mubr.msk.f32.gmra.mrb[26].mxu0 %vm864_vm3, %v824_v58  ;;  %v1381_v49 = vpop.permute.xlu1 %1380 }
 0x10d   : > { %v1379_v37 = vpop.permute.xlu0 %1378  ;;  %v1603_v31 = vsel %vm284_vm0, %v7282_v24, %v1381_v49 }
 0x10e   : > { %1536 = vrot.lane.b32.xlu1 %v7178_v9, %s6727_s9  ;;  %v1602_v61 = vsel %vm284_vm0, %v7284_v17, %v1379_v37 }
 0x10f   : > { %1534 = vrot.lane.b32.xlu0 %v7180_v10, %s6727_s9 }
 0x110   : > { %v597_v41 = vpop.permute.xlu1 %596 }
 0x111   : > { %v1507_v54 = vpop.permute.xlu0 %1506 }
 0x112   : > { %v1634_v57 = vsel %vm796_vm2, %v1602_v61, %v1507_v54  ;;  %2238 = vrot.lane.b32.xlu1 %v7154_v63, %s6728_s10  ;;  %v792_v63 = vsel %vm284_vm0, %v440_v55, %v597_v41  ;;  %v442_v41 = vld [vmem:[#allocation2 + $0x168] sm:$0xff]  ;;  %v443_v54 = vld [vmem:[#allocation2 + $0x170] sm:$0xff] }
 0x113   : > { %2236 = vrot.lane.b32.xlu0 %v7156_v0, %s6728_s10  ;;  %6400 = vmatprep.mubr.msk.f32.mxu1 %vm864_vm3, %v1634_v57 }
 0x114   : > { %v599_v34 = vpop.permute.xlu1 %598 }
 0x115   : > { %v1509_v32 = vpop.permute.xlu0 %1508  ;;  %v793_v0 = vsel %vm284_vm0, %v441_v33, %v599_v34 }
 0x116   : > { %v1635_v17 = vsel %vm796_vm2, %v1603_v31, %v1509_v32  ;;  %1410 = vrot.lane.b32.xlu1 %v7188_v1, %s6728_s10 }
 0x117   : > { %2364 = vrot.lane.b32.xlu0 %v7164_v3, %s6727_s9  ;;  %6401 = vmatmul.mubr.msk.f32.vlgmr.msra.gmra.mrb[0].mxu1 %vm864_vm3, %v1635_v17 }
 0x118   : > { %v727_v56 = vpop.permute.xlu1 %726 }
 0x119   : > { %v725_v24 = vpop.permute.xlu0 %724  ;;  %v826_v59 = vsel %vm796_vm2, %v793_v0, %v727_v56 }
 0x11a   : > { %v825_v60 = vsel %vm796_vm2, %v792_v63, %v725_v24  ;;  %1412 = vrot.lane.b32.xlu1 %v7186_v11, %s6728_s10 }
 0x11b   : > { %2366 = vrot.lane.b32.xlu0 %v7162_v2, %s6727_s9  ;;  %6388 = vmatprep.mubr.msk.f32.mxu0 %vm864_vm3, %v825_v60 }
 0x11c   : > { %6389 = vmatmul.mubr.msk.f32.gmra.mrb[28].mxu0 %vm864_vm3, %v826_v59  ;;  %v1385_v3 = vpop.permute.xlu1 %1384 }
 0x11d   : > { %v1383_v53 = vpop.permute.xlu0 %1382  ;;  %v1605_v2 = vsel %vm284_vm0, %v7300_v15, %v1385_v3 }
 0x11e   : > { %1540 = vrot.lane.b32.xlu1 %v7194_v48, %s6727_s9  ;;  %v1604_v51 = vsel %vm284_vm0, %v7302_v19, %v1383_v53 }
 0x11f   : > { %1538 = vrot.lane.b32.xlu0 %v7196_v47, %s6727_s9 }
 0x120   : > { %v601_v58 = vpop.permute.xlu1 %600 }
 0x121   : > { %v1511_v52 = vpop.permute.xlu0 %1510 }
 0x122   : > { %v1636_v49 = vsel %vm796_vm2, %v1604_v51, %v1511_v52  ;;  %2242 = vrot.lane.b32.xlu1 %v7170_v4, %s6728_s10  ;;  %v794_v4 = vsel %vm284_vm0, %v442_v41, %v601_v58 }
 0x123   : > { %2240 = vrot.lane.b32.xlu0 %v7172_v8, %s6728_s10  ;;  %6403 = vmatprep.mubr.msk.f32.mxu1 %vm864_vm3, %v1636_v49  ;;  %v2169_v49 = vld [vmem:[#allocation2 + $0xfa] sm:$0xff] }
 0x124   : > { %v603_v37 = vpop.permute.xlu1 %602 }
 0x125   : > { %v1513_v61 = vpop.permute.xlu0 %1512  ;;  %v795_v8 = vsel %vm284_vm0, %v443_v54, %v603_v37 }
 0x126   : > { %v1637_v57 = vsel %vm796_vm2, %v1605_v2, %v1513_v61  ;;  %1414 = vrot.lane.b32.xlu1 %v7204_v45, %s6728_s10 }
 0x127   : > { %2368 = vrot.lane.b32.xlu0 %v7180_v10, %s6727_s9  ;;  %6404 = vmatmul.mubr.msk.f32.gmra.mrb[2].mxu1 %vm864_vm3, %v1637_v57 }
 0x128   : > { %v731_v31 = vpop.permute.xlu1 %730 }
 0x129   : > { %v729_v34 = vpop.permute.xlu0 %728  ;;  %v828_v32 = vsel %vm796_vm2, %v795_v8, %v731_v31 }
 0x12a   : > { %v827_v55 = vsel %vm796_vm2, %v794_v4, %v729_v34  ;;  %1416 = vrot.lane.b32.xlu1 %v7202_v46, %s6728_s10 }
 0x12b   : > { %2370 = vrot.lane.b32.xlu0 %v7178_v9, %s6727_s9  ;;  %6391 = vmatprep.mubr.msk.f32.mxu0 %vm864_vm3, %v827_v55  ;;  %v2171_v55 = vld [vmem:[#allocation2 + $0x112] sm:$0xff] }
 0x12c   : > { %6392 = vmatmul.mubr.msk.f32.gmra.mrb[30].mxu0 %vm864_vm3, %v828_v32  ;;  %v1389_v10 = vpop.permute.xlu1 %1388  ;;  %v1307_v32 = vld [vmem:[#allocation2 + $0x141] sm:$0xff] }
 0x12d   : > { %v1387_v33 = vpop.permute.xlu0 %1386  ;;  %v1607_v17 = vsel %vm284_vm0, %v7318_v23, %v1389_v10 }
 0x12e   : > { %1544 = vrot.lane.b32.xlu1 %v7210_v43, %s6727_s9  ;;  %v1606_v63 = vsel %vm284_vm0, %v7320_v12, %v1387_v33 }
 0x12f   : > { %1542 = vrot.lane.b32.xlu0 %v7212_v44, %s6727_s9 }
 0x130   : > { %v1517_v0 = vpop.permute.xlu1 %1516 }
 0x131   : > { %v1515_v9 = vpop.permute.xlu0 %1514  ;;  %v1639_v56 = vsel %vm796_vm2, %v1607_v17, %v1517_v0  ;;  %v7712_v0 = vld [vmem:[#allocation2 + $0x142] sm:$0xff] }
 0x132   : > { %v1638_v24 = vsel %vm796_vm2, %v1606_v63, %v1515_v9  ;;  %2246 = vrot.lane.b32.xlu1 %v7186_v11, %s6728_s10 }
 0x133   : > { %2244 = vrot.lane.b32.xlu0 %v7188_v1, %s6728_s10  ;;  %6406 = vmatprep.mubr.msk.f32.mxu1 %vm864_vm3, %v1638_v24 }
 0x134   : > { %6407 = vmatmul.mubr.msk.f32.gmra.mrb[4].mxu1 %vm864_vm3, %v1639_v56  ;;  %v2219_v43 = vpop.permute.xlu1 %2218 }
 0x135   : > { %v2217_v59 = vpop.permute.xlu0 %2216  ;;  %v2441_v1 = vsel %vm284_vm0, %v7300_v15, %v2219_v43  ;;  %v2141_v43 = vld [vmem:[#allocation2 + $0x129] sm:$0xff] }
 0x136   : > { %1418 = vrot.lane.b32.xlu1 %v7220_v42, %s6728_s10  ;;  %v2440_v60 = vsel %vm284_vm0, %v7302_v19, %v2217_v59  ;;  %v2140_v59 = vld [vmem:[#allocation2 + $0x121] sm:$0xff] }
 0x137   : > { %2372 = vrot.lane.b32.xlu0 %v7196_v47, %s6727_s9 }
 0x138   : > { %v1391_v3 = vpop.permute.xlu1 %1390 }
 0x139   : > { %v2345_v11 = vpop.permute.xlu0 %2344 }
 0x13a   : > { %v2472_v53 = vsel %vm796_vm2, %v2440_v60, %v2345_v11  ;;  %1420 = vrot.lane.b32.xlu1 %v7218_v40, %s6728_s10  ;;  %v1608_v40 = vsel %vm284_vm0, %v7347_v30, %v1391_v3 }
 0x13b   : > { %2374 = vrot.lane.b32.xlu0 %v7194_v48, %s6727_s9  ;;  %6454 = vmatprep.mubr.msk.f32.mxu0 %vm864_vm3, %v2472_v53 }
 0x13c   : > { %v1393_v42 = vpop.permute.xlu1 %1392 }
 0x13d   : > { %v2347_v47 = vpop.permute.xlu0 %2346  ;;  %v1609_v48 = vsel %vm284_vm0, %v7345_v13, %v1393_v42  ;;  %v7730_v42 = vld [vmem:[#allocation2 + $0x151] sm:$0xff] }
 0x13e   : > { %v2473_v51 = vsel %vm796_vm2, %v2441_v1, %v2347_v47  ;;  %1548 = vrot.lane.b32.xlu1 %v7226_v38, %s6727_s9  ;;  %v2172_v47 = vld [vmem:[#allocation2 + $0x122] sm:$0xff] }
 0x13f   : > { %1546 = vrot.lane.b32.xlu0 %v7228_v39, %s6727_s9  ;;  %6455 = vmatmul.mubr.msk.f32.vlgmr.msra.gmra.mrb[32].mxu0 %vm864_vm3, %v2473_v51 }
 0x140   : > { %v1521_v19 = vpop.permute.xlu1 %1520 }
 0x141   : > { %v1519_v15 = vpop.permute.xlu0 %1518  ;;  %v1641_v58 = vsel %vm796_vm2, %v1609_v48, %v1521_v19  ;;  %v7736_v48 = vld [vmem:[#allocation2 + $0x159] sm:$0xff]  ;;  %v2173_v19 = vld [vmem:[#allocation2 + $0x12a] sm:$0xff] }
 0x142   : > { %v1640_v52 = vsel %vm796_vm2, %v1608_v40, %v1519_v15  ;;  %2250 = vrot.lane.b32.xlu1 %v7202_v46, %s6728_s10 }
 0x143   : > { %2248 = vrot.lane.b32.xlu0 %v7204_v45, %s6728_s10  ;;  %6409 = vmatprep.mubr.msk.f32.mxu1 %vm864_vm3, %v1640_v52 }
 0x144   : > { %6410 = vmatmul.mubr.msk.f32.gmra.mrb[6].mxu1 %vm864_vm3, %v1641_v58  ;;  %v2223_v38 = vpop.permute.xlu1 %2222 }
 0x145   : > { %v2221_v39 = vpop.permute.xlu0 %2220 }
 0x146   : > { %1422 = vrot.lane.b32.xlu1 %v7236_v36, %s6728_s10  ;;  %v2442_v2 = vsel %vm284_vm0, %v7320_v12, %v2221_v39  ;;  %v2443_v36 = vsel %vm284_vm0, %v7318_v23, %v2223_v38  ;;  %v2139_v12 = vld [vmem:[#allocation2 + $0x111] sm:$0xff]  ;;  %v7745_v39 = vld [vmem:[#allocation2 + $0x15a] sm:$0xff] }
 0x147   : > { %2376 = vrot.lane.b32.xlu0 %v7212_v44, %s6727_s9 }
 0x148   : > { %v1395_v46 = vpop.permute.xlu1 %1394 }
 0x149   : > { %v2349_v37 = vpop.permute.xlu0 %2348  ;;  %v1610_v54 = vsel %vm284_vm0, %v7367_v18, %v1395_v46 }
 0x14a   : > { %v2474_v45 = vsel %vm796_vm2, %v2442_v2, %v2349_v37  ;;  %1424 = vrot.lane.b32.xlu1 %v7234_v27, %s6728_s10  ;;  %v2138_v27 = vld [vmem:[#allocation2 + $0x109] sm:$0xff] }
 0x14b   : > { %2378 = vrot.lane.b32.xlu0 %v2169_v49, %s6727_s9  ;;  %6457 = vmatprep.mubr.msk.f32.mxu0 %vm864_vm3, %v2474_v45  ;;  %v7747_v49 = vld [vmem:[#allocation2 + $0x152] sm:$0xff] }
 0x14c   : > { %v1397_v61 = vpop.permute.xlu1 %1396  ;;  %v2142_v45 = vld [vmem:[#allocation2 + $0x139] sm:$0xff] }
 0x14d   : > { %v2351_v44 = vpop.permute.xlu0 %2350  ;;  %v1611_v23 = vsel %vm284_vm0, %v7365_v5, %v1397_v61 }
 0x14e   : > { %v2475_v41 = vsel %vm796_vm2, %v2443_v36, %v2351_v44  ;;  %1552 = vrot.lane.b32.xlu1 %v7242_v25, %s6727_s9  ;;  %v2170_v25 = vld [vmem:[#allocation2 + $0x10a] sm:$0xff] }
 0x14f   : > { %1550 = vrot.lane.b32.xlu0 %v7244_v26, %s6727_s9  ;;  %6458 = vmatmul.mubr.msk.f32.gmra.mrb[34].mxu0 %vm864_vm3, %v2475_v41 }
 0x150   : > { %v1525_v57 = vpop.permute.xlu1 %1524 }
 0x151   : > { %v1523_v4 = vpop.permute.xlu0 %1522  ;;  %v1643_v8 = vsel %vm796_vm2, %v1611_v23, %v1525_v57  ;;  %v830_v57 = vld [vmem:[#allocation3 + $0x8] sm:$0xff] }
 0x152   : > { %v1642_v31 = vsel %vm796_vm2, %v1610_v54, %v1523_v4  ;;  %2254 = vrot.lane.b32.xlu1 %v2139_v12, %s6728_s10  ;;  %v829_v4 = vld [vmem:[#allocation3] sm:$0xff] }
 0x153   : > { %2252 = vrot.lane.b32.xlu0 %v2138_v27, %s6728_s10  ;;  %6412 = vmatprep.mubr.msk.f32.mxu1 %vm864_vm3, %v1642_v31  ;;  %v7766_v27 = vld [vmem:[#allocation2 + $0x169] sm:$0xff] }
 0x154   : > { %6413 = vmatmul.mubr.msk.f32.gmra.mrb[8].mxu1 %vm864_vm3, %v1643_v8  ;;  %v2227_v26 = vpop.permute.xlu1 %2226 }
 0x155   : > { %v2225_v34 = vpop.permute.xlu0 %2224  ;;  %v2445_v9 = vsel %vm284_vm0, %v7345_v13, %v2227_v26  ;;  %v1311_v26 = vld [vmem:[#allocation2 + $0x171] sm:$0xff] }
 0x156   : > { %1426 = vrot.lane.b32.xlu1 %v7256_v22, %s6728_s10  ;;  %v2444_v10 = vsel %vm284_vm0, %v7347_v30, %v2225_v34  ;;  %v1338_v22 = vld [vmem:[#allocation2 + $0x13a] sm:$0xff] }
 0x157   : > { %2380 = vrot.lane.b32.xlu0 %v2170_v25, %s6727_s9 }
 0x158   : > { %v1399_v33 = vpop.permute.xlu1 %1398 }
 0x159   : > { %v2353_v17 = vpop.permute.xlu0 %2352  ;;  %v1612_v60 = vsel %vm284_vm0, %v7387_v7, %v1399_v33 }
 0x15a   : > { %v2476_v63 = vsel %vm796_vm2, %v2444_v10, %v2353_v17  ;;  %1428 = vrot.lane.b32.xlu1 %v1307_v32, %s6728_s10  ;;  %v1343_v17 = vld [vmem:[#allocation2 + $0x172] sm:$0xff] }
 0x15b   : > { %2382 = vrot.lane.b32.xlu0 %v2171_v55, %s6727_s9  ;;  %6460 = vmatprep.mubr.msk.f32.mxu0 %vm864_vm3, %v2476_v63  ;;  %v1342_v63 = vld [vmem:[#allocation2 + $0x16a] sm:$0xff] }
 0x15c   : > { %v1401_v56 = vpop.permute.xlu1 %1400 }
 0x15d   : > { %v2355_v24 = vpop.permute.xlu0 %2354  ;;  %v1613_v3 = vsel %vm284_vm0, %v7385_v14, %v1401_v56 }
 0x15e   : > { %v2477_v30 = vsel %vm796_vm2, %v2445_v9, %v2355_v24  ;;  %1556 = vrot.lane.b32.xlu1 %v7712_v0, %s6727_s9  ;;  %v832_v24 = vld [vmem:[#allocation3 + $0x18] sm:$0xff] }
 0x15f   : > { %1554 = vrot.lane.b32.xlu0 %v1338_v22, %s6727_s9  ;;  %6461 = vmatmul.mubr.msk.f32.gmra.mrb[36].mxu0 %vm864_vm3, %v2477_v30  ;;  %v831_v30 = vld [vmem:[#allocation3 + $0x10] sm:$0xff] }
 0x160   : > { %v1529_v13 = vpop.permute.xlu1 %1528 }
 0x161   : > { %v1527_v11 = vpop.permute.xlu0 %1526  ;;  %v1645_v53 = vsel %vm796_vm2, %v1613_v3, %v1529_v13 }
 0x162   : > { %v1644_v1 = vsel %vm796_vm2, %v1612_v60, %v1527_v11  ;;  %2258 = vrot.lane.b32.xlu1 %v2141_v43, %s6728_s10 }
 0x163   : > { %2256 = vrot.lane.b32.xlu0 %v2140_v59, %s6728_s10  ;;  %6415 = vmatprep.mubr.msk.f32.mxu1 %vm864_vm3, %v1644_v1 }
 0x164   : > { %6416 = vmatmul.mubr.msk.f32.gmra.mrb[10].mxu1 %vm864_vm3, %v1645_v53  ;;  %v2231_v51 = vpop.permute.xlu1 %2230 }
 0x165   : > { %v2229_v40 = vpop.permute.xlu0 %2228  ;;  %v2447_v2 = vsel %vm284_vm0, %v7365_v5, %v2231_v51  ;;  %v833_v51 = vld [vmem:[#allocation3 + $0x20] sm:$0xff] }
 0x166   : > { %1430 = vrot.lane.b32.xlu1 %v7730_v42, %s6728_s10  ;;  %v2446_v15 = vsel %vm284_vm0, %v7367_v18, %v2229_v40 }
 0x167   : > { %2384 = vrot.lane.b32.xlu0 %v2172_v47, %s6727_s9  ;;  %v834_v47 = vld [vmem:[#allocation3 + $0x28] sm:$0xff] }
 0x168   : > { %v1403_v58 = vpop.permute.xlu1 %1402 }
 0x169   : > { %v2357_v52 = vpop.permute.xlu0 %2356  ;;  %v1614_v36 = vsel %vm284_vm0, %v7407_v21, %v1403_v58 }
 0x16a   : > { %v2478_v38 = vsel %vm796_vm2, %v2446_v15, %v2357_v52  ;;  %1432 = vrot.lane.b32.xlu1 %v7736_v48, %s6728_s10 }
 0x16b   : > { %2386 = vrot.lane.b32.xlu0 %v2173_v19, %s6727_s9  ;;  %6463 = vmatprep.mubr.msk.f32.mxu0 %vm864_vm3, %v2478_v38 }
 0x16c   : > { %v1405_v46 = vpop.permute.xlu1 %1404 }
 0x16d   : > { %v2359_v18 = vpop.permute.xlu0 %2358  ;;  %v1615_v61 = vsel %vm284_vm0, %v7405_v35, %v1405_v46 }
 0x16e   : > { %v2479_v37 = vsel %vm796_vm2, %v2447_v2, %v2359_v18  ;;  %1560 = vrot.lane.b32.xlu1 %v7745_v39, %s6727_s9  ;;  %v836_v2 = vld [vmem:[#allocation3 + $0x38] sm:$0xff]  ;;  %v835_v18 = vld [vmem:[#allocation3 + $0x30] sm:$0xff] }
 0x16f   : > { %1558 = vrot.lane.b32.xlu0 %v7747_v49, %s6727_s9  ;;  %6464 = vmatmul.mubr.msk.f32.gmra.mrb[38].mxu0 %vm864_vm3, %v2479_v37 }
 0x170   : > { %v1533_v5 = vpop.permute.xlu1 %1532 }
 0x171   : > { %v1531_v44 = vpop.permute.xlu0 %1530  ;;  %v1647_v41 = vsel %vm796_vm2, %v1615_v61, %v1533_v5  ;;  %v6348_v8 = vpop.f32.mrb[0].mxu0 }
 0x172   : > { %v1646_v12 = vsel %vm796_vm2, %v1614_v36, %v1531_v44  ;;  %2262 = vrot.lane.b32.xlu1 %v1307_v32, %s6728_s10  ;;  %v1187_v31 = vadd.f32 %v6348_v8, %v830_v57  ;;  %v1027_v25 = vpop.f32.mrb[1].mxu0  ;;  %v2149_v36 = vld [vmem:[#allocation2 + $0x189] sm:$0xff]  ;;  %v838_v8 = vld [vmem:[#allocation3 + $0x48] sm:$0xff] }
 0x173   : > { %2260 = vrot.lane.b32.xlu0 %v2142_v45, %s6728_s10  ;;  %6418 = vmatprep.mubr.msk.f32.mxu1 %vm864_vm3, %v1646_v12  ;;  %v1186_v32 = vadd.f32 %v1027_v25, %v829_v4  ;;  %v2148_v45 = vld [vmem:[#allocation2 + $0x181] sm:$0xff]  ;;  %v2181_v57 = vld [vmem:[#allocation2 + $0x18a] sm:$0xff] }
 0x174   : > { %6419 = vmatmul.mubr.msk.f32.gmra.mrb[12].mxu1 %vm864_vm3, %v1647_v41  ;;  %v2235_v54 = vpop.permute.xlu1 %2234  ;;  %1219 = vst.msk [vmem:[#allocation3 + $0x8] sm:$0xff] %vm284_vm0, %v1187_v31  ;;  %v2100_v31 = vld [vmem:[#allocation2 + $0xc0] sm:$0xff]  ;;  %v837_v25 = vld [vmem:[#allocation3 + $0x40] sm:$0xff] }
 0x175   : > { %v2233_v23 = vpop.permute.xlu0 %2232  ;;  %1218 = vst.msk [vmem:[#allocation3] sm:$0xff] %vm284_vm0, %v1186_v32 }
 0x176   : > { %1434 = vrot.lane.b32.xlu1 %v7766_v27, %s6728_s10  ;;  %v2448_v34 = vsel %vm284_vm0, %v7387_v7, %v2233_v23  ;;  %v2449_v7 = vsel %vm284_vm0, %v7385_v14, %v2235_v54 }
 0x177   : > { %2388 = vrot.lane.b32.xlu0 %v1338_v22, %s6727_s9 }
 0x178   : > { %v1407_v55 = vpop.permute.xlu1 %1406 }
 0x179   : > { %v2361_v10 = vpop.permute.xlu0 %2360  ;;  %v1616_v14 = vsel %vm284_vm0, %v7427_v28, %v1407_v55 }
 0x17a   : > { %v2480_v33 = vsel %vm796_vm2, %v2448_v34, %v2361_v10  ;;  %1436 = vrot.lane.b32.xlu1 %v1311_v26, %s6728_s10 }
 0x17b   : > { %2390 = vrot.lane.b32.xlu0 %v7712_v0, %s6727_s9  ;;  %6466 = vmatprep.mubr.msk.f32.mxu0 %vm864_vm3, %v2480_v33 }
 0x17c   : > { %v1409_v22 = vpop.permute.xlu1 %1408 }
 0x17d   : > { %v2363_v9 = vpop.permute.xlu0 %2362  ;;  %v1617_v0 = vsel %vm284_vm0, %v7425_v20, %v1409_v22 }
 0x17e   : > { %v2481_v56 = vsel %vm796_vm2, %v2449_v7, %v2363_v9  ;;  %1564 = vrot.lane.b32.xlu1 %v1343_v17, %s6727_s9 }
 0x17f   : > { %1562 = vrot.lane.b32.xlu0 %v1342_v63, %s6727_s9  ;;  %v6351_v43 = vpop.f32.mrb[2].mxu0  ;;  %6467 = vmatmul.mubr.msk.f32.gmra.mrb[40].mxu0 %vm864_vm3, %v2481_v56  ;;  %v7842_v56 = vld [vmem:[#allocation2 + $0xf8] sm:$0xff] }
 0x180   : > { %v1189_v59 = vadd.f32 %v6351_v43, %v832_v24  ;;  %v1037_v60 = vpop.f32.mrb[3].mxu0  ;;  %v1537_v3 = vpop.permute.xlu1 %1536  ;;  %v7844_v43 = vld [vmem:[#allocation2 + $0xf0] sm:$0xff] }
 0x181   : > { %v1188_v13 = vadd.f32 %v1037_v60, %v831_v30  ;;  %v1649_v11 = vsel %vm796_vm2, %v1617_v0, %v1537_v3  ;;  %v1535_v53 = vpop.permute.xlu0 %1534  ;;  %v840_v30 = vld [vmem:[#allocation3 + $0x58] sm:$0xff]  ;;  %v2150_v3 = vld [vmem:[#allocation2 + $0x199] sm:$0xff] }
 0x182   : > { %1221 = vst.msk [vmem:[#allocation3 + $0x18] sm:$0xff] %vm284_vm0, %v1189_v59  ;;  %v1648_v1 = vsel %vm796_vm2, %v1616_v14, %v1535_v53  ;;  %2266 = vrot.lane.b32.xlu1 %v7736_v48, %s6728_s10  ;;  %v839_v59 = vld [vmem:[#allocation3 + $0x50] sm:$0xff] }
 0x183   : > { %2264 = vrot.lane.b32.xlu0 %v7730_v42, %s6728_s10  ;;  %1220 = vst.msk [vmem:[#allocation3 + $0x10] sm:$0xff] %vm284_vm0, %v1188_v13  ;;  %6421 = vmatprep.mubr.msk.f32.mxu1 %vm864_vm3, %v1648_v1  ;;  %v2151_v14 = vld [vmem:[#allocation2 + $0x1a1] sm:$0xff] }
 0x184   : > { %6422 = vmatmul.mubr.msk.f32.gmra.mrb[14].mxu1 %vm864_vm3, %v1649_v11  ;;  %v2239_v20 = vpop.permute.xlu1 %2238 }
 0x185   : > { %v2237_v28 = vpop.permute.xlu0 %2236 }
 0x186   : > { %2394 = vrot.lane.b32.xlu1 %v7745_v39, %s6727_s9  ;;  %v2450_v15 = vsel %vm284_vm0, %v7407_v21, %v2237_v28 }
 0x187   : > { %2392 = vrot.lane.b32.xlu0 %v7747_v49, %s6727_s9  ;;  %v6354_v40 = vpop.f32.mrb[4].mxu0  ;;  %v2451_v49 = vsel %vm284_vm0, %v7405_v35, %v2239_v20 }
 0x188   : > { %v1191_v48 = vadd.f32 %v6354_v40, %v834_v47  ;;  %v1047_v19 = vpop.f32.mrb[5].mxu0  ;;  %v1411_v42 = vpop.permute.xlu1 %1410 }
 0x189   : > { %v1190_v58 = vadd.f32 %v1047_v19, %v833_v51  ;;  %v2365_v52 = vpop.permute.xlu0 %2364  ;;  %v1618_v41 = vsel %vm284_vm0, %v7447_v16, %v1411_v42  ;;  %v2183_v19 = vld [vmem:[#allocation2 + $0x1a2] sm:$0xff] }
 0x18a   : > { %1223 = vst.msk [vmem:[#allocation3 + $0x28] sm:$0xff] %vm284_vm0, %v1191_v48  ;;  %v2482_v38 = vsel %vm796_vm2, %v2450_v15, %v2365_v52  ;;  %2270 = vrot.lane.b32.xlu1 %v1311_v26, %s6728_s10  ;;  %v2182_v48 = vld [vmem:[#allocation2 + $0x19a] sm:$0xff] }
 0x18b   : > { %2268 = vrot.lane.b32.xlu0 %v7766_v27, %s6728_s10  ;;  %1222 = vst.msk [vmem:[#allocation3 + $0x20] sm:$0xff] %vm284_vm0, %v1190_v58  ;;  %6469 = vmatprep.mubr.msk.f32.mxu0 %vm864_vm3, %v2482_v38  ;;  %v842_v58 = vld [vmem:[#allocation3 + $0x68] sm:$0xff]  ;;  %v841_v38 = vld [vmem:[#allocation3 + $0x60] sm:$0xff] }
 0x18c   : > { %v1413_v39 = vpop.permute.xlu1 %1412  ;;  %v2102_v52 = vld [vmem:[#allocation2 + $0xd8] sm:$0xff] }
 0x18d   : > { %v2367_v21 = vpop.permute.xlu0 %2366  ;;  %v1619_v61 = vsel %vm284_vm0, %v7445_v50, %v1413_v39  ;;  %v2180_v50 = vld [vmem:[#allocation2 + $0x182] sm:$0xff] }
 0x18e   : > { %v2483_v46 = vsel %vm796_vm2, %v2451_v49, %v2367_v21  ;;  %2398 = vrot.lane.b32.xlu1 %v1343_v17, %s6727_s9  ;;  %v3093_v49 = vld [vmem:[#allocation2 + $0x9] sm:$0xff]  ;;  %v3092_v21 = vld [vmem:[#allocation2 + $0x1] sm:$0xff] }
 0x18f   : > { %2396 = vrot.lane.b32.xlu0 %v1342_v63, %s6727_s9  ;;  %v6357_v37 = vpop.f32.mrb[6].mxu0  ;;  %6470 = vmatmul.mubr.msk.f32.gmra.mrb[42].mxu0 %vm864_vm3, %v2483_v46  ;;  %v2101_v63 = vld [vmem:[#allocation2 + $0xc8] sm:$0xff] }
 0x190   : > { %v1193_v5 = vadd.f32 %v6357_v37, %v836_v2  ;;  %v1057_v44 = vpop.f32.mrb[7].mxu0  ;;  %v1541_v35 = vpop.permute.xlu1 %1540 }
 0x191   : > { %v1192_v12 = vadd.f32 %v1057_v44, %v835_v18  ;;  %v1651_v27 = vsel %vm796_vm2, %v1619_v61, %v1541_v35  ;;  %v1539_v54 = vpop.permute.xlu0 %1538  ;;  %v2103_v61 = vld [vmem:[#allocation2 + $0xe0] sm:$0xff]  ;;  %v3125_v44 = vld [vmem:[#allocation2 + $0xa] sm:$0xff] }
 0x192   : > { %1225 = vst.msk [vmem:[#allocation3 + $0x38] sm:$0xff] %vm284_vm0, %v1193_v5  ;;  %v1650_v23 = vsel %vm796_vm2, %v1618_v41, %v1539_v54  ;;  %2274 = vrot.lane.b32.xlu1 %v2149_v36, %s6728_s10  ;;  %v3124_v35 = vld [vmem:[#allocation2 + $0x2] sm:$0xff] }
 0x193   : > { %2272 = vrot.lane.b32.xlu0 %v2148_v45, %s6728_s10  ;;  %1224 = vst.msk [vmem:[#allocation3 + $0x30] sm:$0xff] %vm284_vm0, %v1192_v12  ;;  %6424 = vmatprep.mubr.msk.f32.mxu1 %vm864_vm3, %v1650_v23  ;;  %v844_v23 = vld [vmem:[#allocation3 + $0x78] sm:$0xff] }
 0x194   : > { %6425 = vmatmul.mubr.msk.f32.gmra.mrb[16].mxu1 %vm864_vm3, %v1651_v27  ;;  %v2243_v16 = vpop.permute.xlu1 %2242  ;;  %v7872_v27 = vld [vmem:[#allocation2 + $0x110] sm:$0xff] }
 0x195   : > { %v2241_v4 = vpop.permute.xlu0 %2240  ;;  %v2453_v9 = vsel %vm284_vm0, %v2101_v63, %v2243_v16  ;;  %v843_v16 = vld [vmem:[#allocation3 + $0x70] sm:$0xff] }
 0x196   : > { %2402 = vrot.lane.b32.xlu1 %v2181_v57, %s6727_s9  ;;  %v2452_v10 = vsel %vm284_vm0, %v2100_v31, %v2241_v4 }
 0x197   : > { %2400 = vrot.lane.b32.xlu0 %v2180_v50, %s6727_s9  ;;  %v6360_v26 = vpop.f32.mrb[8].mxu0 }
 0x198   : > { %v1195_v34 = vadd.f32 %v6360_v26, %v838_v8  ;;  %v1067_v32 = vpop.f32.mrb[9].mxu0  ;;  %v1415_v55 = vpop.permute.xlu1 %1414 }
 0x199   : > { %v1194_v33 = vadd.f32 %v1067_v32, %v837_v25  ;;  %v2369_v17 = vpop.permute.xlu0 %2368  ;;  %v1620_v20 = vsel %vm284_vm0, %v7844_v43, %v1415_v55 }
 0x19a   : > { %1227 = vst.msk [vmem:[#allocation3 + $0x48] sm:$0xff] %vm284_vm0, %v1195_v34  ;;  %v2484_v7 = vsel %vm796_vm2, %v2452_v10, %v2369_v17  ;;  %1440 = vrot.lane.b32.xlu1 %v2149_v36, %s6728_s10 }
 0x19b   : > { %1438 = vrot.lane.b32.xlu0 %v2148_v45, %s6728_s10  ;;  %1226 = vst.msk [vmem:[#allocation3 + $0x40] sm:$0xff] %vm284_vm0, %v1194_v33  ;;  %6472 = vmatprep.mubr.msk.f32.mxu0 %vm864_vm3, %v2484_v7  ;;  %v846_v7 = vld [vmem:[#allocation3 + $0x88] sm:$0xff] }
 0x19c   : > { %v1417_v22 = vpop.permute.xlu1 %1416 }
 0x19d   : > { %v2371_v24 = vpop.permute.xlu0 %2370  ;;  %v1621_v13 = vsel %vm284_vm0, %v7842_v56, %v1417_v22  ;;  %v845_v22 = vld [vmem:[#allocation3 + $0x80] sm:$0xff] }
 0x19e   : > { %v2485_v0 = vsel %vm796_vm2, %v2453_v9, %v2371_v24  ;;  %1568 = vrot.lane.b32.xlu1 %v2181_v57, %s6727_s9 }
 0x19f   : > { %1566 = vrot.lane.b32.xlu0 %v2180_v50, %s6727_s9  ;;  %v6363_v60 = vpop.f32.mrb[10].mxu0  ;;  %6473 = vmatmul.mubr.msk.f32.gmra.mrb[44].mxu0 %vm864_vm3, %v2485_v0  ;;  %v7874_v50 = vld [vmem:[#allocation2 + $0x108] sm:$0xff] }
 0x1a0   : > { %v1197_v11 = vadd.f32 %v6363_v60, %v840_v30  ;;  %v1077_v53 = vpop.f32.mrb[11].mxu0  ;;  %v1545_v1 = vpop.permute.xlu1 %1544 }
 0x1a1   : > { %v1196_v28 = vadd.f32 %v1077_v53, %v839_v59  ;;  %v1653_v47 = vsel %vm796_vm2, %v1621_v13, %v1545_v1  ;;  %v1543_v51 = vpop.permute.xlu0 %1542  ;;  %v7898_v53 = vld [vmem:[#allocation2 + $0x128] sm:$0xff] }
 0x1a2   : > { %1229 = vst.msk [vmem:[#allocation3 + $0x58] sm:$0xff] %vm284_vm0, %v1197_v11  ;;  %v1652_v40 = vsel %vm796_vm2, %v1620_v20, %v1543_v51  ;;  %2278 = vrot.lane.b32.xlu1 %v2151_v14, %s6728_s10  ;;  %v848_v20 = vld [vmem:[#allocation3 + $0x98] sm:$0xff] }
 0x1a3   : > { %2276 = vrot.lane.b32.xlu0 %v2150_v3, %s6728_s10  ;;  %1228 = vst.msk [vmem:[#allocation3 + $0x50] sm:$0xff] %vm284_vm0, %v1196_v28  ;;  %6427 = vmatprep.mubr.msk.f32.mxu1 %vm864_vm3, %v1652_v40  ;;  %v7900_v28 = vld [vmem:[#allocation2 + $0x120] sm:$0xff] }
 0x1a4   : > { %6428 = vmatmul.mubr.msk.f32.gmra.mrb[18].mxu1 %vm864_vm3, %v1653_v47  ;;  %v2247_v42 = vpop.permute.xlu1 %2246  ;;  %v847_v47 = vld [vmem:[#allocation3 + $0x90] sm:$0xff] }
 0x1a5   : > { %v2245_v15 = vpop.permute.xlu0 %2244  ;;  %v2455_v12 = vsel %vm284_vm0, %v2103_v61, %v2247_v42 }
 0x1a6   : > { %2406 = vrot.lane.b32.xlu1 %v2183_v19, %s6727_s9  ;;  %v2454_v37 = vsel %vm284_vm0, %v2102_v52, %v2245_v15 }
 0x1a7   : > { %2404 = vrot.lane.b32.xlu0 %v2182_v48, %s6727_s9  ;;  %v6366_v39 = vpop.f32.mrb[12].mxu0 }
 0x1a8   : > { %v1199_v2 = vadd.f32 %v6366_v39, %v842_v58  ;;  %v1087_v46 = vpop.f32.mrb[13].mxu0  ;;  %v1419_v18 = vpop.permute.xlu1 %1418 }
 0x1a9   : > { %v1198_v45 = vadd.f32 %v1087_v46, %v841_v38  ;;  %v2373_v36 = vpop.permute.xlu0 %2372  ;;  %v1622_v34 = vsel %vm284_vm0, %v7874_v50, %v1419_v18 }
 0x1aa   : > { %1231 = vst.msk [vmem:[#allocation3 + $0x68] sm:$0xff] %vm284_vm0, %v1199_v2  ;;  %v2486_v5 = vsel %vm796_vm2, %v2454_v37, %v2373_v36  ;;  %3190 = vrot.lane.b32.xlu1 %v3093_v49, %s6728_s10  ;;  %v849_v2 = vld [vmem:[#allocation3 + $0xa0] sm:$0xff] }
 0x1ab   : > { %3188 = vrot.lane.b32.xlu0 %v3092_v21, %s6728_s10  ;;  %1230 = vst.msk [vmem:[#allocation3 + $0x60] sm:$0xff] %vm284_vm0, %v1198_v45  ;;  %6475 = vmatprep.mubr.msk.f32.mxu0 %vm864_vm3, %v2486_v5  ;;  %v850_v21 = vld [vmem:[#allocation3 + $0xa8] sm:$0xff] }
 0x1ac   : > { %v1421_v41 = vpop.permute.xlu1 %1420 }
 0x1ad   : > { %v2375_v54 = vpop.permute.xlu0 %2374  ;;  %v1623_v8 = vsel %vm284_vm0, %v7872_v27, %v1421_v41 }
 0x1ae   : > { %v2487_v57 = vsel %vm796_vm2, %v2455_v12, %v2375_v54  ;;  %3318 = vrot.lane.b32.xlu1 %v3125_v44, %s6727_s9  ;;  %v7922_v12 = vld [vmem:[#allocation2 + $0x140] sm:$0xff] }
 0x1af   : > { %3316 = vrot.lane.b32.xlu0 %v3124_v35, %s6727_s9  ;;  %v6369_v4 = vpop.f32.mrb[14].mxu0  ;;  %6476 = vmatmul.mubr.msk.f32.gmra.mrb[46].mxu0 %vm864_vm3, %v2487_v57  ;;  %v1274_v57 = vld [vmem:[#allocation2 + $0x138] sm:$0xff] }
 0x1b0   : > { %v1201_v31 = vadd.f32 %v6369_v4, %v844_v23  ;;  %v1097_v25 = vpop.f32.mrb[15].mxu0  ;;  %v1549_v26 = vpop.permute.xlu1 %1548  ;;  %v852_v23 = vld [vmem:[#allocation3 + $0xb8] sm:$0xff] }
 0x1b1   : > { %v1200_v32 = vadd.f32 %v1097_v25, %v843_v16  ;;  %v1655_v55 = vsel %vm796_vm2, %v1623_v8, %v1549_v26  ;;  %v1547_v10 = vpop.permute.xlu0 %1546  ;;  %v851_v16 = vld [vmem:[#allocation3 + $0xb0] sm:$0xff] }
 0x1b2   : > { %1233 = vst.msk [vmem:[#allocation3 + $0x78] sm:$0xff] %vm284_vm0, %v1201_v31  ;;  %v1654_v33 = vsel %vm796_vm2, %v1622_v34, %v1547_v10 }
 0x1b3   : > { %1232 = vst.msk [vmem:[#allocation3 + $0x70] sm:$0xff] %vm284_vm0, %v1200_v32  ;;  %6430 = vmatprep.mubr.msk.f32.mxu1 %vm864_vm3, %v1654_v33 }
 0x1b4   : > { %6431 = vmatmul.mubr.msk.f32.gmra.mrb[20].mxu1 %vm864_vm3, %v1655_v55  ;;  %v2251_v17 = vpop.permute.xlu1 %2250 }
 0x1b5   : > { %v2249_v63 = vpop.permute.xlu0 %2248  ;;  %v2457_v11 = vsel %vm284_vm0, %v7842_v56, %v2251_v17 }
 0x1b6   : > { %v2456_v59 = vsel %vm284_vm0, %v7844_v43, %v2249_v63  ;;  %v854_v63 = vld [vmem:[#allocation3 + $0xc8] sm:$0xff] }
 0x1b7   : > { %v6372_v9 = vpop.f32.mrb[16].mxu0 }
 0x1b8   : > { %v1203_v24 = vadd.f32 %v6372_v9, %v846_v7  ;;  %v1107_v30 = vpop.f32.mrb[17].mxu0  ;;  %v1423_v0 = vpop.permute.xlu1 %1422  ;;  %v853_v7 = vld [vmem:[#allocation3 + $0xc0] sm:$0xff] }
 0x1b9   : > { %v1202_v60 = vadd.f32 %v1107_v30, %v845_v22  ;;  %v2377_v3 = vpop.permute.xlu0 %2376  ;;  %v1624_v56 = vsel %vm284_vm0, %v7900_v28, %v1423_v0 }
 0x1ba   : > { %1235 = vst.msk [vmem:[#allocation3 + $0x88] sm:$0xff] %vm284_vm0, %v1203_v24  ;;  %v2488_v14 = vsel %vm796_vm2, %v2456_v59, %v2377_v3 }
 0x1bb   : > { %1234 = vst.msk [vmem:[#allocation3 + $0x80] sm:$0xff] %vm284_vm0, %v1202_v60  ;;  %6478 = vmatprep.mubr.msk.f32.mxu0 %vm864_vm3, %v2488_v14 }
 0x1bc   : > { %v1425_v13 = vpop.permute.xlu1 %1424 }
 0x1bd   : > { %v2379_v1 = vpop.permute.xlu0 %2378  ;;  %v1625_v40 = vsel %vm284_vm0, %v7898_v53, %v1425_v13 }
 0x1be   : > { %v2489_v43 = vsel %vm796_vm2, %v2457_v11, %v2379_v1  ;;  %v1277_v11 = vld [vmem:[#allocation2 + $0x158] sm:$0xff] }
 0x1bf   : > { %v6375_v51 = vpop.f32.mrb[18].mxu0  ;;  %6479 = vmatmul.mubr.msk.f32.gmra.mrb[48].mxu0 %vm864_vm3, %v2489_v43  ;;  %v1276_v43 = vld [vmem:[#allocation2 + $0x150] sm:$0xff] }
 0x1c0   : > { %v1205_v48 = vadd.f32 %v6375_v51, %v848_v20  ;;  %v1117_v19 = vpop.f32.mrb[19].mxu0  ;;  %v1553_v42 = vpop.permute.xlu1 %1552  ;;  %v856_v20 = vld [vmem:[#allocation3 + $0xd8] sm:$0xff] }
 0x1c1   : > { %v1204_v15 = vadd.f32 %v1117_v19, %v847_v47  ;;  %v1657_v58 = vsel %vm796_vm2, %v1625_v40, %v1553_v42  ;;  %v1551_v52 = vpop.permute.xlu0 %1550  ;;  %v855_v47 = vld [vmem:[#allocation3 + $0xd0] sm:$0xff] }
 0x1c2   : > { %1237 = vst.msk [vmem:[#allocation3 + $0x98] sm:$0xff] %vm284_vm0, %v1205_v48  ;;  %v1656_v38 = vsel %vm796_vm2, %v1624_v56, %v1551_v52 }
 0x1c3   : > { %1236 = vst.msk [vmem:[#allocation3 + $0x90] sm:$0xff] %vm284_vm0, %v1204_v15  ;;  %6433 = vmatprep.mubr.msk.f32.mxu1 %vm864_vm3, %v1656_v38 }
 0x1c4   : > { %6434 = vmatmul.mubr.msk.f32.gmra.mrb[22].mxu1 %vm864_vm3, %v1657_v58  ;;  %v2255_v39 = vpop.permute.xlu1 %2254 }
 0x1c5   : > { %v2253_v49 = vpop.permute.xlu0 %2252  ;;  %v2459_v41 = vsel %vm284_vm0, %v7872_v27, %v2255_v39 }
 0x1c6   : > { %v2458_v36 = vsel %vm284_vm0, %v7874_v50, %v2253_v49 }
 0x1c7   : > { %v6378_v46 = vpop.f32.mrb[20].mxu0 }
 0x1c8   : > { %v1207_v18 = vadd.f32 %v6378_v46, %v850_v21  ;;  %v1127_v37 = vpop.f32.mrb[21].mxu0  ;;  %v1427_v45 = vpop.permute.xlu1 %1426 }
 0x1c9   : > { %v1206_v61 = vadd.f32 %v1127_v37, %v849_v2  ;;  %v2381_v5 = vpop.permute.xlu0 %2380  ;;  %v1626_v34 = vsel %vm284_vm0, %v1274_v57, %v1427_v45 }
 0x1ca   : > { %1239 = vst.msk [vmem:[#allocation3 + $0xa8] sm:$0xff] %vm284_vm0, %v1207_v18  ;;  %v2490_v44 = vsel %vm796_vm2, %v2458_v36, %v2381_v5  ;;  %v1667_v18 = vld [vmem:[#allocation3 + $0x8] sm:$0xff]  ;;  %v1666_v36 = vld [vmem:[#allocation3] sm:$0xff] }
 0x1cb   : > { %1238 = vst.msk [vmem:[#allocation3 + $0xa0] sm:$0xff] %vm284_vm0, %v1206_v61  ;;  %6481 = vmatprep.mubr.msk.f32.mxu0 %vm864_vm3, %v2490_v44 }
 0x1cc   : > { %v1429_v35 = vpop.permute.xlu1 %1428 }
 0x1cd   : > { %v2383_v54 = vpop.permute.xlu0 %2382  ;;  %v1627_v8 = vsel %vm284_vm0, %v7922_v12, %v1429_v35 }
 0x1ce   : > { %v2491_v50 = vsel %vm796_vm2, %v2459_v41, %v2383_v54  ;;  %v1279_v41 = vld [vmem:[#allocation2 + $0x170] sm:$0xff] }
 0x1cf   : > { %v6381_v4 = vpop.f32.mrb[22].mxu0  ;;  %6482 = vmatmul.mubr.msk.f32.gmra.mrb[50].mxu0 %vm864_vm3, %v2491_v50 }
 0x1d0   : > { %v1209_v31 = vadd.f32 %v6381_v4, %v852_v23  ;;  %v1137_v25 = vpop.f32.mrb[23].mxu0  ;;  %v1557_v26 = vpop.permute.xlu1 %1556  ;;  %v858_v23 = vld [vmem:[#allocation3 + $0xe8] sm:$0xff] }
 0x1d1   : > { %v1208_v27 = vadd.f32 %v1137_v25, %v851_v16  ;;  %v1659_v32 = vsel %vm796_vm2, %v1627_v8, %v1557_v26  ;;  %v1555_v55 = vpop.permute.xlu0 %1554  ;;  %v857_v16 = vld [vmem:[#allocation3 + $0xe0] sm:$0xff] }
 0x1d2   : > { %1241 = vst.msk [vmem:[#allocation3 + $0xb8] sm:$0xff] %vm284_vm0, %v1209_v31  ;;  %v1658_v10 = vsel %vm796_vm2, %v1626_v34, %v1555_v55 }
 0x1d3   : > { %1240 = vst.msk [vmem:[#allocation3 + $0xb0] sm:$0xff] %vm284_vm0, %v1208_v27  ;;  %6436 = vmatprep.mubr.msk.f32.mxu1 %vm864_vm3, %v1658_v10 }
 0x1d4   : > { %6437 = vmatmul.mubr.msk.f32.gmra.mrb[24].mxu1 %vm864_vm3, %v1659_v32  ;;  %v2259_v33 = vpop.permute.xlu1 %2258 }
 0x1d5   : > { %v2257_v17 = vpop.permute.xlu0 %2256  ;;  %v2461_v13 = vsel %vm284_vm0, %v7898_v53, %v2259_v33 }
 0x1d6   : > { %v2460_v0 = vsel %vm284_vm0, %v7900_v28, %v2257_v17 }
 0x1d7   : > { %v6384_v22 = vpop.f32.mrb[24].mxu0 }
 0x1d8   : > { %v1211_v9 = vadd.f32 %v6384_v22, %v854_v63  ;;  %v1147_v24 = vpop.f32.mrb[25].mxu0  ;;  %v1431_v30 = vpop.permute.xlu1 %1430 }
 0x1d9   : > { %v1210_v59 = vadd.f32 %v1147_v24, %v853_v7  ;;  %v2385_v60 = vpop.permute.xlu0 %2384  ;;  %v1628_v56 = vsel %vm284_vm0, %v1276_v43, %v1431_v30  ;;  %v1669_v30 = vld [vmem:[#allocation3 + $0x18] sm:$0xff] }
 0x1da   : > { %1243 = vst.msk [vmem:[#allocation3 + $0xc8] sm:$0xff] %vm284_vm0, %v1211_v9  ;;  %v2492_v3 = vsel %vm796_vm2, %v2460_v0, %v2385_v60  ;;  %v1668_v60 = vld [vmem:[#allocation3 + $0x10] sm:$0xff] }
 0x1db   : > { %1242 = vst.msk [vmem:[#allocation3 + $0xc0] sm:$0xff] %vm284_vm0, %v1210_v59  ;;  %6484 = vmatprep.mubr.msk.f32.mxu0 %vm864_vm3, %v2492_v3 }
 0x1dc   : > { %v1433_v14 = vpop.permute.xlu1 %1432 }
 0x1dd   : > { %v2387_v1 = vpop.permute.xlu0 %2386  ;;  %v1629_v40 = vsel %vm284_vm0, %v1277_v11, %v1433_v14 }
 0x1de   : > { %v2493_v28 = vsel %vm796_vm2, %v2461_v13, %v2387_v1  ;;  %v860_v1 = vld [vmem:[#allocation3 + $0xf8] sm:$0xff] }
 0x1df   : > { %v6387_v51 = vpop.f32.mrb[26].mxu0  ;;  %6485 = vmatmul.mubr.msk.f32.gmra.mrb[52].mxu0 %vm864_vm3, %v2493_v28 }
 0x1e0   : > { %v1213_v48 = vadd.f32 %v6387_v51, %v856_v20  ;;  %v1157_v19 = vpop.f32.mrb[27].mxu0  ;;  %v1561_v42 = vpop.permute.xlu1 %1560 }
 0x1e1   : > { %v1212_v15 = vadd.f32 %v1157_v19, %v855_v47  ;;  %v1661_v53 = vsel %vm796_vm2, %v1629_v40, %v1561_v42  ;;  %v1559_v58 = vpop.permute.xlu0 %1558 }
 0x1e2   : > { %1245 = vst.msk [vmem:[#allocation3 + $0xd8] sm:$0xff] %vm284_vm0, %v1213_v48  ;;  %v1660_v52 = vsel %vm796_vm2, %v1628_v56, %v1559_v58  ;;  %v2116_v58 = vld [vmem:[#allocation2 + $0x180] sm:$0xff] }
 0x1e3   : > { %1244 = vst.msk [vmem:[#allocation3 + $0xd0] sm:$0xff] %vm284_vm0, %v1212_v15  ;;  %6439 = vmatprep.mubr.msk.f32.mxu1 %vm864_vm3, %v1660_v52 }
 0x1e4   : > { %6440 = vmatmul.mubr.msk.f32.gmra.mrb[26].mxu1 %vm864_vm3, %v1661_v53  ;;  %v2263_v38 = vpop.permute.xlu1 %2262  ;;  %v2117_v53 = vld [vmem:[#allocation2 + $0x188] sm:$0xff] }
 0x1e5   : > { %v2261_v39 = vpop.permute.xlu0 %2260  ;;  %v2463_v35 = vsel %vm284_vm0, %v7922_v12, %v2263_v38 }
 0x1e6   : > { %v2462_v21 = vsel %vm284_vm0, %v1274_v57, %v2261_v39  ;;  %v1278_v57 = vld [vmem:[#allocation2 + $0x168] sm:$0xff] }
 0x1e8   : > { %v1435_v49 = vpop.permute.xlu1 %1434 }
 0x1e9   : > { %v2389_v2 = vpop.permute.xlu0 %2388  ;;  %v1630_v12 = vsel %vm284_vm0, %v1278_v57, %v1435_v49 }
 0x1ea   : > { %v2494_v46 = vsel %vm796_vm2, %v2462_v21, %v2389_v2  ;;  %v6402_v37 = vpop.f32.mrb[0].mxu1  ;;  %v1671_v21 = vld [vmem:[#allocation3 + $0x28] sm:$0xff] }
 0x1eb   : > { %v2024_v45 = vadd.f32 %v6402_v37, %v1667_v18  ;;  %v1864_v61 = vpop.f32.mrb[1].mxu1  ;;  %6487 = vmatprep.mubr.msk.f32.mxu0 %vm864_vm3, %v2494_v46  ;;  %v1670_v18 = vld [vmem:[#allocation3 + $0x20] sm:$0xff] }
 0x1ec   : > { %v2023_v5 = vadd.f32 %v1864_v61, %v1666_v36  ;;  %v1437_v44 = vpop.permute.xlu1 %1436 }
 0x1ed   : > { %2056 = vst.msk [vmem:[#allocation3 + $0x8] sm:$0xff] %vm284_vm0, %v2024_v45  ;;  %v2391_v54 = vpop.permute.xlu0 %2390  ;;  %v1631_v8 = vsel %vm284_vm0, %v1279_v41, %v1437_v44 }
 0x1ee   : > { %2055 = vst.msk [vmem:[#allocation3] sm:$0xff] %vm284_vm0, %v2023_v5  ;;  %v2495_v50 = vsel %vm796_vm2, %v2463_v35, %v2391_v54 }
 0x1ef   : > { %v6390_v4 = vpop.f32.mrb[28].mxu0  ;;  %6488 = vmatmul.mubr.msk.f32.gmra.mrb[54].mxu0 %vm864_vm3, %v2495_v50 }
 0x1f0   : > { %v1215_v31 = vadd.f32 %v6390_v4, %v858_v23  ;;  %v1167_v25 = vpop.f32.mrb[29].mxu0  ;;  %v1565_v26 = vpop.permute.xlu1 %1564 }
 0x1f1   : > { %v1214_v34 = vadd.f32 %v1167_v25, %v857_v16  ;;  %v1663_v27 = vsel %vm796_vm2, %v1631_v8, %v1565_v26  ;;  %v1563_v32 = vpop.permute.xlu0 %1562 }
 0x1f2   : > { %1247 = vst.msk [vmem:[#allocation3 + $0xe8] sm:$0xff] %vm284_vm0, %v1215_v31  ;;  %v1662_v55 = vsel %vm796_vm2, %v1630_v12, %v1563_v32  ;;  %v2118_v32 = vld [vmem:[#allocation2 + $0x198] sm:$0xff] }
 0x1f3   : > { %1246 = vst.msk [vmem:[#allocation3 + $0xe0] sm:$0xff] %vm284_vm0, %v1214_v34  ;;  %6442 = vmatprep.mubr.msk.f32.mxu1 %vm864_vm3, %v1662_v55  ;;  %v2119_v34 = vld [vmem:[#allocation2 + $0x1a0] sm:$0xff] }
 0x1f4   : > { %6443 = vmatmul.mubr.msk.f32.gmra.mrb[28].mxu1 %vm864_vm3, %v1663_v27  ;;  %v2267_v10 = vpop.permute.xlu1 %2266  ;;  %v2505_v8 = vld [vmem:[#allocation3 + $0x8] sm:$0xff] }
 0x1f5   : > { %v2265_v33 = vpop.permute.xlu0 %2264  ;;  %v2465_v17 = vsel %vm284_vm0, %v1277_v11, %v2267_v10  ;;  %v2504_v26 = vld [vmem:[#allocation3] sm:$0xff]  ;;  %v3508_v10 = vld [vmem:[%s9339_s3] sm:$0xff] }
 0x1f6   : > { %v2464_v7 = vsel %vm284_vm0, %v1276_v43, %v2265_v33  ;;  %v859_v43 = vld [vmem:[#allocation3 + $0xf0] sm:$0xff]  ;;  %v3509_v33 = vld [vmem:[%s9339_s3 + $0x8] sm:$0xff] }
 0x1f8   : > { %v2395_v63 = vpop.permute.xlu1 %2394 }
 0x1f9   : > { %v2497_v22 = vsel %vm796_vm2, %v2465_v17, %v2395_v63  ;;  %v2393_v9 = vpop.permute.xlu0 %2392  ;;  %v6681_v63 = vpack.c.bf16 %v3509_v33, %v3508_v10  ;;  %v1676_v33 = vld [vmem:[#allocation3 + $0x50] sm:$0xff] }
 0x1fa   : > { %v2496_v24 = vsel %vm796_vm2, %v2464_v7, %v2393_v9  ;;  %v6405_v0 = vpop.f32.mrb[2].mxu1 }
 0x1fb   : > { %v2026_v59 = vadd.f32 %v6405_v0, %v1669_v30  ;;  %v1874_v3 = vpop.f32.mrb[3].mxu1  ;;  %6490 = vmatprep.mubr.msk.f32.mxu0 %vm864_vm3, %v2496_v24  ;;  %6682 = vmatprep.subr.bf16.mxu1 %v6681_v63  ;;  %v1672_v0 = vld [vmem:[#allocation3 + $0x30] sm:$0xff] }
 0x1fc   : > { %v2025_v14 = vadd.f32 %v1874_v3, %v1668_v60  ;;  %6491 = vmatmul.mubr.msk.f32.gmra.mrb[56].mxu0 %vm864_vm3, %v2497_v22  ;;  %v2271_v13 = vpop.permute.xlu1 %2270  ;;  %v1673_v22 = vld [vmem:[#allocation3 + $0x38] sm:$0xff]  ;;  %6684 = vmatpush3.bf16.msra.mxu1 %v6681_v63 }
 0x1fd   : > { %2058 = vst.msk [vmem:[#allocation3 + $0x18] sm:$0xff] %vm284_vm0, %v2026_v59  ;;  %v2269_v11 = vpop.permute.xlu0 %2268  ;;  %v2467_v20 = vsel %vm284_vm0, %v1279_v41, %v2271_v13 }
 0x1fe   : > { %2057 = vst.msk [vmem:[#allocation3 + $0x10] sm:$0xff] %vm284_vm0, %v2025_v14  ;;  %v2466_v28 = vsel %vm284_vm0, %v1278_v57, %v2269_v11 }
 0x1ff   : > { %v6393_v47 = vpop.f32.mrb[30].mxu0 }
 0x200   : > { %v1217_v51 = vadd.f32 %v6393_v47, %v860_v1  ;;  %v1177_v40 = vpop.f32.mrb[31].mxu0  ;;  %v2399_v48 = vpop.permute.xlu1 %2398  ;;  %v3061_v1 = vld [vmem:[#allocation2 + $0x8] sm:$0xff]  ;;  %v3060_v47 = vld [vmem:[#allocation2] sm:$0xff] }
 0x201   : > { %v1216_v19 = vadd.f32 %v1177_v40, %v859_v43  ;;  %v2397_v42 = vpop.permute.xlu0 %2396  ;;  %v2499_v56 = vsel %vm796_vm2, %v2467_v20, %v2399_v48  ;;  %v3510_v20 = vld [vmem:[%s9339_s3 + $0x10] sm:$0xff] }
 0x202   : > { %1249 = vst.msk [vmem:[#allocation3 + $0xf8] sm:$0xff] %vm284_vm0, %v1217_v51  ;;  %v2498_v15 = vsel %vm796_vm2, %v2466_v28, %v2397_v42  ;;  %6506 = vmatprep.subr.mxu1 %v3510_v20 }
 0x203   : > { %1248 = vst.msk [vmem:[#allocation3 + $0xf0] sm:$0xff] %vm284_vm0, %v1216_v19  ;;  %6493 = vmatprep.mubr.msk.f32.mxu0 %vm864_vm3, %v2498_v15  ;;  %6507 = vmatpush3.msra.mxu1 %v3510_v20  ;;  %v1679_v20 = vld [vmem:[#allocation3 + $0x68] sm:$0xff] }
 0x204   : > { %6494 = vmatmul.mubr.msk.f32.gmra.mrb[58].mxu0 %vm864_vm3, %v2499_v56  ;;  %v2275_v52 = vpop.permute.xlu1 %2274 }
 0x205   : > { %v2273_v38 = vpop.permute.xlu0 %2272  ;;  %v2469_v39 = vsel %vm284_vm0, %v2117_v53, %v2275_v52  ;;  %v2507_v52 = vld [vmem:[#allocation3 + $0x18] sm:$0xff] }
 0x206   : > { %v2468_v49 = vsel %vm284_vm0, %v2116_v58, %v2273_v38 }
 0x207   : > { %v6408_v2 = vpop.f32.mrb[4].mxu1 }
 0x208   : > { %v2028_v46 = vadd.f32 %v6408_v2, %v1671_v21  ;;  %v1884_v37 = vpop.f32.mrb[5].mxu1  ;;  %v2403_v45 = vpop.permute.xlu1 %2402  ;;  %v2506_v21 = vld [vmem:[#allocation3 + $0x10] sm:$0xff] }
 0x209   : > { %v2027_v36 = vadd.f32 %v1884_v37, %v1670_v18  ;;  %v2401_v61 = vpop.permute.xlu0 %2400  ;;  %v2501_v5 = vsel %vm796_vm2, %v2469_v39, %v2403_v45  ;;  %v1675_v37 = vld [vmem:[#allocation3 + $0x48] sm:$0xff] }
 0x20a   : > { %2060 = vst.msk [vmem:[#allocation3 + $0x28] sm:$0xff] %vm284_vm0, %v2028_v46  ;;  %v2500_v44 = vsel %vm796_vm2, %v2468_v49, %v2401_v61 }
 0x20b   : > { %2059 = vst.msk [vmem:[#allocation3 + $0x20] sm:$0xff] %vm284_vm0, %v2027_v36  ;;  %6496 = vmatprep.mubr.msk.f32.mxu0 %vm864_vm3, %v2500_v44 }
 0x20c   : > { %6497 = vmatmul.mubr.msk.f32.gmra.mrb[60].mxu0 %vm864_vm3, %v2501_v5  ;;  %v1441_v35 = vpop.permute.xlu1 %1440  ;;  %v1674_v5 = vld [vmem:[#allocation3 + $0x40] sm:$0xff] }
 0x20d   : > { %v1439_v41 = vpop.permute.xlu0 %1438  ;;  %v1633_v54 = vsel %vm284_vm0, %v2117_v53, %v1441_v35 }
 0x20e   : > { %v1632_v23 = vsel %vm284_vm0, %v2116_v58, %v1439_v41 }
 0x210   : > { %v1569_v57 = vpop.permute.xlu1 %1568 }
 0x211   : > { %v1567_v50 = vpop.permute.xlu0 %1566  ;;  %v1665_v16 = vsel %vm796_vm2, %v1633_v54, %v1569_v57 }
 0x212   : > { %v1664_v4 = vsel %vm796_vm2, %v1632_v23, %v1567_v50  ;;  %v6456_v31 = vpop.f32.mrb[32].mxu0 }
 0x213   : > { %v2862_v25 = vadd.f32 %v6456_v31, %v2505_v8  ;;  %6445 = vmatprep.mubr.msk.f32.mxu1 %vm864_vm3, %v1664_v4  ;;  %v2702_v12 = vpop.f32.mrb[33].mxu0  ;;  %v2509_v4 = vld [vmem:[#allocation3 + $0x28] sm:$0xff] }
 0x214   : > { %v2861_v27 = vadd.f32 %v2702_v12, %v2504_v26  ;;  %6446 = vmatmul.mubr.msk.f32.gmra.mrb[30].mxu1 %vm864_vm3, %v1665_v16  ;;  %v2279_v55 = vpop.permute.xlu1 %2278 }
 0x215   : > { %2894 = vst.msk [vmem:[#allocation3 + $0x8] sm:$0xff] %vm284_vm0, %v2862_v25  ;;  %v2277_v17 = vpop.permute.xlu0 %2276  ;;  %v2471_v7 = vsel %vm284_vm0, %v2119_v34, %v2279_v55  ;;  %v2508_v25 = vld [vmem:[#allocation3 + $0x20] sm:$0xff] }
 0x216   : > { %2893 = vst.msk [vmem:[#allocation3] sm:$0xff] %vm284_vm0, %v2861_v27  ;;  %v2470_v24 = vsel %vm284_vm0, %v2118_v32, %v2277_v17  ;;  %v1677_v27 = vld [vmem:[#allocation3 + $0x58] sm:$0xff] }
 0x217   : > { %v6411_v9 = vpop.f32.mrb[6].mxu1 }
 0x218   : > { %v2030_v30 = vadd.f32 %v6411_v9, %v1673_v22  ;;  %v1894_v59 = vpop.f32.mrb[7].mxu1  ;;  %v2407_v60 = vpop.permute.xlu1 %2406 }
 0x219   : > { %v2029_v3 = vadd.f32 %v1894_v59, %v1672_v0  ;;  %v2405_v14 = vpop.permute.xlu0 %2404  ;;  %v2503_v13 = vsel %vm796_vm2, %v2471_v7, %v2407_v60 }
 0x21a   : > { %2062 = vst.msk [vmem:[#allocation3 + $0x38] sm:$0xff] %vm284_vm0, %v2030_v30  ;;  %v2502_v11 = vsel %vm796_vm2, %v2470_v24, %v2405_v14 }
 0x21b   : > { %2061 = vst.msk [vmem:[#allocation3 + $0x30] sm:$0xff] %vm284_vm0, %v2029_v3  ;;  %6499 = vmatprep.mubr.msk.f32.mxu0 %vm864_vm3, %v2502_v11 }
 0x21c   : > { %v2926_v43 = vld [vmem:[#allocation3 + $0x8] sm:$0xff]  ;;  %6500 = vmatmul.mubr.msk.f32.gmra.mrb[62].mxu0 %vm864_vm3, %v2503_v13  ;;  %v3191_v28 = vpop.permute.xlu1 %3190 }
 0x21d   : > { %v2958_v51 = vmax.f32 %v2926_v43, 0.0  ;;  %v2925_v40 = vld [vmem:[#allocation3] sm:$0xff]  ;;  %v3189_v48 = vpop.permute.xlu0 %3188  ;;  %v3413_v42 = vsel %vm284_vm0, %v3061_v1, %v3191_v28 }
 0x21e   : > { %v2957_v19 = vmax.f32 %v2925_v40, 0.0  ;;  %v3412_v56 = vsel %vm284_vm0, %v3060_v47, %v3189_v48 }
 0x21f   : > { %2990 = vst.msk [vmem:[#allocation2 + $0x21] sm:$0xff] %vm284_vm0, %v2958_v51  ;;  %v1678_v51 = vld [vmem:[#allocation3 + $0x60] sm:$0xff] }
 0x220   : > { %2989 = vst.msk [vmem:[#allocation2 + $0x19] sm:$0xff] %vm284_vm0, %v2957_v19  ;;  %v3319_v15 = vpop.permute.xlu1 %3318 }
 0x221   : > { %v3445_v53 = vsel %vm796_vm2, %v3413_v42, %v3319_v15  ;;  %v3317_v58 = vpop.permute.xlu0 %3316  ;;  %v2511_v59 = vld [vmem:[#allocation3 + $0x38] sm:$0xff] }
 0x222   : > { %v6459_v38 = vpop.f32.mrb[34].mxu0  ;;  %v3444_v39 = vsel %vm796_vm2, %v3412_v56, %v3317_v58  ;;  %v2510_v14 = vld [vmem:[#allocation3 + $0x30] sm:$0xff] }
 0x223   : > { %v2864_v49 = vadd.f32 %v6459_v38, %v2507_v52  ;;  %v2712_v2 = vpop.f32.mrb[35].mxu0  ;;  %6508 = vmatprep.mubr.msk.f32.mxu1 %vm864_vm3, %v3444_v39 }
 0x224   : > { %v2863_v46 = vadd.f32 %v2712_v2, %v2506_v21  ;;  %6509 = vmatmul.mubr.msk.f32.vlgmr.msra.gmra.mrb[32].mxu1 %vm864_vm3, %v3445_v53 }
 0x225   : > { %2896 = vst.msk [vmem:[#allocation3 + $0x18] sm:$0xff] %vm284_vm0, %v2864_v49 }
 0x226   : > { %2895 = vst.msk [vmem:[#allocation3 + $0x10] sm:$0xff] %vm284_vm0, %v2863_v46  ;;  %v8029_v18 = vld [vmem:[#allocation2 + $0x21] sm:$0xff] }
 0x227   : > { %v6414_v45 = vpop.f32.mrb[8].mxu1  ;;  %3194 = vrot.lane.b32.xlu1 %v8029_v18, %s6728_s10  ;;  %v8033_v36 = vld [vmem:[#allocation2 + $0x19] sm:$0xff]  ;;  %v8038_v41 = vld [vmem:[#allocation2 + $0x22] sm:$0xff] }
 0x228   : > { %v2032_v61 = vadd.f32 %v6414_v45, %v1675_v37  ;;  %v1904_v44 = vpop.f32.mrb[9].mxu1  ;;  %3192 = vrot.lane.b32.xlu0 %v8033_v36, %s6728_s10  ;;  %v8043_v54 = vld [vmem:[#allocation2 + $0x1a] sm:$0xff]  ;;  %v1681_v37 = vld [vmem:[#allocation3 + $0x78] sm:$0xff] }
 0x229   : > { %v2031_v35 = vadd.f32 %v1904_v44, %v1674_v5  ;;  %v1680_v44 = vld [vmem:[#allocation3 + $0x70] sm:$0xff] }
 0x22a   : > { %2064 = vst.msk [vmem:[#allocation3 + $0x48] sm:$0xff] %vm284_vm0, %v2032_v61 }
 0x22b   : > { %2063 = vst.msk [vmem:[#allocation3 + $0x40] sm:$0xff] %vm284_vm0, %v2031_v35  ;;  %3322 = vrot.lane.b32.xlu1 %v8038_v41, %s6727_s9 }
 0x22c   : > { %v2928_v23 = vld [vmem:[#allocation3 + $0x18] sm:$0xff]  ;;  %3320 = vrot.lane.b32.xlu0 %v8043_v54, %s6727_s9 }
 0x22d   : > { %v2960_v57 = vmax.f32 %v2928_v23, 0.0  ;;  %v2927_v50 = vld [vmem:[#allocation3 + $0x10] sm:$0xff] }
 0x22e   : > { %v2959_v16 = vmax.f32 %v2927_v50, 0.0 }
 0x22f   : > { %2992 = vst.msk [vmem:[#allocation2 + $0x39] sm:$0xff] %vm284_vm0, %v2960_v57 }
 0x230   : > { %2991 = vst.msk [vmem:[#allocation2 + $0x31] sm:$0xff] %vm284_vm0, %v2959_v16 }
 0x231   : > { %v2513_v52 = vld [vmem:[#allocation3 + $0x48] sm:$0xff] }
 0x232   : > { %v6462_v8 = vpop.f32.mrb[36].mxu0  ;;  %v2512_v49 = vld [vmem:[#allocation3 + $0x40] sm:$0xff] }
 0x233   : > { %v2866_v31 = vadd.f32 %v6462_v8, %v2509_v4  ;;  %v2722_v26 = vpop.f32.mrb[37].mxu0 }
 0x234   : > { %v2865_v12 = vadd.f32 %v2722_v26, %v2508_v25 }
 0x235   : > { %2898 = vst.msk [vmem:[#allocation3 + $0x28] sm:$0xff] %vm284_vm0, %v2866_v31 }
 0x236   : > { %2897 = vst.msk [vmem:[#allocation3 + $0x20] sm:$0xff] %vm284_vm0, %v2865_v12  ;;  %v8051_v34 = vld [vmem:[#allocation2 + $0x39] sm:$0xff] }
 0x237   : > { %v6417_v32 = vpop.f32.mrb[10].mxu1  ;;  %3198 = vrot.lane.b32.xlu1 %v8051_v34, %s6728_s10  ;;  %v8055_v55 = vld [vmem:[#allocation2 + $0x31] sm:$0xff]  ;;  %v3129_v7 = vld [vmem:[#allocation2 + $0x3a] sm:$0xff] }
 0x238   : > { %v2034_v10 = vadd.f32 %v6417_v32, %v1677_v27  ;;  %v1914_v17 = vpop.f32.mrb[11].mxu1  ;;  %3196 = vrot.lane.b32.xlu0 %v8055_v55, %s6728_s10  ;;  %v8062_v22 = vld [vmem:[#allocation2 + $0x32] sm:$0xff] }
 0x239   : > { %v2033_v63 = vadd.f32 %v1914_v17, %v1676_v33  ;;  %v1683_v17 = vld [vmem:[#allocation3 + $0x88] sm:$0xff] }
 0x23a   : > { %2066 = vst.msk [vmem:[#allocation3 + $0x58] sm:$0xff] %vm284_vm0, %v2034_v10 }
 0x23b   : > { %2065 = vst.msk [vmem:[#allocation3 + $0x50] sm:$0xff] %vm284_vm0, %v2033_v63  ;;  %3326 = vrot.lane.b32.xlu1 %v3129_v7, %s6727_s9 }
 0x23c   : > { %v2930_v9 = vld [vmem:[#allocation3 + $0x28] sm:$0xff]  ;;  %3324 = vrot.lane.b32.xlu0 %v8062_v22, %s6727_s9 }
 0x23d   : > { %v2962_v24 = vmax.f32 %v2930_v9, 0.0  ;;  %v2929_v30 = vld [vmem:[#allocation3 + $0x20] sm:$0xff] }
 0x23e   : > { %v2961_v0 = vmax.f32 %v2929_v30, 0.0 }
 0x23f   : > { %2994 = vst.msk [vmem:[#allocation2 + $0x51] sm:$0xff] %vm284_vm0, %v2962_v24  ;;  %v1682_v24 = vld [vmem:[#allocation3 + $0x80] sm:$0xff] }
 0x240   : > { %2993 = vst.msk [vmem:[#allocation2 + $0x49] sm:$0xff] %vm284_vm0, %v2961_v0 }
 0x241   : > { %v2515_v25 = vld [vmem:[#allocation3 + $0x58] sm:$0xff] }
 0x242   : > { %v6465_v60 = vpop.f32.mrb[38].mxu0  ;;  %v2514_v27 = vld [vmem:[#allocation3 + $0x50] sm:$0xff] }
 0x243   : > { %v2868_v3 = vadd.f32 %v6465_v60, %v2511_v59  ;;  %v2732_v13 = vpop.f32.mrb[39].mxu0 }
 0x244   : > { %v2867_v11 = vadd.f32 %v2732_v13, %v2510_v14 }
 0x245   : > { %2900 = vst.msk [vmem:[#allocation3 + $0x38] sm:$0xff] %vm284_vm0, %v2868_v3 }
 0x246   : > { %2899 = vst.msk [vmem:[#allocation3 + $0x30] sm:$0xff] %vm284_vm0, %v2867_v11  ;;  %v8070_v1 = vld [vmem:[#allocation2 + $0x51] sm:$0xff] }
 0x247   : > { %v6420_v43 = vpop.f32.mrb[12].mxu1  ;;  %3202 = vrot.lane.b32.xlu1 %v8070_v1, %s6728_s10  ;;  %v8074_v28 = vld [vmem:[#allocation2 + $0x49] sm:$0xff]  ;;  %v8079_v19 = vld [vmem:[#allocation2 + $0x52] sm:$0xff] }
 0x248   : > { %v2036_v47 = vadd.f32 %v6420_v43, %v1679_v20  ;;  %v1924_v40 = vpop.f32.mrb[13].mxu1  ;;  %3200 = vrot.lane.b32.xlu0 %v8074_v28, %s6728_s10  ;;  %v8084_v42 = vld [vmem:[#allocation2 + $0x4a] sm:$0xff] }
 0x249   : > { %v2035_v48 = vadd.f32 %v1924_v40, %v1678_v51 }
 0x24a   : > { %2068 = vst.msk [vmem:[#allocation3 + $0x68] sm:$0xff] %vm284_vm0, %v2036_v47 }
 0x24b   : > { %2067 = vst.msk [vmem:[#allocation3 + $0x60] sm:$0xff] %vm284_vm0, %v2035_v48  ;;  %3330 = vrot.lane.b32.xlu1 %v8079_v19, %s6727_s9 }
 0x24c   : > { %v2932_v56 = vld [vmem:[#allocation3 + $0x38] sm:$0xff]  ;;  %3328 = vrot.lane.b32.xlu0 %v8084_v42, %s6727_s9 }
 0x24d   : > { %v2964_v15 = vmax.f32 %v2932_v56, 0.0  ;;  %v2931_v53 = vld [vmem:[#allocation3 + $0x30] sm:$0xff] }
 0x24e   : > { %v2963_v58 = vmax.f32 %v2931_v53, 0.0 }
 0x24f   : > { %2996 = vst.msk [vmem:[#allocation2 + $0x69] sm:$0xff] %vm284_vm0, %v2964_v15  ;;  %v1685_v15 = vld [vmem:[#allocation3 + $0x98] sm:$0xff] }
 0x250   : > { %2995 = vst.msk [vmem:[#allocation2 + $0x61] sm:$0xff] %vm284_vm0, %v2963_v58 }
 0x251   : > { %v2517_v20 = vld [vmem:[#allocation3 + $0x68] sm:$0xff] }
 0x252   : > { %v6468_v38 = vpop.f32.mrb[40].mxu0  ;;  %v2516_v51 = vld [vmem:[#allocation3 + $0x60] sm:$0xff] }
 0x253   : > { %v2870_v39 = vadd.f32 %v6468_v38, %v2513_v52  ;;  %v2742_v21 = vpop.f32.mrb[41].mxu0  ;;  %v1684_v38 = vld [vmem:[#allocation3 + $0x90] sm:$0xff] }
 0x254   : > { %v2869_v2 = vadd.f32 %v2742_v21, %v2512_v49 }
 0x255   : > { %2902 = vst.msk [vmem:[#allocation3 + $0x48] sm:$0xff] %vm284_vm0, %v2870_v39 }
 0x256   : > { %2901 = vst.msk [vmem:[#allocation3 + $0x40] sm:$0xff] %vm284_vm0, %v2869_v2  ;;  %v8092_v46 = vld [vmem:[#allocation2 + $0x69] sm:$0xff] }
 0x257   : > { %v6423_v45 = vpop.f32.mrb[14].mxu1  ;;  %3206 = vrot.lane.b32.xlu1 %v8092_v46, %s6728_s10  ;;  %v8096_v61 = vld [vmem:[#allocation2 + $0x61] sm:$0xff]  ;;  %v8101_v57 = vld [vmem:[#allocation2 + $0x6a] sm:$0xff] }
 0x258   : > { %v2038_v5 = vadd.f32 %v6423_v45, %v1681_v37  ;;  %v1934_v35 = vpop.f32.mrb[15].mxu1  ;;  %3204 = vrot.lane.b32.xlu0 %v8096_v61, %s6728_s10  ;;  %v8106_v50 = vld [vmem:[#allocation2 + $0x62] sm:$0xff] }
 0x259   : > { %v2037_v23 = vadd.f32 %v1934_v35, %v1680_v44 }
 0x25a   : > { %2070 = vst.msk [vmem:[#allocation3 + $0x78] sm:$0xff] %vm284_vm0, %v2038_v5 }
 0x25b   : > { %2069 = vst.msk [vmem:[#allocation3 + $0x70] sm:$0xff] %vm284_vm0, %v2037_v23  ;;  %3334 = vrot.lane.b32.xlu1 %v8101_v57, %s6727_s9 }
 0x25c   : > { %v2934_v16 = vld [vmem:[#allocation3 + $0x48] sm:$0xff]  ;;  %3332 = vrot.lane.b32.xlu0 %v8106_v50, %s6727_s9 }
 0x25d   : > { %v2966_v4 = vmax.f32 %v2934_v16, 0.0  ;;  %v2933_v8 = vld [vmem:[#allocation3 + $0x40] sm:$0xff] }
 0x25e   : > { %v2965_v31 = vmax.f32 %v2933_v8, 0.0 }
 0x25f   : > { %2998 = vst.msk [vmem:[#allocation2 + $0x81] sm:$0xff] %vm284_vm0, %v2966_v4 }
 0x260   : > { %2997 = vst.msk [vmem:[#allocation2 + $0x79] sm:$0xff] %vm284_vm0, %v2965_v31 }
 0x261   : > { %v2519_v35 = vld [vmem:[#allocation3 + $0x78] sm:$0xff] }
 0x262   : > { %v6471_v26 = vpop.f32.mrb[42].mxu0  ;;  %v2518_v4 = vld [vmem:[#allocation3 + $0x70] sm:$0xff] }
 0x263   : > { %v2872_v12 = vadd.f32 %v6471_v26, %v2515_v25  ;;  %v2752_v32 = vpop.f32.mrb[43].mxu0  ;;  %v1687_v26 = vld [vmem:[#allocation3 + $0xa8] sm:$0xff] }
 0x264   : > { %v2871_v10 = vadd.f32 %v2752_v32, %v2514_v27 }
 0x265   : > { %2904 = vst.msk [vmem:[#allocation3 + $0x58] sm:$0xff] %vm284_vm0, %v2872_v12 }
 0x266   : > { %2903 = vst.msk [vmem:[#allocation3 + $0x50] sm:$0xff] %vm284_vm0, %v2871_v10  ;;  %v8114_v33 = vld [vmem:[#allocation2 + $0x81] sm:$0xff]  ;;  %v1686_v10 = vld [vmem:[#allocation3 + $0xa0] sm:$0xff] }
 0x267   : > { %v6426_v63 = vpop.f32.mrb[16].mxu1  ;;  %3210 = vrot.lane.b32.xlu1 %v8114_v33, %s6728_s10  ;;  %v8118_v7 = vld [vmem:[#allocation2 + $0x79] sm:$0xff]  ;;  %v8123_v59 = vld [vmem:[#allocation2 + $0x82] sm:$0xff] }
 0x268   : > { %v2040_v9 = vadd.f32 %v6426_v63, %v1683_v17  ;;  %v1944_v30 = vpop.f32.mrb[17].mxu1  ;;  %3208 = vrot.lane.b32.xlu0 %v8118_v7, %s6728_s10  ;;  %v8128_v60 = vld [vmem:[#allocation2 + $0x7a] sm:$0xff] }
 0x269   : > { %v2039_v0 = vadd.f32 %v1944_v30, %v1682_v24 }
 0x26a   : > { %2072 = vst.msk [vmem:[#allocation3 + $0x88] sm:$0xff] %vm284_vm0, %v2040_v9 }
 0x26b   : > { %2071 = vst.msk [vmem:[#allocation3 + $0x80] sm:$0xff] %vm284_vm0, %v2039_v0  ;;  %3338 = vrot.lane.b32.xlu1 %v8123_v59, %s6727_s9 }
 0x26c   : > { %v2936_v3 = vld [vmem:[#allocation3 + $0x58] sm:$0xff]  ;;  %3336 = vrot.lane.b32.xlu0 %v8128_v60, %s6727_s9 }
 0x26d   : > { %v2968_v14 = vmax.f32 %v2936_v3, 0.0  ;;  %v2935_v13 = vld [vmem:[#allocation3 + $0x50] sm:$0xff] }
 0x26e   : > { %v2967_v11 = vmax.f32 %v2935_v13, 0.0 }
 0x26f   : > { %3000 = vst.msk [vmem:[#allocation2 + $0x99] sm:$0xff] %vm284_vm0, %v2968_v14 }
 0x270   : > { %2999 = vst.msk [vmem:[#allocation2 + $0x91] sm:$0xff] %vm284_vm0, %v2967_v11 }
 0x271   : > { %v2521_v13 = vld [vmem:[#allocation3 + $0x88] sm:$0xff] }
 0x272   : > { %v6474_v43 = vpop.f32.mrb[44].mxu0 }
 0x273   : > { %v2874_v47 = vadd.f32 %v6474_v43, %v2517_v20  ;;  %v2762_v40 = vpop.f32.mrb[45].mxu0  ;;  %v2520_v43 = vld [vmem:[#allocation3 + $0x80] sm:$0xff] }
 0x274   : > { %v2873_v48 = vadd.f32 %v2762_v40, %v2516_v51 }
 0x275   : > { %2906 = vst.msk [vmem:[#allocation3 + $0x68] sm:$0xff] %vm284_vm0, %v2874_v47 }
 0x276   : > { %2905 = vst.msk [vmem:[#allocation3 + $0x60] sm:$0xff] %vm284_vm0, %v2873_v48  ;;  %v8136_v56 = vld [vmem:[#allocation2 + $0x99] sm:$0xff]  ;;  %v1689_v48 = vld [vmem:[#allocation3 + $0xb8] sm:$0xff] }
 0x277   : > { %v6429_v53 = vpop.f32.mrb[18].mxu1  ;;  %3214 = vrot.lane.b32.xlu1 %v8136_v56, %s6728_s10  ;;  %v8140_v58 = vld [vmem:[#allocation2 + $0x91] sm:$0xff]  ;;  %v8145_v21 = vld [vmem:[#allocation2 + $0x9a] sm:$0xff] }
 0x278   : > { %v2042_v52 = vadd.f32 %v6429_v53, %v1685_v15  ;;  %v1954_v39 = vpop.f32.mrb[19].mxu1  ;;  %3212 = vrot.lane.b32.xlu0 %v8140_v58, %s6728_s10  ;;  %v8150_v2 = vld [vmem:[#allocation2 + $0x92] sm:$0xff] }
 0x279   : > { %v2041_v49 = vadd.f32 %v1954_v39, %v1684_v38  ;;  %v1688_v38 = vld [vmem:[#allocation3 + $0xb0] sm:$0xff] }
 0x27a   : > { %2074 = vst.msk [vmem:[#allocation3 + $0x98] sm:$0xff] %vm284_vm0, %v2042_v52 }
 0x27b   : > { %2073 = vst.msk [vmem:[#allocation3 + $0x90] sm:$0xff] %vm284_vm0, %v2041_v49  ;;  %3342 = vrot.lane.b32.xlu1 %v8145_v21, %s6727_s9 }
 0x27c   : > { %v2938_v37 = vld [vmem:[#allocation3 + $0x68] sm:$0xff]  ;;  %3340 = vrot.lane.b32.xlu0 %v8150_v2, %s6727_s9 }
 0x27d   : > { %v2970_v45 = vmax.f32 %v2938_v37, 0.0  ;;  %v2937_v5 = vld [vmem:[#allocation3 + $0x60] sm:$0xff] }
 0x27e   : > { %v2969_v44 = vmax.f32 %v2937_v5, 0.0 }
 0x27f   : > { %3002 = vst.msk [vmem:[#allocation2 + $0xb1] sm:$0xff] %vm284_vm0, %v2970_v45 }
 0x280   : > { %3001 = vst.msk [vmem:[#allocation2 + $0xa9] sm:$0xff] %vm284_vm0, %v2969_v44 }
 0x282   : > { %v6477_v23 = vpop.f32.mrb[46].mxu0 }
 0x283   : > { %v2876_v16 = vadd.f32 %v6477_v23, %v2519_v35  ;;  %v2772_v8 = vpop.f32.mrb[47].mxu0 }
 0x284   : > { %v2875_v31 = vadd.f32 %v2772_v8, %v2518_v4  ;;  %v8198_v4 = vld [vmem:[#allocation2 + $0x18] sm:$0xff] }
 0x285   : > { %2908 = vst.msk [vmem:[#allocation3 + $0x78] sm:$0xff] %vm284_vm0, %v2876_v16 }
 0x286   : > { %2907 = vst.msk [vmem:[#allocation3 + $0x70] sm:$0xff] %vm284_vm0, %v2875_v31  ;;  %v8158_v25 = vld [vmem:[#allocation2 + $0xb1] sm:$0xff] }
 0x287   : > { %v6432_v12 = vpop.f32.mrb[20].mxu1  ;;  %3218 = vrot.lane.b32.xlu1 %v8158_v25, %s6728_s10  ;;  %v8162_v27 = vld [vmem:[#allocation2 + $0xa9] sm:$0xff]  ;;  %v8167_v9 = vld [vmem:[#allocation2 + $0xb2] sm:$0xff] }
 0x288   : > { %v2044_v32 = vadd.f32 %v6432_v12, %v1687_v26  ;;  %v1964_v17 = vpop.f32.mrb[21].mxu1  ;;  %3216 = vrot.lane.b32.xlu0 %v8162_v27, %s6728_s10  ;;  %v8172_v24 = vld [vmem:[#allocation2 + $0xaa] sm:$0xff]  ;;  %v8200_v26 = vld [vmem:[#allocation2 + $0x20] sm:$0xff] }
 0x289   : > { %v2043_v63 = vadd.f32 %v1964_v17, %v1686_v10 }
 0x28a   : > { %2076 = vst.msk [vmem:[#allocation3 + $0xa8] sm:$0xff] %vm284_vm0, %v2044_v32 }
 0x28b   : > { %2075 = vst.msk [vmem:[#allocation3 + $0xa0] sm:$0xff] %vm284_vm0, %v2043_v63  ;;  %3346 = vrot.lane.b32.xlu1 %v8167_v9, %s6727_s9 }
 0x28c   : > { %v2940_v30 = vld [vmem:[#allocation3 + $0x78] sm:$0xff]  ;;  %3344 = vrot.lane.b32.xlu0 %v8172_v24, %s6727_s9 }
 0x28d   : > { %v2972_v0 = vmax.f32 %v2940_v30, 0.0  ;;  %v2939_v3 = vld [vmem:[#allocation3 + $0x70] sm:$0xff]  ;;  %v2523_v30 = vld [vmem:[#allocation3 + $0x98] sm:$0xff] }
 0x28e   : > { %v2971_v14 = vmax.f32 %v2939_v3, 0.0 }
 0x28f   : > { %3004 = vst.msk [vmem:[#allocation2 + $0xc9] sm:$0xff] %vm284_vm0, %v2972_v0 }
 0x290   : > { %3003 = vst.msk [vmem:[#allocation2 + $0xc1] sm:$0xff] %vm284_vm0, %v2971_v14  ;;  %v2522_v14 = vld [vmem:[#allocation3 + $0x90] sm:$0xff] }
 0x292   : > { %v6480_v11 = vpop.f32.mrb[48].mxu0 }
 0x293   : > { %v2878_v20 = vadd.f32 %v6480_v11, %v2521_v13  ;;  %v2782_v47 = vpop.f32.mrb[49].mxu0 }
 0x294   : > { %v2877_v51 = vadd.f32 %v2782_v47, %v2520_v43  ;;  %v1691_v43 = vld [vmem:[#allocation3 + $0xc8] sm:$0xff] }
 0x295   : > { %2910 = vst.msk [vmem:[#allocation3 + $0x88] sm:$0xff] %vm284_vm0, %v2878_v20 }
 0x296   : > { %2909 = vst.msk [vmem:[#allocation3 + $0x80] sm:$0xff] %vm284_vm0, %v2877_v51  ;;  %v8180_v40 = vld [vmem:[#allocation2 + $0xc9] sm:$0xff] }
 0x297   : > { %v6435_v15 = vpop.f32.mrb[22].mxu1  ;;  %3222 = vrot.lane.b32.xlu1 %v8180_v40, %s6728_s10  ;;  %v8184_v53 = vld [vmem:[#allocation2 + $0xc1] sm:$0xff]  ;;  %v8189_v5 = vld [vmem:[#allocation2 + $0xca] sm:$0xff] }
 0x298   : > { %v2046_v52 = vadd.f32 %v6435_v15, %v1689_v48  ;;  %v1974_v39 = vpop.f32.mrb[23].mxu1  ;;  %3220 = vrot.lane.b32.xlu0 %v8184_v53, %s6728_s10  ;;  %v8194_v44 = vld [vmem:[#allocation2 + $0xc2] sm:$0xff]  ;;  %v1690_v15 = vld [vmem:[#allocation3 + $0xc0] sm:$0xff] }
 0x299   : > { %v2045_v49 = vadd.f32 %v1974_v39, %v1688_v38  ;;  %v3195_v37 = vpop.permute.xlu1 %3194 }
 0x29a   : > { %2078 = vst.msk [vmem:[#allocation3 + $0xb8] sm:$0xff] %vm284_vm0, %v2046_v52  ;;  %v3193_v45 = vpop.permute.xlu0 %3192  ;;  %v3415_v10 = vsel %vm284_vm0, %v8200_v26, %v3195_v37 }
 0x29b   : > { %2077 = vst.msk [vmem:[#allocation3 + $0xb0] sm:$0xff] %vm284_vm0, %v2045_v49  ;;  %3350 = vrot.lane.b32.xlu1 %v8189_v5, %s6727_s9  ;;  %v3414_v12 = vsel %vm284_vm0, %v8198_v4, %v3193_v45 }
 0x29c   : > { %v2942_v35 = vld [vmem:[#allocation3 + $0x88] sm:$0xff]  ;;  %3348 = vrot.lane.b32.xlu0 %v8194_v44, %s6727_s9 }
 0x29d   : > { %v2974_v23 = vmax.f32 %v2942_v35, 0.0  ;;  %v2941_v16 = vld [vmem:[#allocation3 + $0x80] sm:$0xff]  ;;  %v3323_v8 = vpop.permute.xlu1 %3322 }
 0x29e   : > { %v2973_v31 = vmax.f32 %v2941_v16, 0.0  ;;  %v3321_v32 = vpop.permute.xlu0 %3320  ;;  %v3447_v63 = vsel %vm796_vm2, %v3415_v10, %v3323_v8  ;;  %v8232_v8 = vld [vmem:[#allocation2 + $0x30] sm:$0xff] }
 0x29f   : > { %3006 = vst.msk [vmem:[#allocation2 + $0xe1] sm:$0xff] %vm284_vm0, %v2974_v23  ;;  %v3446_v17 = vsel %vm796_vm2, %v3414_v12, %v3321_v32  ;;  %v8234_v32 = vld [vmem:[#allocation2 + $0x38] sm:$0xff] }
 0x2a0   : > { %3005 = vst.msk [vmem:[#allocation2 + $0xd9] sm:$0xff] %vm284_vm0, %v2973_v31  ;;  %6511 = vmatprep.mubr.msk.f32.mxu1 %vm864_vm3, %v3446_v17 }
 0x2a1   : > { %6512 = vmatmul.mubr.msk.f32.gmra.mrb[34].mxu1 %vm864_vm3, %v3447_v63 }
 0x2a2   : > { %v6483_v0 = vpop.f32.mrb[50].mxu0 }
 0x2a3   : > { %v2880_v3 = vadd.f32 %v6483_v0, %v2523_v30  ;;  %v2792_v13 = vpop.f32.mrb[51].mxu0 }
 0x2a4   : > { %v2879_v11 = vadd.f32 %v2792_v13, %v2522_v14 }
 0x2a5   : > { %2912 = vst.msk [vmem:[#allocation3 + $0x98] sm:$0xff] %vm284_vm0, %v2880_v3  ;;  %v2525_v3 = vld [vmem:[#allocation3 + $0xa8] sm:$0xff] }
 0x2a6   : > { %2911 = vst.msk [vmem:[#allocation3 + $0x90] sm:$0xff] %vm284_vm0, %v2879_v11  ;;  %v8214_v20 = vld [vmem:[#allocation2 + $0xe1] sm:$0xff]  ;;  %v2524_v11 = vld [vmem:[#allocation3 + $0xa0] sm:$0xff] }
 0x2a7   : > { %v6438_v47 = vpop.f32.mrb[24].mxu1  ;;  %3226 = vrot.lane.b32.xlu1 %v8214_v20, %s6728_s10  ;;  %v8218_v51 = vld [vmem:[#allocation2 + $0xd9] sm:$0xff]  ;;  %v8223_v37 = vld [vmem:[#allocation2 + $0xe2] sm:$0xff] }
 0x2a8   : > { %v2048_v48 = vadd.f32 %v6438_v47, %v1691_v43  ;;  %v1984_v52 = vpop.f32.mrb[25].mxu1  ;;  %3224 = vrot.lane.b32.xlu0 %v8218_v51, %s6728_s10  ;;  %v8228_v45 = vld [vmem:[#allocation2 + $0xda] sm:$0xff] }
 0x2a9   : > { %v2047_v38 = vadd.f32 %v1984_v52, %v1690_v15  ;;  %v3199_v39 = vpop.permute.xlu1 %3198  ;;  %v1693_v15 = vld [vmem:[#allocation3 + $0xd8] sm:$0xff] }
 0x2aa   : > { %2080 = vst.msk [vmem:[#allocation3 + $0xc8] sm:$0xff] %vm284_vm0, %v2048_v48  ;;  %v3197_v49 = vpop.permute.xlu0 %3196  ;;  %v3417_v63 = vsel %vm284_vm0, %v8234_v32, %v3199_v39 }
 0x2ab   : > { %2079 = vst.msk [vmem:[#allocation3 + $0xc0] sm:$0xff] %vm284_vm0, %v2047_v38  ;;  %3354 = vrot.lane.b32.xlu1 %v8223_v37, %s6727_s9  ;;  %v3416_v10 = vsel %vm284_vm0, %v8232_v8, %v3197_v49  ;;  %v1692_v49 = vld [vmem:[#allocation3 + $0xd0] sm:$0xff] }
 0x2ac   : > { %v2944_v35 = vld [vmem:[#allocation3 + $0x98] sm:$0xff]  ;;  %3352 = vrot.lane.b32.xlu0 %v8228_v45, %s6727_s9 }
 0x2ad   : > { %v2976_v23 = vmax.f32 %v2944_v35, 0.0  ;;  %v2943_v16 = vld [vmem:[#allocation3 + $0x90] sm:$0xff]  ;;  %v3327_v31 = vpop.permute.xlu1 %3326 }
 0x2ae   : > { %v2975_v12 = vmax.f32 %v2943_v16, 0.0  ;;  %v3325_v17 = vpop.permute.xlu0 %3324  ;;  %v3449_v0 = vsel %vm796_vm2, %v3417_v63, %v3327_v31 }
 0x2af   : > { %3008 = vst.msk [vmem:[#allocation2 + $0xf9] sm:$0xff] %vm284_vm0, %v2976_v23  ;;  %v3448_v30 = vsel %vm796_vm2, %v3416_v10, %v3325_v17 }
 0x2b0   : > { %3007 = vst.msk [vmem:[#allocation2 + $0xf1] sm:$0xff] %vm284_vm0, %v2975_v12  ;;  %6514 = vmatprep.mubr.msk.f32.mxu1 %vm864_vm3, %v3448_v30 }
 0x2b1   : > { %6515 = vmatmul.mubr.msk.f32.gmra.mrb[36].mxu1 %vm864_vm3, %v3449_v0  ;;  %v8266_v0 = vld [vmem:[#allocation2 + $0x48] sm:$0xff]  ;;  %v2529_v62 = vld [vmem:[#allocation3 + $0xc8] sm:$0xff] }
 0x2b2   : > { %v6486_v14 = vpop.f32.mrb[52].mxu0  ;;  %v2528_v6 = vld [vmem:[#allocation3 + $0xc0] sm:$0xff] }
 0x2b3   : > { %v2882_v13 = vadd.f32 %v6486_v14, %v2525_v3  ;;  %v2802_v43 = vpop.f32.mrb[53].mxu0 }
 0x2b4   : > { %v2881_v47 = vadd.f32 %v2802_v43, %v2524_v11 }
 0x2b5   : > { %2914 = vst.msk [vmem:[#allocation3 + $0xa8] sm:$0xff] %vm284_vm0, %v2882_v13  ;;  %v8268_v13 = vld [vmem:[#allocation2 + $0x50] sm:$0xff] }
 0x2b6   : > { %2913 = vst.msk [vmem:[#allocation3 + $0xa0] sm:$0xff] %vm284_vm0, %v2881_v47  ;;  %v8248_v48 = vld [vmem:[#allocation2 + $0xf9] sm:$0xff] }
 0x2b7   : > { %v6441_v52 = vpop.f32.mrb[26].mxu1  ;;  %3230 = vrot.lane.b32.xlu1 %v8248_v48, %s6728_s10  ;;  %v8252_v38 = vld [vmem:[#allocation2 + $0xf1] sm:$0xff]  ;;  %v8257_v12 = vld [vmem:[#allocation2 + $0xfa] sm:$0xff] }
 0x2b8   : > { %v2050_v39 = vadd.f32 %v6441_v52, %v1693_v15  ;;  %v1994_v35 = vpop.f32.mrb[27].mxu1  ;;  %3228 = vrot.lane.b32.xlu0 %v8252_v38, %s6728_s10  ;;  %v8262_v10 = vld [vmem:[#allocation2 + $0xf2] sm:$0xff] }
 0x2b9   : > { %v2049_v23 = vadd.f32 %v1994_v35, %v1692_v49  ;;  %v3203_v16 = vpop.permute.xlu1 %3202 }
 0x2ba   : > { %2082 = vst.msk [vmem:[#allocation3 + $0xd8] sm:$0xff] %vm284_vm0, %v2050_v39  ;;  %v3201_v31 = vpop.permute.xlu0 %3200  ;;  %v3419_v47 = vsel %vm284_vm0, %v8268_v13, %v3203_v16  ;;  %v2527_v39 = vld [vmem:[#allocation3 + $0xb8] sm:$0xff] }
 0x2bb   : > { %2081 = vst.msk [vmem:[#allocation3 + $0xd0] sm:$0xff] %vm284_vm0, %v2049_v23  ;;  %3358 = vrot.lane.b32.xlu1 %v8257_v12, %s6727_s9  ;;  %v3418_v11 = vsel %vm284_vm0, %v8266_v0, %v3201_v31  ;;  %v2526_v23 = vld [vmem:[#allocation3 + $0xb0] sm:$0xff] }
 0x2bc   : > { %v2946_v17 = vld [vmem:[#allocation3 + $0xa8] sm:$0xff]  ;;  %3356 = vrot.lane.b32.xlu0 %v8262_v10, %s6727_s9 }
 0x2bd   : > { %v2978_v63 = vmax.f32 %v2946_v17, 0.0  ;;  %v2945_v30 = vld [vmem:[#allocation3 + $0xa0] sm:$0xff]  ;;  %v3331_v3 = vpop.permute.xlu1 %3330 }
 0x2be   : > { %v2977_v14 = vmax.f32 %v2945_v30, 0.0  ;;  %v3329_v43 = vpop.permute.xlu0 %3328  ;;  %v3451_v52 = vsel %vm796_vm2, %v3419_v47, %v3331_v3 }
 0x2bf   : > { %3010 = vst.msk [vmem:[#allocation2 + $0x111] sm:$0xff] %vm284_vm0, %v2978_v63  ;;  %v3450_v15 = vsel %vm796_vm2, %v3418_v11, %v3329_v43  ;;  %v1695_v63 = vld [vmem:[#allocation3 + $0xe8] sm:$0xff]  ;;  %v1694_v11 = vld [vmem:[#allocation3 + $0xe0] sm:$0xff] }
 0x2c0   : > { %3009 = vst.msk [vmem:[#allocation2 + $0x109] sm:$0xff] %vm284_vm0, %v2977_v14  ;;  %6517 = vmatprep.mubr.msk.f32.mxu1 %vm864_vm3, %v3450_v15 }
 0x2c1   : > { %6518 = vmatmul.mubr.msk.f32.gmra.mrb[38].mxu1 %vm864_vm3, %v3451_v52 }
 0x2c2   : > { %v6489_v49 = vpop.f32.mrb[54].mxu0 }
 0x2c3   : > { %v2884_v35 = vadd.f32 %v6489_v49, %v2527_v39  ;;  %v2812_v31 = vpop.f32.mrb[55].mxu0 }
 0x2c4   : > { %v2883_v17 = vadd.f32 %v2812_v31, %v2526_v23 }
 0x2c5   : > { %2916 = vst.msk [vmem:[#allocation3 + $0xb8] sm:$0xff] %vm284_vm0, %v2884_v35 }
 0x2c6   : > { %2915 = vst.msk [vmem:[#allocation3 + $0xb0] sm:$0xff] %vm284_vm0, %v2883_v17  ;;  %v3115_v16 = vld [vmem:[#allocation2 + $0x111] sm:$0xff]  ;;  %v8297_v17 = vld [vmem:[#allocation2 + $0x60] sm:$0xff] }
 0x2c7   : > { %v6444_v30 = vpop.f32.mrb[28].mxu1  ;;  %3234 = vrot.lane.b32.xlu1 %v3115_v16, %s6728_s10  ;;  %v8283_v3 = vld [vmem:[#allocation2 + $0x109] sm:$0xff]  ;;  %v8288_v39 = vld [vmem:[#allocation2 + $0x112] sm:$0xff]  ;;  %9417 = vst [vmem:[#allocation37_spill] sm:$0xff] %v8297_v17 }
 0x2c8   : > { %v2052_v14 = vadd.f32 %v6444_v30, %v1695_v63  ;;  %v2004_v43 = vpop.f32.mrb[29].mxu1  ;;  %3232 = vrot.lane.b32.xlu0 %v8283_v3, %s6728_s10  ;;  %v8293_v49 = vld [vmem:[#allocation2 + $0x10a] sm:$0xff] }
 0x2c9   : > { %v2051_v47 = vadd.f32 %v2004_v43, %v1694_v11  ;;  %v3207_v15 = vpop.permute.xlu1 %3206  ;;  %9416 = vst [vmem:[#allocation36_spill] sm:$0xff] %v8293_v49  ;;  %v8299_v30 = vld [vmem:[#allocation2 + $0x68] sm:$0xff] }
 0x2ca   : > { %2084 = vst.msk [vmem:[#allocation3 + $0xe8] sm:$0xff] %vm284_vm0, %v2052_v14  ;;  %v3205_v52 = vpop.permute.xlu0 %3204  ;;  %9418 = vst [vmem:[#allocation38_spill] sm:$0xff] %v8299_v30  ;;  %v3421_v43 = vsel %vm284_vm0, %v8299_v30, %v3207_v15 }
 0x2cb   : > { %2083 = vst.msk [vmem:[#allocation3 + $0xe0] sm:$0xff] %vm284_vm0, %v2051_v47  ;;  %3362 = vrot.lane.b32.xlu1 %v8288_v39, %s6727_s9  ;;  %v3420_v14 = vsel %vm284_vm0, %v8297_v17, %v3205_v52 }
 0x2cc   : > { %v2948_v35 = vld [vmem:[#allocation3 + $0xb8] sm:$0xff]  ;;  %3360 = vrot.lane.b32.xlu0 %v8293_v49, %s6727_s9 }
 0x2cd   : > { %v2980_v23 = vmax.f32 %v2948_v35, 0.0  ;;  %v2947_v31 = vld [vmem:[#allocation3 + $0xb0] sm:$0xff]  ;;  %v3335_v16 = vpop.permute.xlu1 %3334 }
 0x2ce   : > { %v2979_v63 = vmax.f32 %v2947_v31, 0.0  ;;  %v3333_v11 = vpop.permute.xlu0 %3332  ;;  %v3453_v29 = vsel %vm796_vm2, %v3421_v43, %v3335_v16 }
 0x2cf   : > { %3012 = vst.msk [vmem:[#allocation2 + $0x129] sm:$0xff] %vm284_vm0, %v2980_v23  ;;  %v3452_v47 = vsel %vm796_vm2, %v3420_v14, %v3333_v11  ;;  %v6492_v35 = vpop.f32.mrb[56].mxu0  ;;  %v2531_v23 = vld [vmem:[#allocation3 + $0xd8] sm:$0xff] }
 0x2d0   : > { %3011 = vst.msk [vmem:[#allocation2 + $0x121] sm:$0xff] %vm284_vm0, %v2979_v63  ;;  %v2886_v31 = vadd.f32 %v6492_v35, %v2529_v62  ;;  %v2822_v49 = vpop.f32.mrb[57].mxu0  ;;  %6520 = vmatprep.mubr.msk.f32.mxu1 %vm864_vm3, %v3452_v47  ;;  %v2530_v62 = vld [vmem:[#allocation3 + $0xd0] sm:$0xff] }
 0x2d1   : > { %v2885_v52 = vadd.f32 %v2822_v49, %v2528_v6  ;;  %6521 = vmatmul.mubr.msk.f32.gmra.mrb[40].mxu1 %vm864_vm3, %v3453_v29 }
 0x2d2   : > { %2918 = vst.msk [vmem:[#allocation3 + $0xc8] sm:$0xff] %vm284_vm0, %v2886_v31 }
 0x2d3   : > { %2917 = vst.msk [vmem:[#allocation3 + $0xc0] sm:$0xff] %vm284_vm0, %v2885_v52 }
 0x2d6   : > { %v3117_v15 = vld [vmem:[#allocation2 + $0x129] sm:$0xff] }
 0x2d7   : > { %3238 = vrot.lane.b32.xlu1 %v3117_v15, %s6728_s10  ;;  %v6495_v14 = vpop.f32.mrb[58].mxu0  ;;  %v8314_v63 = vld [vmem:[#allocation2 + $0x121] sm:$0xff]  ;;  %v8319_v31 = vld [vmem:[#allocation2 + $0x12a] sm:$0xff] }
 0x2d8   : > { %9419 = vst [vmem:[#allocation39_spill] sm:$0xff] %v8314_v63  ;;  %v2888_v16 = vadd.f32 %v6495_v14, %v2531_v23  ;;  %3236 = vrot.lane.b32.xlu0 %v8314_v63, %s6728_s10  ;;  %v2832_v11 = vpop.f32.mrb[59].mxu0  ;;  %9420 = vst [vmem:[#allocation40_spill] sm:$0xff] %v8319_v31  ;;  %v8324_v15 = vld [vmem:[#allocation2 + $0x122] sm:$0xff]  ;;  %v8330_v23 = vld [vmem:[#allocation2 + $0x78] sm:$0xff] }
 0x2d9   : > { %v2950_v6 = vld [vmem:[#allocation3 + $0xc8] sm:$0xff]  ;;  %v2887_v49 = vadd.f32 %v2832_v11, %v2530_v62  ;;  %v3211_v29 = vpop.permute.xlu1 %3210  ;;  %9421 = vst [vmem:[#allocation41_spill] sm:$0xff] %v8324_v15  ;;  %9422 = vst [vmem:[#allocation42_spill] sm:$0xff] %v8330_v23 }
 0x2da   : > { %v2982_v43 = vmax.f32 %v2950_v6, 0.0  ;;  %v2949_v47 = vld [vmem:[#allocation3 + $0xc0] sm:$0xff]  ;;  %2920 = vst.msk [vmem:[#allocation3 + $0xd8] sm:$0xff] %vm284_vm0, %v2888_v16  ;;  %v3209_v35 = vpop.permute.xlu0 %3208  ;;  %v8332_v16 = vld [vmem:[#allocation2 + $0x80] sm:$0xff] }
 0x2db   : > { %v2981_v52 = vmax.f32 %v2949_v47, 0.0  ;;  %2919 = vst.msk [vmem:[#allocation3 + $0xd0] sm:$0xff] %vm284_vm0, %v2887_v49  ;;  %3366 = vrot.lane.b32.xlu1 %v8319_v31, %s6727_s9  ;;  %v3422_v62 = vsel %vm284_vm0, %v8330_v23, %v3209_v35  ;;  %v3423_v6 = vsel %vm284_vm0, %v8332_v16, %v3211_v29 }
 0x2dc   : > { %3014 = vst.msk [vmem:[#allocation2 + $0x141] sm:$0xff] %vm284_vm0, %v2982_v43  ;;  %3364 = vrot.lane.b32.xlu0 %v8324_v15, %s6727_s9  ;;  %v2533_v43 = vld [vmem:[#allocation3 + $0xe8] sm:$0xff] }
 0x2dd   : > { %3013 = vst.msk [vmem:[#allocation2 + $0x139] sm:$0xff] %vm284_vm0, %v2981_v52  ;;  %v3339_v14 = vpop.permute.xlu1 %3338  ;;  %v2532_v52 = vld [vmem:[#allocation3 + $0xe0] sm:$0xff] }
 0x2de   : > { %v3337_v11 = vpop.permute.xlu0 %3336  ;;  %v3455_v15 = vsel %vm796_vm2, %v3423_v6, %v3339_v14  ;;  %v6052_v14 = vld [vmem:[%s9339_s3 + $0x18] sm:$0xff] }
 0x2df   : > { %v3454_v49 = vsel %vm796_vm2, %v3422_v62, %v3337_v11  ;;  %v6498_v47 = vpop.f32.mrb[60].mxu0 }
 0x2e0   : > { %v2890_v31 = vadd.f32 %v6498_v47, %v2533_v43  ;;  %v2842_v63 = vpop.f32.mrb[61].mxu0  ;;  %6523 = vmatprep.mubr.msk.f32.mxu1 %vm864_vm3, %v3454_v49  ;;  %v1696_v49 = vld [vmem:[#allocation3 + $0xf0] sm:$0xff] }
 0x2e1   : > { %v2952_v30 = vld [vmem:[#allocation3 + $0xd8] sm:$0xff]  ;;  %v2889_v17 = vadd.f32 %v2842_v63, %v2532_v52  ;;  %6524 = vmatmul.mubr.msk.f32.gmra.mrb[42].mxu1 %vm864_vm3, %v3455_v15 }
 0x2e2   : > { %v2984_v35 = vmax.f32 %v2952_v30, 0.0  ;;  %v2951_v23 = vld [vmem:[#allocation3 + $0xd0] sm:$0xff]  ;;  %2922 = vst.msk [vmem:[#allocation3 + $0xe8] sm:$0xff] %vm284_vm0, %v2890_v31 }
 0x2e3   : > { %v2983_v29 = vmax.f32 %v2951_v23, 0.0  ;;  %2921 = vst.msk [vmem:[#allocation3 + $0xe0] sm:$0xff] %vm284_vm0, %v2889_v17  ;;  %v3119_v62 = vld [vmem:[#allocation2 + $0x141] sm:$0xff] }
 0x2e4   : > { %3016 = vst.msk [vmem:[#allocation2 + $0x159] sm:$0xff] %vm284_vm0, %v2984_v35  ;;  %3242 = vrot.lane.b32.xlu1 %v3119_v62, %s6728_s10  ;;  %v3118_v11 = vld [vmem:[#allocation2 + $0x139] sm:$0xff]  ;;  %v1697_v17 = vld [vmem:[#allocation3 + $0xf8] sm:$0xff] }
 0x2e5   : > { %3015 = vst.msk [vmem:[#allocation2 + $0x151] sm:$0xff] %vm284_vm0, %v2983_v29  ;;  %3240 = vrot.lane.b32.xlu0 %v3118_v11, %s6728_s10  ;;  %v6053_v30 = vld [vmem:[%s9339_s3 + $0x20] sm:$0xff]  ;;  %v6054_v23 = vld [vmem:[%s9339_s3 + $0x28] sm:$0xff] }
 0x2e6   : > { %v6685_v63 = vpack.c.bf16 %v6053_v30, %v6052_v14  ;;  %v3151_v15 = vld [vmem:[#allocation2 + $0x142] sm:$0xff]  ;;  %v3150_v47 = vld [vmem:[#allocation2 + $0x13a] sm:$0xff] }
 0x2e7   : > { %v6447_v31 = vpop.f32.mrb[30].mxu1 }
 0x2e8   : > { %v2054_v6 = vadd.f32 %v6447_v31, %v1697_v17  ;;  %v2014_v43 = vpop.f32.mrb[31].mxu1  ;;  %3370 = vrot.lane.b32.xlu1 %v3151_v15, %s6727_s9  ;;  %6686 = vmatprep.subr.bf16.mxu0 %v6685_v63  ;;  %v8365_v17 = vld [vmem:[#allocation2 + $0x90] sm:$0xff] }
 0x2e9   : > { %v2954_v52 = vld [vmem:[#allocation3 + $0xe8] sm:$0xff]  ;;  %v2053_v35 = vadd.f32 %v2014_v43, %v1696_v49  ;;  %v3215_v29 = vpop.permute.xlu1 %3214  ;;  %3368 = vrot.lane.b32.xlu0 %v3150_v47, %s6727_s9  ;;  %6688 = vmatpush3.bf16.msra.mxu0 %v6685_v63  ;;  %v9423_v49 = vmov 0.0  }
 0x2ea   : > { %v2986_v62 = vmax.f32 %v2954_v52, 0.0  ;;  %v2953_v14 = vld [vmem:[#allocation3 + $0xe0] sm:$0xff]  ;;  %2086 = vst.msk [vmem:[#allocation3 + $0xf8] sm:$0xff] %vm284_vm0, %v2054_v6  ;;  %v3213_v11 = vpop.permute.xlu0 %3212  ;;  %6560 = vmatprep.subr.mxu0 %v6054_v23  ;;  %v3073_v63 = vld [vmem:[#allocation2 + $0x98] sm:$0xff] }
 0x2eb   : > { %v2985_v30 = vmax.f32 %v2953_v14, 0.0  ;;  %2085 = vst.msk [vmem:[#allocation3 + $0xf0] sm:$0xff] %vm284_vm0, %v2053_v35  ;;  %v3424_v15 = vsel %vm284_vm0, %v8365_v17, %v3213_v11  ;;  %v3425_v43 = vsel %vm284_vm0, %v3073_v63, %v3215_v29  ;;  %v8377_v35 = vld [vmem:[%s9340_s4] ss:$0 sm:$0xff] }
 0x2ec   : > { %3018 = vst.msk [vmem:[#allocation2 + $0x171] sm:$0xff] %vm284_vm0, %v2986_v62  ;;  %4026 = vrot.lane.b32.xlu1 %v8029_v18, %s6728_s10  ;;  %v3120_v47 = vld [vmem:[#allocation2 + $0x151] sm:$0xff]  ;;  %3029 = vst.msk [vmem:[#allocation3 + $0x8] sm:$0xff] %vm284_vm0, %v8377_v35 }
 0x2ed   : > { %3017 = vst.msk [vmem:[#allocation2 + $0x169] sm:$0xff] %vm284_vm0, %v2985_v30  ;;  %v3343_v31 = vpop.permute.xlu1 %3342  ;;  %4024 = vrot.lane.b32.xlu0 %v8033_v36, %s6728_s10  ;;  %6561 = vmatpush3.msra.mxu0 %v6054_v23  ;;  %3028 = vst.msk [vmem:[#allocation3] sm:$0xff] %vm284_vm0, %v8377_v35  ;;  %v3121_v30 = vld [vmem:[#allocation2 + $0x159] sm:$0xff] }
 0x2ee   : > { %v3341_v6 = vpop.permute.xlu0 %3340  ;;  %6664 = vmatprep.subr.mxu0 %v9423_v49  ;;  %v3457_v36 = vsel %vm796_vm2, %v3425_v43, %v3343_v31  ;;  %3030 = vst.msk [vmem:[#allocation3 + $0x10] sm:$0xff] %vm284_vm0, %v8377_v35  ;;  %3031 = vst.msk [vmem:[#allocation3 + $0x18] sm:$0xff] %vm284_vm0, %v8377_v35  ;;  %v3153_v31 = vld [vmem:[#allocation2 + $0x15a] sm:$0xff] }
 0x2ef   : > { %v3456_v18 = vsel %vm796_vm2, %v3424_v15, %v3341_v6  ;;  %v6501_v52 = vpop.f32.mrb[62].mxu0  ;;  %3032 = vst.msk [vmem:[#allocation3 + $0x20] sm:$0xff] %vm284_vm0, %v8377_v35  ;;  %3033 = vst.msk [vmem:[#allocation3 + $0x28] sm:$0xff] %vm284_vm0, %v8377_v35 }
 0x2f0   : > { %6526 = vmatprep.mubr.msk.f32.mxu1 %vm864_vm3, %v3456_v18  ;;  %3244 = vrot.lane.b32.xlu1 %v3120_v47, %s6728_s10  ;;  %v2852_v23 = vpop.f32.mrb[63].mxu0  ;;  %3034 = vst.msk [vmem:[#allocation3 + $0x30] sm:$0xff] %vm284_vm0, %v8377_v35  ;;  %3035 = vst.msk [vmem:[#allocation3 + $0x38] sm:$0xff] %vm284_vm0, %v8377_v35 }
 0x2f1   : > { %3036 = vst.msk [vmem:[#allocation3 + $0x40] sm:$0xff] %vm284_vm0, %v8377_v35  ;;  %3037 = vst.msk [vmem:[#allocation3 + $0x48] sm:$0xff] %vm284_vm0, %v8377_v35  ;;  %6527 = vmatmul.mubr.msk.f32.gmra.mrb[44].mxu1 %vm864_vm3, %v3457_v36  ;;  %4152 = vrot.lane.b32.xlu0 %v8043_v54, %s6727_s9  ;;  %v2535_v29 = vld [vmem:[#allocation3 + $0xf8] sm:$0xff]  ;;  %v3152_v54 = vld [vmem:[#allocation2 + $0x152] sm:$0xff] }
 0x2f2   : > { %3038 = vst.msk [vmem:[#allocation3 + $0x50] sm:$0xff] %vm284_vm0, %v8377_v35  ;;  %3039 = vst.msk [vmem:[#allocation3 + $0x58] sm:$0xff] %vm284_vm0, %v8377_v35  ;;  %v2892_v62 = vadd.f32 %v6501_v52, %v2535_v29  ;;  %v2534_v14 = vld [vmem:[#allocation3 + $0xf0] sm:$0xff] }
 0x2f3   : > { %3040 = vst.msk [vmem:[#allocation3 + $0x60] sm:$0xff] %vm284_vm0, %v8377_v35  ;;  %3041 = vst.msk [vmem:[#allocation3 + $0x68] sm:$0xff] %vm284_vm0, %v8377_v35  ;;  %v2891_v11 = vadd.f32 %v2852_v23, %v2534_v14  ;;  %v3477_v63 = vld [vmem:[#allocation3 + $0x8] sm:$0xff]  ;;  %v8458_v14 = vld [vmem:[#allocation2 + $0xa8] sm:$0xff] }
 0x2f4   : > { %3042 = vst.msk [vmem:[#allocation3 + $0x70] sm:$0xff] %vm284_vm0, %v8377_v35  ;;  %3043 = vst.msk [vmem:[#allocation3 + $0x78] sm:$0xff] %vm284_vm0, %v8377_v35  ;;  %3246 = vrot.lane.b32.xlu1 %v3121_v30, %s6728_s10  ;;  %v3476_v6 = vld [vmem:[#allocation3] sm:$0xff] }
 0x2f5   : > { %3044 = vst.msk [vmem:[#allocation3 + $0x80] sm:$0xff] %vm284_vm0, %v8377_v35  ;;  %3045 = vst.msk [vmem:[#allocation3 + $0x88] sm:$0xff] %vm284_vm0, %v8377_v35  ;;  %4154 = vrot.lane.b32.xlu0 %v8038_v41, %s6727_s9  ;;  %v3075_v30 = vld [vmem:[#allocation2 + $0xb0] sm:$0xff] }
 0x2f6   : > { %3046 = vst.msk [vmem:[#allocation3 + $0x90] sm:$0xff] %vm284_vm0, %v8377_v35  ;;  %3047 = vst.msk [vmem:[#allocation3 + $0x98] sm:$0xff] %vm284_vm0, %v8377_v35 }
 0x2f7   : > { %3048 = vst.msk [vmem:[#allocation3 + $0xa0] sm:$0xff] %vm284_vm0, %v8377_v35  ;;  %3049 = vst.msk [vmem:[#allocation3 + $0xa8] sm:$0xff] %vm284_vm0, %v8377_v35  ;;  %v6510_v15 = vpop.f32.mrb[32].mxu1 }
 0x2f8   : > { %3050 = vst.msk [vmem:[#allocation3 + $0xb0] sm:$0xff] %vm284_vm0, %v8377_v35  ;;  %3051 = vst.msk [vmem:[#allocation3 + $0xb8] sm:$0xff] %vm284_vm0, %v8377_v35  ;;  %3374 = vrot.lane.b32.xlu1 %v3153_v31, %s6727_s9  ;;  %v3833_v43 = vadd.f32 %v6510_v15, %v3477_v63  ;;  %v3673_v18 = vpop.f32.mrb[33].mxu1 }
 0x2f9   : > { %3052 = vst.msk [vmem:[#allocation3 + $0xc0] sm:$0xff] %vm284_vm0, %v8377_v35  ;;  %3053 = vst.msk [vmem:[#allocation3 + $0xc8] sm:$0xff] %vm284_vm0, %v8377_v35  ;;  %v3219_v47 = vpop.permute.xlu1 %3218  ;;  %3372 = vrot.lane.b32.xlu0 %v3152_v54, %s6727_s9  ;;  %v3832_v52 = vadd.f32 %v3673_v18, %v3476_v6  ;;  %v3122_v6 = vld [vmem:[#allocation2 + $0x169] sm:$0xff] }
 0x2fa   : > { %3054 = vst.msk [vmem:[#allocation3 + $0xd0] sm:$0xff] %vm284_vm0, %v8377_v35  ;;  %3055 = vst.msk [vmem:[#allocation3 + $0xd8] sm:$0xff] %vm284_vm0, %v8377_v35  ;;  %v3217_v36 = vpop.permute.xlu0 %3216  ;;  %v3427_v63 = vsel %vm284_vm0, %v3075_v30, %v3219_v47  ;;  %v3154_v18 = vld [vmem:[#allocation2 + $0x16a] sm:$0xff] }
 0x2fb   : > { %3056 = vst.msk [vmem:[#allocation3 + $0xe0] sm:$0xff] %vm284_vm0, %v8377_v35  ;;  %3057 = vst.msk [vmem:[#allocation3 + $0xe8] sm:$0xff] %vm284_vm0, %v8377_v35  ;;  %v3426_v31 = vsel %vm284_vm0, %v8458_v14, %v3217_v36  ;;  %v6087_v36 = vld [vmem:[%s9339_s3 + $0x30] sm:$0xff] }
 0x2fc   : > { %2924 = vst.msk [vmem:[#allocation3 + $0xf8] sm:$0xff] %vm284_vm0, %v2892_v62  ;;  %2923 = vst.msk [vmem:[#allocation3 + $0xf0] sm:$0xff] %vm284_vm0, %v2891_v11  ;;  %4030 = vrot.lane.b32.xlu1 %v8051_v34, %s6728_s10 }
 0x2fd   : > { %3865 = vst.msk [vmem:[#allocation3 + $0x8] sm:$0xff] %vm284_vm0, %v3833_v43  ;;  %3864 = vst.msk [vmem:[#allocation3] sm:$0xff] %vm284_vm0, %v3832_v52  ;;  %v3347_v11 = vpop.permute.xlu1 %3346  ;;  %4028 = vrot.lane.b32.xlu0 %v8055_v55, %s6728_s10  ;;  %v3123_v55 = vld [vmem:[#allocation2 + $0x171] sm:$0xff] }
 0x2fe   : > { %v3345_v34 = vpop.permute.xlu0 %3344  ;;  %v3459_v54 = vsel %vm796_vm2, %v3427_v63, %v3347_v11  ;;  %v3155_v43 = vld [vmem:[#allocation2 + $0x172] sm:$0xff] }
 0x2ff   : > { %v3458_v15 = vsel %vm796_vm2, %v3426_v31, %v3345_v34 }
 0x300   : > { %6529 = vmatprep.mubr.msk.f32.mxu1 %vm864_vm3, %v3458_v15  ;;  %3248 = vrot.lane.b32.xlu1 %v3122_v6, %s6728_s10  ;;  %v4765_v15 = vld [vmem:[#allocation2 + $0x31] sm:$0xff] }
 0x301   : > { %6530 = vmatmul.mubr.msk.f32.gmra.mrb[46].mxu1 %vm864_vm3, %v3459_v54  ;;  %4156 = vrot.lane.b32.xlu0 %v8062_v22, %s6727_s9  ;;  %v6088_v22 = vld [vmem:[%s9339_s3 + $0x38] sm:$0xff] }
 0x302   : > { %v4797_v6 = vld [vmem:[#allocation2 + $0x32] sm:$0xff] }
 0x303   : > { %v2956_v23 = vld [vmem:[#allocation3 + $0xf8] sm:$0xff]  ;;  %v2955_v29 = vld [vmem:[#allocation3 + $0xf0] sm:$0xff] }
 0x304   : > { %v2988_v41 = vmax.f32 %v2956_v23, 0.0  ;;  %3059 = vst.msk [vmem:[#allocation3 + $0xf8] sm:$0xff] %vm284_vm0, %v8377_v35  ;;  %v2987_v62 = vmax.f32 %v2955_v29, 0.0  ;;  %3058 = vst.msk [vmem:[#allocation3 + $0xf0] sm:$0xff] %vm284_vm0, %v8377_v35  ;;  %3250 = vrot.lane.b32.xlu1 %v3123_v55, %s6728_s10  ;;  %v6709_v35 = vld [vmem:[#allocation2 + $0x3a] sm:$0xff]  ;;  %v6689_v23 = vpack.c.bf16 %v6088_v22, %v6087_v36  ;;  %v6710_v22 = vld [vmem:[#allocation2 + $0x49] sm:$0xff] }
 0x305   : > { %4158 = vrot.lane.b32.xlu0 %v6709_v35, %s6727_s9  ;;  %v3078_v55 = vld [vmem:[#allocation2 + $0xd8] sm:$0xff] }
 0x306   : > { %3020 = vst.msk [vmem:[#allocation2 + $0x189] sm:$0xff] %vm284_vm0, %v2988_v41  ;;  %3019 = vst.msk [vmem:[#allocation2 + $0x181] sm:$0xff] %vm284_vm0, %v2987_v62  ;;  %v3076_v41 = vld [vmem:[#allocation2 + $0xc0] sm:$0xff]  ;;  %v3077_v62 = vld [vmem:[#allocation2 + $0xc8] sm:$0xff]  ;;  %6690 = vmatprep.subr.bf16.mxu1 %v6689_v23 }
 0x307   : > { %6692 = vmatpush3.bf16.msra.mxu1 %v6689_v23  ;;  %v4799_v23 = vld [vmem:[#allocation2 + $0x4a] sm:$0xff] }
 0x308   : > { %3378 = vrot.lane.b32.xlu1 %v3155_v43, %s6727_s9  ;;  %v3079_v43 = vld [vmem:[#allocation2 + $0xe0] sm:$0xff] }
 0x309   : > { %v3223_v47 = vpop.permute.xlu1 %3222  ;;  %3376 = vrot.lane.b32.xlu0 %v3154_v18, %s6727_s9 }
 0x30a   : > { %v3221_v52 = vpop.permute.xlu0 %3220  ;;  %v3429_v31 = vsel %vm284_vm0, %v3077_v62, %v3223_v47  ;;  %v3080_v62 = vld [vmem:[#allocation2 + $0xf0] sm:$0xff] }
 0x30b   : > { %v3428_v11 = vsel %vm284_vm0, %v3076_v41, %v3221_v52 }
 0x30c   : > { %4034 = vrot.lane.b32.xlu1 %v8070_v1, %s6728_s10  ;;  %v6089_v1 = vld [vmem:[%s9339_s3 + $0x40] sm:$0xff] }
 0x30d   : > { %v3351_v29 = vpop.permute.xlu1 %3350  ;;  %4032 = vrot.lane.b32.xlu0 %v8074_v28, %s6728_s10  ;;  %6614 = vmatprep.subr.mxu1 %v6089_v1  ;;  %v4766_v28 = vld [vmem:[#allocation2 + $0x39] sm:$0xff] }
 0x30e   : > { %v3349_v30 = vpop.permute.xlu0 %3348  ;;  %v3461_v63 = vsel %vm796_vm2, %v3429_v31, %v3351_v29  ;;  %6615 = vmatpush3.msra.mxu1 %v6089_v1 }
 0x30f   : > { %v3460_v34 = vsel %vm796_vm2, %v3428_v11, %v3349_v30  ;;  %v3081_v11 = vld [vmem:[#allocation2 + $0xf8] sm:$0xff] }
 0x310   : > { %6532 = vmatprep.mubr.msk.f32.mxu1 %vm864_vm3, %v3460_v34  ;;  %4162 = vrot.lane.b32.xlu1 %v8079_v19, %s6727_s9 }
 0x311   : > { %6533 = vmatmul.mubr.msk.f32.gmra.mrb[48].mxu1 %vm864_vm3, %v3461_v63  ;;  %4160 = vrot.lane.b32.xlu0 %v8084_v42, %s6727_s9  ;;  %v4798_v42 = vld [vmem:[#allocation2 + $0x3a] sm:$0xff] }
 0x312   : > { %v6711_v63 = vld [vmem:[#allocation2 + $0x61] sm:$0xff] }
 0x314   : > { %4863 = vrot.lane.b32.xlu1 %v4766_v28, %s6728_s10  ;;  %v4801_v28 = vld [vmem:[#allocation2 + $0x62] sm:$0xff] }
 0x315   : > { %4861 = vrot.lane.b32.xlu0 %v4765_v15, %s6728_s10 }
 0x318   : > { %4036 = vrot.lane.b32.xlu1 %v8096_v61, %s6728_s10 }
 0x319   : > { %v3227_v54 = vpop.permute.xlu1 %3226  ;;  %4989 = vrot.lane.b32.xlu0 %v4797_v6, %s6727_s9 }
 0x31a   : > { %v3225_v19 = vpop.permute.xlu0 %3224  ;;  %v3431_v52 = vsel %vm284_vm0, %v3079_v43, %v3227_v54  ;;  %v3082_v54 = vld [vmem:[#allocation2 + $0x108] sm:$0xff] }
 0x31b   : > { %v3430_v18 = vsel %vm284_vm0, %v3078_v55, %v3225_v19  ;;  %v3083_v19 = vld [vmem:[#allocation2 + $0x110] sm:$0xff] }
 0x31c   : > { %4038 = vrot.lane.b32.xlu1 %v8092_v46, %s6728_s10  ;;  %v4768_v46 = vld [vmem:[#allocation2 + $0x51] sm:$0xff] }
 0x31d   : > { %v3355_v35 = vpop.permute.xlu1 %3354  ;;  %4991 = vrot.lane.b32.xlu0 %v4798_v42, %s6727_s9 }
 0x31e   : > { %v3353_v47 = vpop.permute.xlu0 %3352  ;;  %v3463_v36 = vsel %vm796_vm2, %v3431_v52, %v3355_v35  ;;  %v6714_v52 = vld [vmem:[#allocation2 + $0x7a] sm:$0xff] }
 0x31f   : > { %v3462_v61 = vsel %vm796_vm2, %v3430_v18, %v3353_v47  ;;  %v6713_v18 = vld [vmem:[#allocation2 + $0x79] sm:$0xff] }
 0x320   : > { %6535 = vmatprep.mubr.msk.f32.mxu1 %vm864_vm3, %v3462_v61  ;;  %4166 = vrot.lane.b32.xlu1 %v8101_v57, %s6727_s9  ;;  %v4800_v57 = vld [vmem:[#allocation2 + $0x52] sm:$0xff] }
 0x321   : > { %6536 = vmatmul.mubr.msk.f32.gmra.mrb[50].mxu1 %vm864_vm3, %v3463_v36  ;;  %4164 = vrot.lane.b32.xlu0 %v8106_v50, %s6727_s9  ;;  %v3084_v36 = vld [vmem:[#allocation2 + $0x120] sm:$0xff] }
 0x324   : > { %4867 = vrot.lane.b32.xlu1 %v4768_v46, %s6728_s10  ;;  %v3085_v46 = vld [vmem:[#allocation2 + $0x128] sm:$0xff] }
 0x325   : > { %4865 = vrot.lane.b32.xlu0 %v6710_v22, %s6728_s10 }
 0x328   : > { %4040 = vrot.lane.b32.xlu1 %v8118_v7, %s6728_s10 }
 0x329   : > { %v3231_v41 = vpop.permute.xlu1 %3230  ;;  %4993 = vrot.lane.b32.xlu0 %v4799_v23, %s6727_s9 }
 0x32a   : > { %v3229_v29 = vpop.permute.xlu0 %3228  ;;  %v3433_v34 = vsel %vm284_vm0, %v3081_v11, %v3231_v41  ;;  %v6717_v11 = vld [vmem:[#allocation2 + $0x92] sm:$0xff] }
 0x32b   : > { %v3432_v30 = vsel %vm284_vm0, %v3080_v62, %v3229_v29 }
 0x32c   : > { %4042 = vrot.lane.b32.xlu1 %v8114_v33, %s6728_s10  ;;  %v4770_v33 = vld [vmem:[#allocation2 + $0x69] sm:$0xff] }
 0x32d   : > { %v3359_v50 = vpop.permute.xlu1 %3358  ;;  %4995 = vrot.lane.b32.xlu0 %v4800_v57, %s6727_s9  ;;  %v6716_v57 = vld [vmem:[#allocation2 + $0x91] sm:$0xff] }
 0x32e   : > { %v3357_v31 = vpop.permute.xlu0 %3356  ;;  %v3465_v1 = vsel %vm796_vm2, %v3433_v34, %v3359_v50 }
 0x32f   : > { %v3464_v7 = vsel %vm796_vm2, %v3432_v30, %v3357_v31  ;;  %v3087_v31 = vld [vmem:[#allocation2 + $0x140] sm:$0xff] }
 0x330   : > { %6538 = vmatprep.mubr.msk.f32.mxu1 %vm864_vm3, %v3464_v7  ;;  %4170 = vrot.lane.b32.xlu1 %v8123_v59, %s6727_s9  ;;  %v4802_v59 = vld [vmem:[#allocation2 + $0x6a] sm:$0xff] }
 0x331   : > { %6539 = vmatmul.mubr.msk.f32.gmra.mrb[52].mxu1 %vm864_vm3, %v3465_v1  ;;  %4168 = vrot.lane.b32.xlu0 %v8128_v60, %s6727_s9 }
 0x334   : > { %4871 = vrot.lane.b32.xlu1 %v4770_v33, %s6728_s10  ;;  %v4806_v33 = vld [vmem:[#allocation2 + $0x9a] sm:$0xff] }
 0x335   : > { %4869 = vrot.lane.b32.xlu0 %v6711_v63, %s6728_s10 }
 0x338   : > { %4044 = vrot.lane.b32.xlu1 %v8140_v58, %s6728_s10 }
 0x339   : > { %v3235_v15 = vpop.permute.xlu1 %3234  ;;  %4997 = vrot.lane.b32.xlu0 %v4801_v28, %s6727_s9 }
 0x33a   : > { %v3233_v6 = vpop.permute.xlu0 %3232  ;;  %v3435_v35 = vsel %vm284_vm0, %v3083_v19, %v3235_v15 }
 0x33b   : > { %v3434_v42 = vsel %vm284_vm0, %v3082_v54, %v3233_v6 }
 0x33c   : > { %4046 = vrot.lane.b32.xlu1 %v8136_v56, %s6728_s10  ;;  %v6712_v56 = vld [vmem:[#allocation2 + $0x81] sm:$0xff] }
 0x33d   : > { %v3363_v60 = vpop.permute.xlu1 %3362  ;;  %4999 = vrot.lane.b32.xlu0 %v4802_v59, %s6727_s9  ;;  %v4776_v59 = vld [vmem:[#allocation2 + $0xb1] sm:$0xff] }
 0x33e   : > { %v3361_v55 = vpop.permute.xlu0 %3360  ;;  %v3467_v43 = vsel %vm796_vm2, %v3435_v35, %v3363_v60  ;;  %v4775_v60 = vld [vmem:[#allocation2 + $0xa9] sm:$0xff] }
 0x33f   : > { %v3466_v58 = vsel %vm796_vm2, %v3434_v42, %v3361_v55  ;;  %v3088_v55 = vld [vmem:[#allocation2 + $0x150] sm:$0xff] }
 0x340   : > { %6541 = vmatprep.mubr.msk.f32.mxu1 %vm864_vm3, %v3466_v58  ;;  %4174 = vrot.lane.b32.xlu1 %v8145_v21, %s6727_s9  ;;  %v4804_v21 = vld [vmem:[#allocation2 + $0x82] sm:$0xff] }
 0x341   : > { %6542 = vmatmul.mubr.msk.f32.gmra.mrb[54].mxu1 %vm864_vm3, %v3467_v43  ;;  %4172 = vrot.lane.b32.xlu0 %v8150_v2, %s6727_s9  ;;  %v3089_v43 = vld [vmem:[#allocation2 + $0x158] sm:$0xff] }
 0x344   : > { %4875 = vrot.lane.b32.xlu1 %v6712_v56, %s6728_s10 }
 0x345   : > { %4873 = vrot.lane.b32.xlu0 %v6713_v18, %s6728_s10 }
 0x348   : > { %4048 = vrot.lane.b32.xlu1 %v8162_v27, %s6728_s10 }
 0x349   : > { %v3239_v47 = vpop.permute.xlu1 %3238  ;;  %5001 = vrot.lane.b32.xlu0 %v6714_v52, %s6727_s9 }
 0x34a   : > { %v3237_v61 = vpop.permute.xlu0 %3236  ;;  %v3437_v41 = vsel %vm284_vm0, %v3085_v46, %v3239_v47  ;;  %v4808_v47 = vld [vmem:[#allocation2 + $0xb2] sm:$0xff]  ;;  %v4778_v46 = vld [vmem:[#allocation2 + $0xc9] sm:$0xff] }
 0x34b   : > { %v3436_v22 = vsel %vm284_vm0, %v3084_v36, %v3237_v61  ;;  %v3479_v36 = vld [vmem:[#allocation3 + $0x18] sm:$0xff] }
 0x34c   : > { %4050 = vrot.lane.b32.xlu1 %v8158_v25, %s6728_s10  ;;  %v6715_v25 = vld [vmem:[#allocation2 + $0x99] sm:$0xff] }
 0x34d   : > { %v3367_v2 = vpop.permute.xlu1 %3366  ;;  %5003 = vrot.lane.b32.xlu0 %v4804_v21, %s6727_s9 }
 0x34e   : > { %v3365_v23 = vpop.permute.xlu0 %3364  ;;  %v3469_v29 = vsel %vm796_vm2, %v3437_v41, %v3367_v2 }
 0x34f   : > { %v3468_v27 = vsel %vm796_vm2, %v3436_v22, %v3365_v23  ;;  %v3478_v22 = vld [vmem:[#allocation3 + $0x10] sm:$0xff] }
 0x350   : > { %6544 = vmatprep.mubr.msk.f32.mxu1 %vm864_vm3, %v3468_v27  ;;  %4178 = vrot.lane.b32.xlu1 %v8167_v9, %s6727_s9  ;;  %v3086_v9 = vld [vmem:[#allocation2 + $0x138] sm:$0xff]  ;;  %v4777_v27 = vld [vmem:[#allocation2 + $0xc1] sm:$0xff] }
 0x351   : > { %6545 = vmatmul.mubr.msk.f32.gmra.mrb[56].mxu1 %vm864_vm3, %v3469_v29  ;;  %4176 = vrot.lane.b32.xlu0 %v8172_v24, %s6727_s9 }
 0x354   : > { %4879 = vrot.lane.b32.xlu1 %v6715_v25, %s6728_s10 }
 0x355   : > { %4877 = vrot.lane.b32.xlu0 %v6716_v57, %s6728_s10 }
 0x356   : > { %v3243_v62 = vpop.permute.xlu1 %3242 }
 0x357   : > { %v3241_v50 = vpop.permute.xlu0 %3240  ;;  %v3439_v7 = vsel %vm284_vm0, %v3087_v31, %v3243_v62 }
 0x358   : > { %4052 = vrot.lane.b32.xlu1 %v8184_v53, %s6728_s10  ;;  %v3438_v34 = vsel %vm284_vm0, %v3086_v9, %v3241_v50  ;;  %v4809_v50 = vld [vmem:[#allocation2 + $0xc2] sm:$0xff] }
 0x359   : > { %5005 = vrot.lane.b32.xlu0 %v6717_v11, %s6727_s9  ;;  %v3090_v11 = vld [vmem:[#allocation2 + $0x168] sm:$0xff] }
 0x35a   : > { %v3371_v30 = vpop.permute.xlu1 %3370 }
 0x35b   : > { %v3369_v24 = vpop.permute.xlu0 %3368  ;;  %v3471_v63 = vsel %vm796_vm2, %v3439_v7, %v3371_v30  ;;  %v4810_v7 = vld [vmem:[#allocation2 + $0xca] sm:$0xff] }
 0x35c   : > { %v3470_v1 = vsel %vm796_vm2, %v3438_v34, %v3369_v24  ;;  %4054 = vrot.lane.b32.xlu1 %v8180_v40, %s6728_s10 }
 0x35d   : > { %6547 = vmatprep.mubr.msk.f32.mxu1 %vm864_vm3, %v3470_v1  ;;  %5007 = vrot.lane.b32.xlu0 %v4806_v33, %s6727_s9 }
 0x35e   : > { %v4027_v53 = vpop.permute.xlu1 %4026  ;;  %6548 = vmatmul.mubr.msk.f32.gmra.mrb[58].mxu1 %vm864_vm3, %v3471_v63 }
 0x35f   : > { %v4025_v28 = vpop.permute.xlu0 %4024 }
 0x360   : > { %4182 = vrot.lane.b32.xlu1 %v8189_v5, %s6727_s9  ;;  %v4248_v40 = vsel %vm284_vm0, %v8198_v4, %v4025_v28  ;;  %v4249_v5 = vsel %vm284_vm0, %v8200_v26, %v4027_v53  ;;  %v4807_v4 = vld [vmem:[#allocation2 + $0xaa] sm:$0xff]  ;;  %v3481_v53 = vld [vmem:[#allocation3 + $0x28] sm:$0xff] }
 0x361   : > { %4180 = vrot.lane.b32.xlu0 %v8194_v44, %s6727_s9 }
 0x362   : > { %v3245_v15 = vpop.permute.xlu1 %3244 }
 0x363   : > { %v4153_v6 = vpop.permute.xlu0 %4152  ;;  %v3440_v58 = vsel %vm284_vm0, %v3088_v55, %v3245_v15  ;;  %v4780_v15 = vld [vmem:[#allocation2 + $0xe1] sm:$0xff] }
 0x364   : > { %v4280_v54 = vsel %vm796_vm2, %v4248_v40, %v4153_v6  ;;  %4883 = vrot.lane.b32.xlu1 %v4776_v59, %s6728_s10  ;;  %v3480_v40 = vld [vmem:[#allocation3 + $0x20] sm:$0xff] }
 0x365   : > { %6562 = vmatprep.mubr.msk.f32.mxu0 %vm864_vm3, %v4280_v54  ;;  %4881 = vrot.lane.b32.xlu0 %v4775_v60, %s6728_s10 }
 0x366   : > { %v3247_v19 = vpop.permute.xlu1 %3246 }
 0x367   : > { %v4155_v44 = vpop.permute.xlu0 %4154  ;;  %v3441_v18 = vsel %vm284_vm0, %v3089_v43, %v3247_v19 }
 0x368   : > { %v4281_v42 = vsel %vm796_vm2, %v4249_v5, %v4155_v44  ;;  %4056 = vrot.lane.b32.xlu1 %v8218_v51, %s6728_s10  ;;  %v4811_v44 = vld [vmem:[#allocation2 + $0xda] sm:$0xff] }
 0x369   : > { %6563 = vmatmul.mubr.msk.f32.vlgmr.msra.gmra.mrb[64].mxu0 %vm864_vm3, %v4281_v42  ;;  %5009 = vrot.lane.b32.xlu0 %v4807_v4, %s6727_s9  ;;  %v4733_v42 = vld [vmem:[#allocation2 + $0x30] sm:$0xff] }
 0x36a   : > { %v3375_v35 = vpop.permute.xlu1 %3374 }
 0x36b   : > { %v3373_v56 = vpop.permute.xlu0 %3372  ;;  %v3473_v51 = vsel %vm796_vm2, %v3441_v18, %v3375_v35 }
 0x36c   : > { %v3472_v26 = vsel %vm796_vm2, %v3440_v58, %v3373_v56  ;;  %4058 = vrot.lane.b32.xlu1 %v8214_v20, %s6728_s10  ;;  %v8663_v58 = vld [vmem:[#allocation2 + $0x111] sm:$0xff]  ;;  %v4812_v56 = vld [vmem:[#allocation2 + $0xe2] sm:$0xff] }
 0x36d   : > { %6550 = vmatprep.mubr.msk.f32.mxu1 %vm864_vm3, %v3472_v26  ;;  %5011 = vrot.lane.b32.xlu0 %v4808_v47, %s6727_s9 }
 0x36e   : > { %v4031_v52 = vpop.permute.xlu1 %4030  ;;  %6551 = vmatmul.mubr.msk.f32.gmra.mrb[60].mxu1 %vm864_vm3, %v3473_v51 }
 0x36f   : > { %v4029_v61 = vpop.permute.xlu0 %4028 }
 0x370   : > { %4186 = vrot.lane.b32.xlu1 %v8223_v37, %s6727_s9  ;;  %v4250_v20 = vsel %vm284_vm0, %v8232_v8, %v4029_v61  ;;  %v4251_v8 = vsel %vm284_vm0, %v8234_v32, %v4031_v52  ;;  %v3091_v32 = vld [vmem:[#allocation2 + $0x170] sm:$0xff] }
 0x371   : > { %4184 = vrot.lane.b32.xlu0 %v8228_v45, %s6727_s9  ;;  %v9424_v52 = vld [vmem:[#allocation36_spill] sm:$0xff] }
 0x372   : > { %v3249_v21 = vpop.permute.xlu1 %3248 }
 0x373   : > { %v4157_v2 = vpop.permute.xlu0 %4156  ;;  %v3442_v30 = vsel %vm284_vm0, %v3090_v11, %v3249_v21  ;;  %v3483_v21 = vld [vmem:[#allocation3 + $0x38] sm:$0xff]  ;;  %v4813_v11 = vld [vmem:[#allocation2 + $0xf2] sm:$0xff] }
 0x374   : > { %v4282_v23 = vsel %vm796_vm2, %v4250_v20, %v4157_v2  ;;  %v6513_v41 = vpop.f32.mrb[34].mxu1  ;;  %4887 = vrot.lane.b32.xlu1 %v4778_v46, %s6728_s10  ;;  %v4782_v46 = vld [vmem:[#allocation2 + $0xf9] sm:$0xff] }
 0x375   : > { %v3835_v29 = vadd.f32 %v6513_v41, %v3479_v36  ;;  %v3683_v25 = vpop.f32.mrb[35].mxu1  ;;  %6565 = vmatprep.mubr.msk.f32.mxu0 %vm864_vm3, %v4282_v23  ;;  %4885 = vrot.lane.b32.xlu0 %v4777_v27, %s6728_s10  ;;  %v9425_v36 = vld [vmem:[#allocation37_spill] sm:$0xff]  ;;  %v9426_v23 = vld [vmem:[#allocation38_spill] sm:$0xff] }
 0x376   : > { %v3834_v37 = vadd.f32 %v3683_v25, %v3478_v22  ;;  %v3251_v45 = vpop.permute.xlu1 %3250  ;;  %v3482_v22 = vld [vmem:[#allocation3 + $0x30] sm:$0xff] }
 0x377   : > { %3867 = vst.msk [vmem:[#allocation3 + $0x18] sm:$0xff] %vm284_vm0, %v3835_v29  ;;  %v4159_v57 = vpop.permute.xlu0 %4158  ;;  %v3443_v34 = vsel %vm284_vm0, %v3091_v32, %v3251_v45 }
 0x378   : > { %3866 = vst.msk [vmem:[#allocation3 + $0x10] sm:$0xff] %vm284_vm0, %v3834_v37  ;;  %v4283_v62 = vsel %vm796_vm2, %v4251_v8, %v4159_v57  ;;  %4060 = vrot.lane.b32.xlu1 %v8252_v38, %s6728_s10 }
 0x379   : > { %6566 = vmatmul.mubr.msk.f32.gmra.mrb[66].mxu0 %vm864_vm3, %v4283_v62  ;;  %5013 = vrot.lane.b32.xlu0 %v4809_v50, %s6727_s9  ;;  %v9427_v50 = vld [vmem:[#allocation39_spill] sm:$0xff] }
 0x37a   : > { %v3379_v9 = vpop.permute.xlu1 %3378 }
 0x37b   : > { %v3377_v31 = vpop.permute.xlu0 %3376  ;;  %v3475_v38 = vsel %vm796_vm2, %v3443_v34, %v3379_v9  ;;  %v4735_v9 = vld [vmem:[#allocation2 + $0x48] sm:$0xff] }
 0x37c   : > { %v3474_v24 = vsel %vm796_vm2, %v3442_v30, %v3377_v31  ;;  %4062 = vrot.lane.b32.xlu1 %v8248_v48, %s6728_s10  ;;  %v8693_v34 = vld [vmem:[#allocation2 + $0x129] sm:$0xff] }
 0x37d   : > { %5015 = vrot.lane.b32.xlu0 %v4810_v7, %s6727_s9  ;;  %6553 = vmatprep.mubr.msk.f32.mxu1 %vm864_vm3, %v3474_v24  ;;  %v4814_v7 = vld [vmem:[#allocation2 + $0xfa] sm:$0xff] }
 0x37e   : > { %v4035_v1 = vpop.permute.xlu1 %4034  ;;  %6554 = vmatmul.mubr.msk.f32.gmra.mrb[62].mxu1 %vm864_vm3, %v3475_v38  ;;  %v4736_v38 = vld [vmem:[#allocation2 + $0x50] sm:$0xff] }
 0x37f   : > { %v4033_v33 = vpop.permute.xlu0 %4032  ;;  %v4253_v6 = vsel %vm284_vm0, %v8268_v13, %v4035_v1 }
 0x380   : > { %4190 = vrot.lane.b32.xlu1 %v8257_v12, %s6727_s9  ;;  %v4252_v48 = vsel %vm284_vm0, %v8266_v0, %v4033_v33  ;;  %v4779_v12 = vld [vmem:[#allocation2 + $0xd9] sm:$0xff] }
 0x381   : > { %4188 = vrot.lane.b32.xlu0 %v8262_v10, %s6727_s9 }
 0x382   : > { %v4163_v63 = vpop.permute.xlu1 %4162 }
 0x383   : > { %v4161_v28 = vpop.permute.xlu0 %4160  ;;  %v4285_v60 = vsel %vm796_vm2, %v4253_v6, %v4163_v63  ;;  %v9430_v6 = vld [vmem:[#allocation42_spill] sm:$0xff] }
 0x384   : > { %v4284_v59 = vsel %vm796_vm2, %v4252_v48, %v4161_v28  ;;  %v6516_v54 = vpop.f32.mrb[36].mxu1  ;;  %4891 = vrot.lane.b32.xlu1 %v4780_v15, %s6728_s10  ;;  %v9428_v48 = vld [vmem:[#allocation40_spill] sm:$0xff]  ;;  %v9429_v28 = vld [vmem:[#allocation41_spill] sm:$0xff] }
 0x385   : > { %v3837_v10 = vadd.f32 %v6516_v54, %v3481_v53  ;;  %v3693_v19 = vpop.f32.mrb[37].mxu1  ;;  %4889 = vrot.lane.b32.xlu0 %v4779_v12, %s6728_s10  ;;  %6568 = vmatprep.mubr.msk.f32.mxu0 %vm864_vm3, %v4284_v59  ;;  %v3484_v12 = vld [vmem:[#allocation3 + $0x40] sm:$0xff] }
 0x386   : > { %v3836_v0 = vadd.f32 %v3693_v19, %v3480_v40  ;;  %6569 = vmatmul.mubr.msk.f32.gmra.mrb[68].mxu0 %vm864_vm3, %v4285_v60  ;;  %v4864_v5 = vpop.permute.xlu1 %4863  ;;  %v3485_v40 = vld [vmem:[#allocation3 + $0x48] sm:$0xff] }
 0x387   : > { %3869 = vst.msk [vmem:[#allocation3 + $0x28] sm:$0xff] %vm284_vm0, %v3837_v10  ;;  %v4862_v13 = vpop.permute.xlu0 %4861 }
 0x388   : > { %3868 = vst.msk [vmem:[#allocation3 + $0x20] sm:$0xff] %vm284_vm0, %v3836_v0  ;;  %4064 = vrot.lane.b32.xlu1 %v8283_v3, %s6728_s10  ;;  %v5085_v55 = vsel %vm284_vm0, %v4733_v42, %v4862_v13  ;;  %v4734_v3 = vld [vmem:[#allocation2 + $0x38] sm:$0xff]  ;;  %v4783_v0 = vld [vmem:[#allocation2 + $0x109] sm:$0xff] }
 0x389   : > { %5017 = vrot.lane.b32.xlu0 %v4811_v44, %s6727_s9  ;;  %v5086_v26 = vsel %vm284_vm0, %v4734_v3, %v4864_v5 }
 0x38a   : > { %v4037_v4 = vpop.permute.xlu1 %4036 }
 0x38b   : > { %v4990_v35 = vpop.permute.xlu0 %4989  ;;  %v4254_v20 = vsel %vm284_vm0, %v9425_v36, %v4037_v4  ;;  %v8734_v36 = vld [vmem:[#allocation2 + $0x142] sm:$0xff] }
 0x38c   : > { %v5117_v43 = vsel %vm796_vm2, %v5085_v55, %v4990_v35  ;;  %4066 = vrot.lane.b32.xlu1 %v8663_v58, %s6728_s10  ;;  %v8719_v55 = vld [vmem:[#allocation2 + $0x139] sm:$0xff]  ;;  %v4815_v35 = vld [vmem:[#allocation2 + $0x10a] sm:$0xff] }
 0x38d   : > { %5019 = vrot.lane.b32.xlu0 %v4812_v56, %s6727_s9  ;;  %6616 = vmatprep.mubr.msk.f32.mxu1 %vm864_vm3, %v5117_v43 }
 0x38e   : > { %v4039_v18 = vpop.permute.xlu1 %4038 }
 0x38f   : > { %v4992_v47 = vpop.permute.xlu0 %4991  ;;  %v4255_v41 = vsel %vm284_vm0, %v9426_v23, %v4039_v18  ;;  %v8726_v18 = vld [vmem:[#allocation2 + $0x141] sm:$0xff] }
 0x390   : > { %v5118_v51 = vsel %vm796_vm2, %v5086_v26, %v4992_v47  ;;  %4194 = vrot.lane.b32.xlu1 %v8288_v39, %s6727_s9  ;;  %v4781_v39 = vld [vmem:[#allocation2 + $0xf1] sm:$0xff] }
 0x391   : > { %4192 = vrot.lane.b32.xlu0 %v9424_v52, %s6727_s9  ;;  %6617 = vmatmul.mubr.msk.f32.vlgmr.msra.gmra.mrb[64].mxu1 %vm864_vm3, %v5118_v51  ;;  %v4816_v47 = vld [vmem:[#allocation2 + $0x112] sm:$0xff]  ;;  %v4738_v51 = vld [vmem:[#allocation2 + $0x68] sm:$0xff] }
 0x392   : > { %v4167_v61 = vpop.permute.xlu1 %4166 }
 0x393   : > { %v4165_v2 = vpop.permute.xlu0 %4164  ;;  %v4287_v25 = vsel %vm796_vm2, %v4255_v41, %v4167_v61  ;;  %v8746_v41 = vld [vmem:[#allocation2 + $0x98] sm:$0xff] }
 0x394   : > { %v4286_v27 = vsel %vm796_vm2, %v4254_v20, %v4165_v2  ;;  %v6519_v29 = vpop.f32.mrb[38].mxu1  ;;  %4895 = vrot.lane.b32.xlu1 %v4782_v46, %s6728_s10  ;;  %v8739_v2 = vld [vmem:[#allocation2 + $0x13a] sm:$0xff] }
 0x395   : > { %v3839_v37 = vadd.f32 %v6519_v29, %v3483_v21  ;;  %v3703_v45 = vpop.f32.mrb[39].mxu1  ;;  %4893 = vrot.lane.b32.xlu0 %v4781_v39, %s6728_s10  ;;  %6571 = vmatprep.mubr.msk.f32.mxu0 %vm864_vm3, %v4286_v27  ;;  %v3486_v29 = vld [vmem:[#allocation3 + $0x50] sm:$0xff] }
 0x396   : > { %v3838_v8 = vadd.f32 %v3703_v45, %v3482_v22  ;;  %6572 = vmatmul.mubr.msk.f32.gmra.mrb[70].mxu0 %vm864_vm3, %v4287_v25  ;;  %v4868_v57 = vpop.permute.xlu1 %4867  ;;  %v3487_v22 = vld [vmem:[#allocation3 + $0x58] sm:$0xff] }
 0x397   : > { %3871 = vst.msk [vmem:[#allocation3 + $0x38] sm:$0xff] %vm284_vm0, %v3839_v37  ;;  %v4866_v62 = vpop.permute.xlu0 %4865  ;;  %v5088_v33 = vsel %vm284_vm0, %v4736_v38, %v4868_v57  ;;  %v4785_v45 = vld [vmem:[#allocation2 + $0x121] sm:$0xff] }
 0x398   : > { %3870 = vst.msk [vmem:[#allocation3 + $0x30] sm:$0xff] %vm284_vm0, %v3838_v8  ;;  %4068 = vrot.lane.b32.xlu1 %v9427_v50, %s6728_s10  ;;  %v5087_v32 = vsel %vm284_vm0, %v4735_v9, %v4866_v62  ;;  %v8758_v9 = vld [vmem:[#allocation2 + $0x151] sm:$0xff] }
 0x399   : > { %5021 = vrot.lane.b32.xlu0 %v4813_v11, %s6727_s9 }
 0x39a   : > { %v4041_v30 = vpop.permute.xlu1 %4040 }
 0x39b   : > { %v4994_v31 = vpop.permute.xlu0 %4993  ;;  %v4256_v59 = vsel %vm284_vm0, %v9430_v6, %v4041_v30  ;;  %v4817_v30 = vld [vmem:[#allocation2 + $0x122] sm:$0xff] }
 0x39c   : > { %v5119_v24 = vsel %vm796_vm2, %v5087_v32, %v4994_v31  ;;  %4070 = vrot.lane.b32.xlu1 %v8693_v34, %s6728_s10  ;;  %v4739_v32 = vld [vmem:[#allocation2 + $0x78] sm:$0xff] }
 0x39d   : > { %5023 = vrot.lane.b32.xlu0 %v4814_v7, %s6727_s9  ;;  %6619 = vmatprep.mubr.msk.f32.mxu1 %vm864_vm3, %v5119_v24  ;;  %v8765_v7 = vld [vmem:[#allocation2 + $0x159] sm:$0xff] }
 0x39e   : > { %v4043_v1 = vpop.permute.xlu1 %4042 }
 0x39f   : > { %v4996_v63 = vpop.permute.xlu0 %4995  ;;  %v4257_v60 = vsel %vm284_vm0, %v8332_v16, %v4043_v1  ;;  %v4818_v1 = vld [vmem:[#allocation2 + $0x12a] sm:$0xff] }
 0x3a0   : > { %v5120_v53 = vsel %vm796_vm2, %v5088_v33, %v4996_v63  ;;  %4198 = vrot.lane.b32.xlu1 %v9428_v48, %s6727_s9  ;;  %v4740_v33 = vld [vmem:[#allocation2 + $0x80] sm:$0xff] }
 0x3a1   : > { %4196 = vrot.lane.b32.xlu0 %v9429_v28, %s6727_s9  ;;  %6620 = vmatmul.mubr.msk.f32.gmra.mrb[66].mxu1 %vm864_vm3, %v5120_v53  ;;  %v8773_v28 = vld [vmem:[#allocation2 + $0x15a] sm:$0xff] }
 0x3a2   : > { %v4171_v15 = vpop.permute.xlu1 %4170 }
 0x3a3   : > { %v4169_v54 = vpop.permute.xlu0 %4168  ;;  %v4289_v5 = vsel %vm796_vm2, %v4257_v60, %v4171_v15 }
 0x3a4   : > { %v4288_v10 = vsel %vm796_vm2, %v4256_v59, %v4169_v54  ;;  %v6522_v19 = vpop.f32.mrb[40].mxu1  ;;  %4899 = vrot.lane.b32.xlu1 %v8663_v58, %s6728_s10  ;;  %v4737_v58 = vld [vmem:[#allocation2 + $0x60] sm:$0xff]  ;;  %v3489_v59 = vld [vmem:[#allocation3 + $0x68] sm:$0xff] }
 0x3a5   : > { %v3841_v13 = vadd.f32 %v6522_v19, %v3485_v40  ;;  %v3713_v44 = vpop.f32.mrb[41].mxu1  ;;  %4897 = vrot.lane.b32.xlu0 %v4783_v0, %s6728_s10  ;;  %6574 = vmatprep.mubr.msk.f32.mxu0 %vm864_vm3, %v4288_v10  ;;  %v8778_v40 = vld [vmem:[#allocation2 + $0x152] sm:$0xff] }
 0x3a6   : > { %v3840_v42 = vadd.f32 %v3713_v44, %v3484_v12  ;;  %6575 = vmatmul.mubr.msk.f32.gmra.mrb[72].mxu0 %vm864_vm3, %v4289_v5  ;;  %v4872_v4 = vpop.permute.xlu1 %4871  ;;  %v8785_v12 = vld [vmem:[#allocation2 + $0xb0] sm:$0xff] }
 0x3a7   : > { %3873 = vst.msk [vmem:[#allocation3 + $0x48] sm:$0xff] %vm284_vm0, %v3841_v13  ;;  %v4870_v16 = vpop.permute.xlu0 %4869  ;;  %v5090_v61 = vsel %vm284_vm0, %v4738_v51, %v4872_v4  ;;  %v3488_v10 = vld [vmem:[#allocation3 + $0x60] sm:$0xff] }
 0x3a8   : > { %3872 = vst.msk [vmem:[#allocation3 + $0x40] sm:$0xff] %vm284_vm0, %v3840_v42  ;;  %4072 = vrot.lane.b32.xlu1 %v8719_v55, %s6728_s10  ;;  %v5089_v56 = vsel %vm284_vm0, %v4737_v58, %v4870_v16 }
 0x3a9   : > { %5025 = vrot.lane.b32.xlu0 %v4815_v35, %s6727_s9  ;;  %v8798_v35 = vld [vmem:[#allocation2 + $0x169] sm:$0xff] }
 0x3aa   : > { %v4045_v43 = vpop.permute.xlu1 %4044 }
 0x3ab   : > { %v4998_v3 = vpop.permute.xlu0 %4997  ;;  %v4258_v23 = vsel %vm284_vm0, %v8365_v17, %v4045_v43 }
 0x3ac   : > { %v5121_v26 = vsel %vm796_vm2, %v5089_v56, %v4998_v3  ;;  %4074 = vrot.lane.b32.xlu1 %v8726_v18, %s6728_s10  ;;  %v8806_v3 = vld [vmem:[#allocation2 + $0x171] sm:$0xff] }
 0x3ad   : > { %5027 = vrot.lane.b32.xlu0 %v4816_v47, %s6727_s9  ;;  %6622 = vmatprep.mubr.msk.f32.mxu1 %vm864_vm3, %v5121_v26 }
 0x3ae   : > { %v4047_v52 = vpop.permute.xlu1 %4046 }
 0x3af   : > { %v5000_v21 = vpop.permute.xlu0 %4999  ;;  %v4259_v39 = vsel %vm284_vm0, %v8746_v41, %v4047_v52  ;;  %v8816_v52 = vld [vmem:[#allocation2 + $0x172] sm:$0xff] }
 0x3b0   : > { %v5122_v20 = vsel %vm796_vm2, %v5090_v61, %v5000_v21  ;;  %4202 = vrot.lane.b32.xlu1 %v8734_v36, %s6727_s9  ;;  %v8821_v21 = vld [vmem:[#allocation2 + $0x16a] sm:$0xff] }
 0x3b1   : > { %4200 = vrot.lane.b32.xlu0 %v8739_v2, %s6727_s9  ;;  %6623 = vmatmul.mubr.msk.f32.gmra.mrb[68].mxu1 %vm864_vm3, %v5122_v20 }
 0x3b2   : > { %v4175_v46 = vpop.permute.xlu1 %4174 }
 0x3b3   : > { %v4173_v27 = vpop.permute.xlu0 %4172  ;;  %v4291_v8 = vsel %vm796_vm2, %v4259_v39, %v4175_v46 }
 0x3b4   : > { %v4290_v25 = vsel %vm796_vm2, %v4258_v23, %v4173_v27  ;;  %v6525_v37 = vpop.f32.mrb[42].mxu1  ;;  %4903 = vrot.lane.b32.xlu1 %v8693_v34, %s6728_s10 }
 0x3b5   : > { %v3843_v57 = vadd.f32 %v6525_v37, %v3487_v22  ;;  %v3723_v62 = vpop.f32.mrb[43].mxu1  ;;  %4901 = vrot.lane.b32.xlu0 %v4785_v45, %s6728_s10  ;;  %6577 = vmatprep.mubr.msk.f32.mxu0 %vm864_vm3, %v4290_v25  ;;  %v8830_v22 = vld [vmem:[#allocation2 + $0xc8] sm:$0xff] }
 0x3b6   : > { %v3842_v17 = vadd.f32 %v3723_v62, %v3486_v29  ;;  %6578 = vmatmul.mubr.msk.f32.gmra.mrb[74].mxu0 %vm864_vm3, %v4291_v8  ;;  %v4876_v50 = vpop.permute.xlu1 %4875 }
 0x3b7   : > { %3875 = vst.msk [vmem:[#allocation3 + $0x58] sm:$0xff] %vm284_vm0, %v3843_v57  ;;  %v4874_v11 = vpop.permute.xlu0 %4873  ;;  %v5092_v53 = vsel %vm284_vm0, %v4740_v33, %v4876_v50  ;;  %v4743_v50 = vld [vmem:[#allocation2 + $0xa8] sm:$0xff] }
 0x3b8   : > { %3874 = vst.msk [vmem:[#allocation3 + $0x50] sm:$0xff] %vm284_vm0, %v3842_v17  ;;  %4076 = vrot.lane.b32.xlu1 %v8758_v9, %s6728_s10  ;;  %v5091_v34 = vsel %vm284_vm0, %v4739_v32, %v4874_v11  ;;  %v3958_v17 = vld [vmem:[#allocation2 + $0x181] sm:$0xff]  ;;  %v3959_v32 = vld [vmem:[#allocation2 + $0x189] sm:$0xff] }
 0x3b9   : > { %5029 = vrot.lane.b32.xlu0 %v4817_v30, %s6727_s9  ;;  %v3990_v33 = vld [vmem:[#allocation2 + $0x182] sm:$0xff] }
 0x3ba   : > { %v4049_v31 = vpop.permute.xlu1 %4048 }
 0x3bb   : > { %v5002_v24 = vpop.permute.xlu0 %5001  ;;  %v4260_v54 = vsel %vm284_vm0, %v8458_v14, %v4049_v31 }
 0x3bc   : > { %v5123_v38 = vsel %vm796_vm2, %v5091_v34, %v5002_v24  ;;  %4078 = vrot.lane.b32.xlu1 %v8765_v7, %s6728_s10 }
 0x3bd   : > { %5031 = vrot.lane.b32.xlu0 %v4818_v1, %s6727_s9  ;;  %6625 = vmatprep.mubr.msk.f32.mxu1 %vm864_vm3, %v5123_v38  ;;  %v3991_v38 = vld [vmem:[#allocation2 + $0x18a] sm:$0xff] }
 0x3be   : > { %v4051_v63 = vpop.permute.xlu1 %4050 }
 0x3bf   : > { %v5004_v48 = vpop.permute.xlu0 %5003  ;;  %v4261_v19 = vsel %vm284_vm0, %v8785_v12, %v4051_v63  ;;  %v8859_v63 = vld [vmem:[#allocation2 + $0xd8] sm:$0xff] }
 0x3c0   : > { %v5124_v15 = vsel %vm796_vm2, %v5092_v53, %v5004_v48  ;;  %4206 = vrot.lane.b32.xlu1 %v8773_v28, %s6727_s9  ;;  %v3493_v48 = vld [vmem:[#allocation3 + $0x88] sm:$0xff] }
 0x3c1   : > { %4204 = vrot.lane.b32.xlu0 %v8778_v40, %s6727_s9  ;;  %6626 = vmatmul.mubr.msk.f32.gmra.mrb[70].mxu1 %vm864_vm3, %v5124_v15  ;;  %v8863_v15 = vld [vmem:[#allocation2 + $0xe0] sm:$0xff] }
 0x3c2   : > { %v4179_v6 = vpop.permute.xlu1 %4178 }
 0x3c3   : > { %v4177_v60 = vpop.permute.xlu0 %4176  ;;  %v4293_v13 = vsel %vm796_vm2, %v4261_v19, %v4179_v6  ;;  %v3492_v6 = vld [vmem:[#allocation3 + $0x80] sm:$0xff] }
 0x3c4   : > { %v4292_v0 = vsel %vm796_vm2, %v4260_v54, %v4177_v60  ;;  %v6528_v5 = vpop.f32.mrb[44].mxu1  ;;  %4907 = vrot.lane.b32.xlu1 %v8726_v18, %s6728_s10 }
 0x3c5   : > { %v3845_v44 = vadd.f32 %v6528_v5, %v3489_v59  ;;  %v3733_v42 = vpop.f32.mrb[45].mxu1  ;;  %4905 = vrot.lane.b32.xlu0 %v8719_v55, %s6728_s10  ;;  %6580 = vmatprep.mubr.msk.f32.mxu0 %vm864_vm3, %v4292_v0  ;;  %v4741_v55 = vld [vmem:[#allocation2 + $0x90] sm:$0xff] }
 0x3c6   : > { %v3844_v14 = vadd.f32 %v3733_v42, %v3488_v10  ;;  %6581 = vmatmul.mubr.msk.f32.gmra.mrb[76].mxu0 %vm864_vm3, %v4293_v13  ;;  %v4880_v4 = vpop.permute.xlu1 %4879 }
 0x3c7   : > { %3877 = vst.msk [vmem:[#allocation3 + $0x68] sm:$0xff] %vm284_vm0, %v3845_v44  ;;  %v4878_v16 = vpop.permute.xlu0 %4877  ;;  %v5094_v47 = vsel %vm284_vm0, %v8746_v41, %v4880_v4  ;;  %v3490_v41 = vld [vmem:[#allocation3 + $0x70] sm:$0xff] }
 0x3c8   : > { %3876 = vst.msk [vmem:[#allocation3 + $0x60] sm:$0xff] %vm284_vm0, %v3844_v14  ;;  %4080 = vrot.lane.b32.xlu1 %v8798_v35, %s6728_s10  ;;  %v5093_v43 = vsel %vm284_vm0, %v4741_v55, %v4878_v16 }
 0x3c9   : > { %5033 = vrot.lane.b32.xlu0 %v8739_v2, %s6727_s9  ;;  %v3491_v2 = vld [vmem:[#allocation3 + $0x78] sm:$0xff] }
 0x3ca   : > { %v4053_v58 = vpop.permute.xlu1 %4052 }
 0x3cb   : > { %v5006_v56 = vpop.permute.xlu0 %5005 }
 0x3cc   : > { %v5125_v18 = vsel %vm796_vm2, %v5093_v43, %v5006_v56  ;;  %4082 = vrot.lane.b32.xlu1 %v8806_v3, %s6728_s10  ;;  %v4796_v43 = vld [vmem:[#allocation2 + $0x1a1] sm:$0xff]  ;;  %v3914_v56 = vld [vmem:[#allocation2 + $0xf0] sm:$0xff] }
 0x3cd   : > { %5035 = vrot.lane.b32.xlu0 %v8734_v36, %s6727_s9  ;;  %6628 = vmatprep.mubr.msk.f32.mxu1 %vm864_vm3, %v5125_v18  ;;  %v8826_v36 = vld [vmem:[#allocation2 + $0xc0] sm:$0xff]  ;;  %v3495_v18 = vld [vmem:[#allocation3 + $0x98] sm:$0xff] }
 0x3ce   : > { %v4055_v26 = vpop.permute.xlu1 %4054  ;;  %v4262_v46 = vsel %vm284_vm0, %v8826_v36, %v4053_v58 }
 0x3cf   : > { %v5008_v51 = vpop.permute.xlu0 %5007  ;;  %v4263_v27 = vsel %vm284_vm0, %v8830_v22, %v4055_v26  ;;  %v4795_v26 = vld [vmem:[#allocation2 + $0x199] sm:$0xff] }
 0x3d0   : > { %v5126_v61 = vsel %vm796_vm2, %v5094_v47, %v5008_v51  ;;  %4210 = vrot.lane.b32.xlu1 %v8816_v52, %s6727_s9  ;;  %v3915_v51 = vld [vmem:[#allocation2 + $0xf8] sm:$0xff] }
 0x3d1   : > { %4208 = vrot.lane.b32.xlu0 %v8821_v21, %s6727_s9  ;;  %6629 = vmatmul.mubr.msk.f32.gmra.mrb[72].mxu1 %vm864_vm3, %v5126_v61  ;;  %v3494_v61 = vld [vmem:[#allocation3 + $0x90] sm:$0xff] }
 0x3d2   : > { %v4183_v20 = vpop.permute.xlu1 %4182 }
 0x3d3   : > { %v4181_v23 = vpop.permute.xlu0 %4180  ;;  %v4295_v25 = vsel %vm796_vm2, %v4263_v27, %v4183_v20 }
 0x3d4   : > { %v4294_v29 = vsel %vm796_vm2, %v4262_v46, %v4181_v23  ;;  %v6531_v39 = vpop.f32.mrb[46].mxu1  ;;  %4911 = vrot.lane.b32.xlu1 %v8765_v7, %s6728_s10  ;;  %v4828_v23 = vld [vmem:[#allocation2 + $0x1a2] sm:$0xff] }
 0x3d5   : > { %v3847_v37 = vadd.f32 %v6531_v39, %v3491_v2  ;;  %v3743_v45 = vpop.f32.mrb[47].mxu1  ;;  %4909 = vrot.lane.b32.xlu0 %v8758_v9, %s6728_s10  ;;  %6583 = vmatprep.mubr.msk.f32.mxu0 %vm864_vm3, %v4294_v29  ;;  %v4827_v29 = vld [vmem:[#allocation2 + $0x19a] sm:$0xff] }
 0x3d6   : > { %v3846_v8 = vadd.f32 %v3743_v45, %v3490_v41  ;;  %6584 = vmatmul.mubr.msk.f32.gmra.mrb[78].mxu0 %vm864_vm3, %v4295_v25  ;;  %v4884_v57 = vpop.permute.xlu1 %4883 }
 0x3d7   : > { %3879 = vst.msk [vmem:[#allocation3 + $0x78] sm:$0xff] %vm284_vm0, %v3847_v37  ;;  %v4882_v62 = vpop.permute.xlu0 %4881  ;;  %v5096_v24 = vsel %vm284_vm0, %v8785_v12, %v4884_v57 }
 0x3d8   : > { %3878 = vst.msk [vmem:[#allocation3 + $0x70] sm:$0xff] %vm284_vm0, %v3846_v8  ;;  %4084 = vrot.lane.b32.xlu1 %v3958_v17, %s6728_s10  ;;  %v5095_v9 = vsel %vm284_vm0, %v4743_v50, %v4882_v62 }
 0x3d9   : > { %5037 = vrot.lane.b32.xlu0 %v8778_v40, %s6727_s9 }
 0x3da   : > { %v4057_v11 = vpop.permute.xlu1 %4056 }
 0x3db   : > { %v5010_v30 = vpop.permute.xlu0 %5009 }
 0x3dc   : > { %v5127_v31 = vsel %vm796_vm2, %v5095_v9, %v5010_v30  ;;  %4086 = vrot.lane.b32.xlu1 %v3959_v32, %s6728_s10  ;;  %v3497_v30 = vld [vmem:[#allocation3 + $0xa8] sm:$0xff] }
 0x3dd   : > { %5039 = vrot.lane.b32.xlu0 %v8773_v28, %s6727_s9  ;;  %6631 = vmatprep.mubr.msk.f32.mxu1 %vm864_vm3, %v5127_v31  ;;  %v4264_v28 = vsel %vm284_vm0, %v8859_v63, %v4057_v11  ;;  %v3916_v11 = vld [vmem:[#allocation2 + $0x108] sm:$0xff]  ;;  %v3917_v31 = vld [vmem:[#allocation2 + $0x110] sm:$0xff] }
 0x3de   : > { %v4059_v34 = vpop.permute.xlu1 %4058 }
 0x3df   : > { %v5012_v7 = vpop.permute.xlu0 %5011  ;;  %v4265_v59 = vsel %vm284_vm0, %v8863_v15, %v4059_v34 }
 0x3e0   : > { %v5128_v1 = vsel %vm796_vm2, %v5096_v24, %v5012_v7  ;;  %4214 = vrot.lane.b32.xlu1 %v3991_v38, %s6727_s9  ;;  %v3496_v24 = vld [vmem:[#allocation3 + $0xa0] sm:$0xff] }
 0x3e1   : > { %6632 = vmatmul.mubr.msk.f32.gmra.mrb[74].mxu1 %vm864_vm3, %v5128_v1  ;;  %4212 = vrot.lane.b32.xlu0 %v3990_v33, %s6727_s9 }
 0x3e2   : > { %v4187_v53 = vpop.permute.xlu1 %4186 }
 0x3e3   : > { %v4185_v40 = vpop.permute.xlu0 %4184  ;;  %v4297_v60 = vsel %vm796_vm2, %v4265_v59, %v4187_v53 }
 0x3e4   : > { %v4296_v54 = vsel %vm796_vm2, %v4264_v28, %v4185_v40  ;;  %v6534_v12 = vpop.f32.mrb[48].mxu1  ;;  %4915 = vrot.lane.b32.xlu1 %v8806_v3, %s6728_s10 }
 0x3e5   : > { %v3849_v10 = vadd.f32 %v6534_v12, %v3493_v48  ;;  %v3753_v19 = vpop.f32.mrb[49].mxu1  ;;  %6586 = vmatprep.mubr.msk.f32.mxu0 %vm864_vm3, %v4296_v54  ;;  %4913 = vrot.lane.b32.xlu0 %v8798_v35, %s6728_s10 }
 0x3e6   : > { %v3848_v0 = vadd.f32 %v3753_v19, %v3492_v6  ;;  %6587 = vmatmul.mubr.msk.f32.gmra.mrb[80].mxu0 %vm864_vm3, %v4297_v60  ;;  %v4888_v5 = vpop.permute.xlu1 %4887 }
 0x3e7   : > { %3881 = vst.msk [vmem:[#allocation3 + $0x88] sm:$0xff] %vm284_vm0, %v3849_v10  ;;  %v4886_v13 = vpop.permute.xlu0 %4885  ;;  %v5098_v35 = vsel %vm284_vm0, %v8830_v22, %v4888_v5 }
 0x3e8   : > { %3880 = vst.msk [vmem:[#allocation3 + $0x80] sm:$0xff] %vm284_vm0, %v3848_v0  ;;  %5043 = vrot.lane.b32.xlu1 %v8816_v52, %s6727_s9  ;;  %v5097_v42 = vsel %vm284_vm0, %v8826_v36, %v4886_v13  ;;  %v3918_v0 = vld [vmem:[#allocation2 + $0x120] sm:$0xff]  ;;  %v3499_v13 = vld [vmem:[#allocation3 + $0xb8] sm:$0xff] }
 0x3e9   : > { %5041 = vrot.lane.b32.xlu0 %v8821_v21, %s6727_s9 }
 0x3ea   : > { %v4061_v44 = vpop.permute.xlu1 %4060 }
 0x3eb   : > { %v5014_v14 = vpop.permute.xlu0 %5013  ;;  %v4266_v47 = vsel %vm284_vm0, %v3914_v56, %v4061_v44 }
 0x3ec   : > { %v5129_v4 = vsel %vm796_vm2, %v5097_v42, %v5014_v14  ;;  %4919 = vrot.lane.b32.xlu1 %v3959_v32, %s6728_s10  ;;  %v3919_v42 = vld [vmem:[#allocation2 + $0x128] sm:$0xff] }
 0x3ed   : > { %6634 = vmatprep.mubr.msk.f32.mxu1 %vm864_vm3, %v5129_v4  ;;  %4917 = vrot.lane.b32.xlu0 %v3958_v17, %s6728_s10  ;;  %v3498_v4 = vld [vmem:[#allocation3 + $0xb0] sm:$0xff] }
 0x3ee   : > { %v4063_v16 = vpop.permute.xlu1 %4062 }
 0x3ef   : > { %v5016_v55 = vpop.permute.xlu0 %5015  ;;  %v4267_v21 = vsel %vm284_vm0, %v3915_v51, %v4063_v16 }
 0x3f0   : > { %v5130_v58 = vsel %vm796_vm2, %v5098_v35, %v5016_v55  ;;  %5047 = vrot.lane.b32.xlu1 %v3991_v38, %s6727_s9 }
 0x3f1   : > { %6635 = vmatmul.mubr.msk.f32.gmra.mrb[76].mxu1 %vm864_vm3, %v5130_v58  ;;  %5045 = vrot.lane.b32.xlu0 %v3990_v33, %s6727_s9 }
 0x3f2   : > { %v4191_v3 = vpop.permute.xlu1 %4190 }
 0x3f3   : > { %v4189_v52 = vpop.permute.xlu0 %4188  ;;  %v4299_v2 = vsel %vm796_vm2, %v4267_v21, %v4191_v3 }
 0x3f4   : > { %v4298_v36 = vsel %vm796_vm2, %v4266_v47, %v4189_v52  ;;  %v6537_v20 = vpop.f32.mrb[50].mxu1  ;;  %4923 = vrot.lane.b32.xlu1 %v4796_v43, %s6728_s10 }
 0x3f5   : > { %v3851_v46 = vadd.f32 %v6537_v20, %v3495_v18  ;;  %v3763_v22 = vpop.f32.mrb[51].mxu1  ;;  %6589 = vmatprep.mubr.msk.f32.mxu0 %vm864_vm3, %v4298_v36  ;;  %4921 = vrot.lane.b32.xlu0 %v4795_v26, %s6728_s10 }
 0x3f6   : > { %v3850_v41 = vadd.f32 %v3763_v22, %v3494_v61  ;;  %6590 = vmatmul.mubr.msk.f32.gmra.mrb[82].mxu0 %vm864_vm3, %v4299_v2  ;;  %v4892_v27 = vpop.permute.xlu1 %4891 }
 0x3f7   : > { %3883 = vst.msk [vmem:[#allocation3 + $0x98] sm:$0xff] %vm284_vm0, %v3851_v46  ;;  %v4890_v39 = vpop.permute.xlu0 %4889  ;;  %v5100_v62 = vsel %vm284_vm0, %v8863_v15, %v4892_v27  ;;  %v3920_v46 = vld [vmem:[#allocation2 + $0x138] sm:$0xff]  ;;  %v3921_v27 = vld [vmem:[#allocation2 + $0x140] sm:$0xff] }
 0x3f8   : > { %3882 = vst.msk [vmem:[#allocation3 + $0x90] sm:$0xff] %vm284_vm0, %v3850_v41  ;;  %5051 = vrot.lane.b32.xlu1 %v4828_v23, %s6727_s9  ;;  %v5099_v37 = vsel %vm284_vm0, %v8859_v63, %v4890_v39  ;;  %v3501_v23 = vld [vmem:[#allocation3 + $0xc8] sm:$0xff]  ;;  %v3500_v39 = vld [vmem:[#allocation3 + $0xc0] sm:$0xff] }
 0x3f9   : > { %5049 = vrot.lane.b32.xlu0 %v4827_v29, %s6727_s9 }
 0x3fa   : > { %v4065_v25 = vpop.permute.xlu1 %4064 }
 0x3fb   : > { %v5018_v45 = vpop.permute.xlu0 %5017  ;;  %v4268_v32 = vsel %vm284_vm0, %v3916_v11, %v4065_v25 }
 0x3fc   : > { %v5131_v8 = vsel %vm796_vm2, %v5099_v37, %v5018_v45 }
 0x3fd   : > { %6637 = vmatprep.mubr.msk.f32.mxu1 %vm864_vm3, %v5131_v8 }
 0x3fe   : > { %v4067_v57 = vpop.permute.xlu1 %4066 }
 0x3ff   : > { %v5020_v17 = vpop.permute.xlu0 %5019  ;;  %v4269_v7 = vsel %vm284_vm0, %v3917_v31, %v4067_v57 }
 0x400   : > { %v5132_v50 = vsel %vm796_vm2, %v5100_v62, %v5020_v17 }
 0x401   : > { %6638 = vmatmul.mubr.msk.f32.gmra.mrb[78].mxu1 %vm864_vm3, %v5132_v50 }
 0x402   : > { %v4195_v9 = vpop.permute.xlu1 %4194 }
 0x403   : > { %v4193_v34 = vpop.permute.xlu0 %4192  ;;  %v4301_v33 = vsel %vm796_vm2, %v4269_v7, %v4195_v9 }
 0x404   : > { %v4300_v38 = vsel %vm796_vm2, %v4268_v32, %v4193_v34  ;;  %v6540_v1 = vpop.f32.mrb[52].mxu1 }
 0x405   : > { %v3853_v63 = vadd.f32 %v6540_v1, %v3497_v30  ;;  %v3773_v53 = vpop.f32.mrb[53].mxu1  ;;  %6592 = vmatprep.mubr.msk.f32.mxu0 %vm864_vm3, %v4300_v38  ;;  %v3503_v38 = vld [vmem:[#allocation3 + $0xd8] sm:$0xff] }
 0x406   : > { %v3852_v48 = vadd.f32 %v3773_v53, %v3496_v24  ;;  %6593 = vmatmul.mubr.msk.f32.gmra.mrb[84].mxu0 %vm864_vm3, %v4301_v33  ;;  %v4896_v28 = vpop.permute.xlu1 %4895  ;;  %v3502_v33 = vld [vmem:[#allocation3 + $0xd0] sm:$0xff]  ;;  %v3922_v53 = vld [vmem:[#allocation2 + $0x150] sm:$0xff] }
 0x407   : > { %3885 = vst.msk [vmem:[#allocation3 + $0xa8] sm:$0xff] %vm284_vm0, %v3853_v63  ;;  %v4894_v15 = vpop.permute.xlu0 %4893  ;;  %v5102_v60 = vsel %vm284_vm0, %v3915_v51, %v4896_v28 }
 0x408   : > { %3884 = vst.msk [vmem:[#allocation3 + $0xa0] sm:$0xff] %vm284_vm0, %v3852_v48  ;;  %v5101_v6 = vsel %vm284_vm0, %v3914_v56, %v4894_v15 }
 0x40a   : > { %v4069_v40 = vpop.permute.xlu1 %4068 }
 0x40b   : > { %v5022_v59 = vpop.permute.xlu0 %5021  ;;  %v4270_v44 = vsel %vm284_vm0, %v3918_v0, %v4069_v40 }
 0x40c   : > { %v5133_v54 = vsel %vm796_vm2, %v5101_v6, %v5022_v59  ;;  %v8956_v6 = vld [vmem:[#allocation2 + $0x158] sm:$0xff] }
 0x40d   : > { %6640 = vmatprep.mubr.msk.f32.mxu1 %vm864_vm3, %v5133_v54 }
 0x40e   : > { %v4071_v12 = vpop.permute.xlu1 %4070 }
 0x40f   : > { %v5024_v10 = vpop.permute.xlu0 %5023  ;;  %v4271_v16 = vsel %vm284_vm0, %v3919_v42, %v4071_v12 }
 0x410   : > { %v5134_v19 = vsel %vm796_vm2, %v5102_v60, %v5024_v10 }
 0x411   : > { %6641 = vmatmul.mubr.msk.f32.gmra.mrb[80].mxu1 %vm864_vm3, %v5134_v19 }
 0x412   : > { %v4199_v5 = vpop.permute.xlu1 %4198 }
 0x413   : > { %v4197_v14 = vpop.permute.xlu0 %4196  ;;  %v4303_v58 = vsel %vm796_vm2, %v4271_v16, %v4199_v5 }
 0x414   : > { %v4302_v35 = vsel %vm796_vm2, %v4270_v44, %v4197_v14  ;;  %v6543_v55 = vpop.f32.mrb[54].mxu1  ;;  %v4313_v14 = vld [vmem:[#allocation3 + $0x8] sm:$0xff] }
 0x415   : > { %v3855_v43 = vadd.f32 %v6543_v55, %v3499_v13  ;;  %v3783_v56 = vpop.f32.mrb[55].mxu1  ;;  %6595 = vmatprep.mubr.msk.f32.mxu0 %vm864_vm3, %v4302_v35  ;;  %v4312_v35 = vld [vmem:[#allocation3] sm:$0xff] }
 0x416   : > { %v3854_v3 = vadd.f32 %v3783_v56, %v3498_v4  ;;  %6596 = vmatmul.mubr.msk.f32.gmra.mrb[86].mxu0 %vm864_vm3, %v4303_v58  ;;  %v4900_v18 = vpop.permute.xlu1 %4899 }
 0x417   : > { %3887 = vst.msk [vmem:[#allocation3 + $0xb8] sm:$0xff] %vm284_vm0, %v3855_v43  ;;  %v4898_v26 = vpop.permute.xlu0 %4897  ;;  %v5104_v36 = vsel %vm284_vm0, %v3917_v31, %v4900_v18  ;;  %v3505_v18 = vld [vmem:[#allocation3 + $0xe8] sm:$0xff] }
 0x418   : > { %3886 = vst.msk [vmem:[#allocation3 + $0xb0] sm:$0xff] %vm284_vm0, %v3854_v3  ;;  %v5103_v51 = vsel %vm284_vm0, %v3916_v11, %v4898_v26 }
 0x41a   : > { %v4073_v47 = vpop.permute.xlu1 %4072 }
 0x41b   : > { %v5026_v52 = vpop.permute.xlu0 %5025  ;;  %v4272_v41 = vsel %vm284_vm0, %v3920_v46, %v4073_v47  ;;  %v3504_v47 = vld [vmem:[#allocation3 + $0xe0] sm:$0xff] }
 0x41c   : > { %v5135_v61 = vsel %vm796_vm2, %v5103_v51, %v5026_v52  ;;  %v3924_v52 = vld [vmem:[#allocation2 + $0x168] sm:$0xff] }
 0x41d   : > { %6643 = vmatprep.mubr.msk.f32.mxu1 %vm864_vm3, %v5135_v61 }
 0x41e   : > { %v4075_v21 = vpop.permute.xlu1 %4074 }
 0x41f   : > { %v5028_v20 = vpop.permute.xlu0 %5027  ;;  %v4273_v25 = vsel %vm284_vm0, %v3921_v27, %v4075_v21 }
 0x420   : > { %v5136_v2 = vsel %vm796_vm2, %v5104_v36, %v5028_v20 }
 0x421   : > { %6644 = vmatmul.mubr.msk.f32.gmra.mrb[82].mxu1 %vm864_vm3, %v5136_v2  ;;  %v3925_v2 = vld [vmem:[#allocation2 + $0x170] sm:$0xff] }
 0x422   : > { %v4203_v22 = vpop.permute.xlu1 %4202 }
 0x423   : > { %v4201_v29 = vpop.permute.xlu0 %4200  ;;  %v4305_v8 = vsel %vm796_vm2, %v4273_v25, %v4203_v22 }
 0x424   : > { %v4304_v37 = vsel %vm796_vm2, %v4272_v41, %v4201_v29  ;;  %v6546_v45 = vpop.f32.mrb[56].mxu1 }
 0x425   : > { %v3857_v57 = vadd.f32 %v6546_v45, %v3501_v23  ;;  %v3793_v62 = vpop.f32.mrb[57].mxu1  ;;  %6598 = vmatprep.mubr.msk.f32.mxu0 %vm864_vm3, %v4304_v37 }
 0x426   : > { %v3856_v17 = vadd.f32 %v3793_v62, %v3500_v39  ;;  %6599 = vmatmul.mubr.msk.f32.gmra.mrb[88].mxu0 %vm864_vm3, %v4305_v8  ;;  %v4904_v50 = vpop.permute.xlu1 %4903 }
 0x427   : > { %3889 = vst.msk [vmem:[#allocation3 + $0xc8] sm:$0xff] %vm284_vm0, %v3857_v57  ;;  %v4902_v11 = vpop.permute.xlu0 %4901  ;;  %v5106_v24 = vsel %vm284_vm0, %v3919_v42, %v4904_v50  ;;  %v4315_v57 = vld [vmem:[#allocation3 + $0x18] sm:$0xff]  ;;  %v4314_v50 = vld [vmem:[#allocation3 + $0x10] sm:$0xff] }
 0x428   : > { %3888 = vst.msk [vmem:[#allocation3 + $0xc0] sm:$0xff] %vm284_vm0, %v3856_v17  ;;  %v5105_v30 = vsel %vm284_vm0, %v3918_v0, %v4902_v11 }
 0x42a   : > { %v4077_v9 = vpop.permute.xlu1 %4076 }
 0x42b   : > { %v5030_v32 = vpop.permute.xlu0 %5029  ;;  %v4274_v40 = vsel %vm284_vm0, %v3922_v53, %v4077_v9 }
 0x42c   : > { %v5137_v31 = vsel %vm796_vm2, %v5105_v30, %v5030_v32 }
 0x42d   : > { %6646 = vmatprep.mubr.msk.f32.mxu1 %vm864_vm3, %v5137_v31 }
 0x42e   : > { %v4079_v34 = vpop.permute.xlu1 %4078 }
 0x42f   : > { %v5032_v7 = vpop.permute.xlu0 %5031  ;;  %v4275_v12 = vsel %vm284_vm0, %v8956_v6, %v4079_v34  ;;  %v3507_v34 = vld [vmem:[#allocation3 + $0xf8] sm:$0xff] }
 0x430   : > { %v5138_v1 = vsel %vm796_vm2, %v5106_v24, %v5032_v7  ;;  %v3506_v7 = vld [vmem:[#allocation3 + $0xf0] sm:$0xff] }
 0x431   : > { %v6549_v63 = vpop.f32.mrb[58].mxu1  ;;  %6647 = vmatmul.mubr.msk.f32.gmra.mrb[84].mxu1 %vm864_vm3, %v5138_v1  ;;  %v3926_v1 = vld [vmem:[#allocation2 + $0x180] sm:$0xff] }
 0x432   : > { %v3859_v48 = vadd.f32 %v6549_v63, %v3503_v38  ;;  %v3803_v28 = vpop.f32.mrb[59].mxu1  ;;  %v4207_v15 = vpop.permute.xlu1 %4206 }
 0x433   : > { %v3858_v59 = vadd.f32 %v3803_v28, %v3502_v33  ;;  %v4205_v54 = vpop.permute.xlu0 %4204  ;;  %v4307_v10 = vsel %vm796_vm2, %v4275_v12, %v4207_v15  ;;  %v3927_v28 = vld [vmem:[#allocation2 + $0x188] sm:$0xff] }
 0x434   : > { %3891 = vst.msk [vmem:[#allocation3 + $0xd8] sm:$0xff] %vm284_vm0, %v3859_v48  ;;  %v4306_v60 = vsel %vm796_vm2, %v4274_v40, %v4205_v54 }
 0x435   : > { %3890 = vst.msk [vmem:[#allocation3 + $0xd0] sm:$0xff] %vm284_vm0, %v3858_v59  ;;  %6601 = vmatprep.mubr.msk.f32.mxu0 %vm864_vm3, %v4306_v60 }
 0x436   : > { %6602 = vmatmul.mubr.msk.f32.gmra.mrb[90].mxu0 %vm864_vm3, %v4307_v10  ;;  %v4908_v19 = vpop.permute.xlu1 %4907  ;;  %v4317_v10 = vld [vmem:[#allocation3 + $0x28] sm:$0xff] }
 0x437   : > { %v4906_v0 = vpop.permute.xlu0 %4905  ;;  %v5108_v56 = vsel %vm284_vm0, %v3921_v27, %v4908_v19 }
 0x438   : > { %v5107_v13 = vsel %vm284_vm0, %v3920_v46, %v4906_v0 }
 0x43a   : > { %v4081_v5 = vpop.permute.xlu1 %4080 }
 0x43b   : > { %v5034_v44 = vpop.permute.xlu0 %5033  ;;  %v4276_v20 = vsel %vm284_vm0, %v3924_v52, %v4081_v5  ;;  %v4316_v5 = vld [vmem:[#allocation3 + $0x20] sm:$0xff] }
 0x43c   : > { %v5139_v42 = vsel %vm796_vm2, %v5107_v13, %v5034_v44  ;;  %v6564_v4 = vpop.f32.mrb[64].mxu0 }
 0x43d   : > { %v4670_v16 = vadd.f32 %v6564_v4, %v4313_v14  ;;  %v4510_v55 = vpop.f32.mrb[65].mxu0  ;;  %6649 = vmatprep.mubr.msk.f32.mxu1 %vm864_vm3, %v5139_v42 }
 0x43e   : > { %v4669_v58 = vadd.f32 %v4510_v55, %v4312_v35  ;;  %v4083_v43 = vpop.permute.xlu1 %4082 }
 0x43f   : > { %4702 = vst.msk [vmem:[#allocation3 + $0x8] sm:$0xff] %vm284_vm0, %v4670_v16  ;;  %v5036_v3 = vpop.permute.xlu0 %5035  ;;  %v4277_v23 = vsel %vm284_vm0, %v3925_v2, %v4083_v43 }
 0x440   : > { %4701 = vst.msk [vmem:[#allocation3] sm:$0xff] %vm284_vm0, %v4669_v58  ;;  %v5140_v26 = vsel %vm796_vm2, %v5108_v56, %v5036_v3 }
 0x441   : > { %v6552_v51 = vpop.f32.mrb[60].mxu1  ;;  %6650 = vmatmul.mubr.msk.f32.gmra.mrb[86].mxu1 %vm864_vm3, %v5140_v26 }
 0x442   : > { %v3861_v61 = vadd.f32 %v6552_v51, %v3505_v18  ;;  %v3813_v21 = vpop.f32.mrb[61].mxu1  ;;  %v4211_v36 = vpop.permute.xlu1 %4210 }
 0x443   : > { %v3860_v46 = vadd.f32 %v3813_v21, %v3504_v47  ;;  %v4209_v22 = vpop.permute.xlu0 %4208  ;;  %v4309_v27 = vsel %vm796_vm2, %v4277_v23, %v4211_v36 }
 0x444   : > { %3893 = vst.msk [vmem:[#allocation3 + $0xe8] sm:$0xff] %vm284_vm0, %v3861_v61  ;;  %v4308_v41 = vsel %vm796_vm2, %v4276_v20, %v4209_v22  ;;  %v4764_v22 = vld [vmem:[#allocation2 + $0x1a0] sm:$0xff] }
 0x445   : > { %3892 = vst.msk [vmem:[#allocation3 + $0xe0] sm:$0xff] %vm284_vm0, %v3860_v46  ;;  %6604 = vmatprep.mubr.msk.f32.mxu0 %vm864_vm3, %v4308_v41  ;;  %v4763_v41 = vld [vmem:[#allocation2 + $0x198] sm:$0xff] }
 0x446   : > { %6605 = vmatmul.mubr.msk.f32.gmra.mrb[92].mxu0 %vm864_vm3, %v4309_v27  ;;  %v4912_v29 = vpop.permute.xlu1 %4911  ;;  %v5150_v51 = vld [vmem:[#allocation3 + $0x8] sm:$0xff]  ;;  %v4319_v27 = vld [vmem:[#allocation3 + $0x38] sm:$0xff] }
 0x447   : > { %v4910_v39 = vpop.permute.xlu0 %4909  ;;  %v5110_v32 = vsel %vm284_vm0, %v8956_v6, %v4912_v29  ;;  %v5149_v36 = vld [vmem:[#allocation3] sm:$0xff] }
 0x448   : > { %v5109_v37 = vsel %vm284_vm0, %v3922_v53, %v4910_v39 }
 0x44a   : > { %v4085_v25 = vpop.permute.xlu1 %4084 }
 0x44b   : > { %v5038_v45 = vpop.permute.xlu0 %5037  ;;  %v4278_v48 = vsel %vm284_vm0, %v3926_v1, %v4085_v25 }
 0x44c   : > { %v5141_v8 = vsel %vm796_vm2, %v5109_v37, %v5038_v45  ;;  %v6567_v62 = vpop.f32.mrb[66].mxu0  ;;  %v4318_v37 = vld [vmem:[#allocation3 + $0x30] sm:$0xff] }
 0x44d   : > { %v4672_v17 = vadd.f32 %v6567_v62, %v4315_v57  ;;  %v4520_v11 = vpop.f32.mrb[67].mxu0  ;;  %6652 = vmatprep.mubr.msk.f32.mxu1 %vm864_vm3, %v5141_v8 }
 0x44e   : > { %v4671_v9 = vadd.f32 %v4520_v11, %v4314_v50  ;;  %v4087_v30 = vpop.permute.xlu1 %4086 }
 0x44f   : > { %4704 = vst.msk [vmem:[#allocation3 + $0x18] sm:$0xff] %vm284_vm0, %v4672_v17  ;;  %v5040_v31 = vpop.permute.xlu0 %5039  ;;  %v4279_v6 = vsel %vm284_vm0, %v3927_v28, %v4087_v30 }
 0x450   : > { %4703 = vst.msk [vmem:[#allocation3 + $0x10] sm:$0xff] %vm284_vm0, %v4671_v9  ;;  %v5142_v24 = vsel %vm796_vm2, %v5110_v32, %v5040_v31 }
 0x451   : > { %v6555_v38 = vpop.f32.mrb[62].mxu1  ;;  %6653 = vmatmul.mubr.msk.f32.gmra.mrb[88].mxu1 %vm864_vm3, %v5142_v24 }
 0x452   : > { %v3863_v33 = vadd.f32 %v6555_v38, %v3507_v34  ;;  %v3823_v63 = vpop.f32.mrb[63].mxu1  ;;  %v4215_v53 = vpop.permute.xlu1 %4214 }
 0x453   : > { %v3862_v15 = vadd.f32 %v3823_v63, %v3506_v7  ;;  %v4213_v40 = vpop.permute.xlu0 %4212  ;;  %v4311_v54 = vsel %vm796_vm2, %v4279_v6, %v4215_v53  ;;  %v4321_v7 = vld [vmem:[#allocation3 + $0x48] sm:$0xff] }
 0x454   : > { %3895 = vst.msk [vmem:[#allocation3 + $0xf8] sm:$0xff] %vm284_vm0, %v3863_v33  ;;  %v4310_v59 = vsel %vm796_vm2, %v4278_v48, %v4213_v40  ;;  %v4320_v33 = vld [vmem:[#allocation3 + $0x40] sm:$0xff] }
 0x455   : > { %3894 = vst.msk [vmem:[#allocation3 + $0xf0] sm:$0xff] %vm284_vm0, %v3862_v15  ;;  %6607 = vmatprep.mubr.msk.f32.mxu0 %vm864_vm3, %v4310_v59 }
 0x456   : > { %v4916_v12 = vpop.permute.xlu1 %4915  ;;  %6608 = vmatmul.mubr.msk.f32.gmra.mrb[94].mxu0 %vm864_vm3, %v4311_v54  ;;  %v5152_v9 = vld [vmem:[#allocation3 + $0x18] sm:$0xff] }
 0x457   : > { %v4914_v60 = vpop.permute.xlu0 %4913  ;;  %v5112_v16 = vsel %vm284_vm0, %v3925_v2, %v4916_v12  ;;  %v5151_v31 = vld [vmem:[#allocation3 + $0x10] sm:$0xff]  ;;  %v4323_v54 = vld [vmem:[#allocation3 + $0x58] sm:$0xff]  ;;  %6666 = vmatprep.mubr.msk.f32.mxu0 %vm6729_vm4, %v9423_v49 }
 0x458   : > { %v5111_v42 = vsel %vm284_vm0, %v3924_v52, %v4914_v60 }
 0x459   : > { %v6570_v19 = vpop.f32.mrb[68].mxu0 }
 0x45a   : > { %v4674_v0 = vadd.f32 %v6570_v19, %v4317_v10  ;;  %v4530_v13 = vpop.f32.mrb[69].mxu0  ;;  %v5044_v44 = vpop.permute.xlu1 %5043  ;;  %v4322_v10 = vld [vmem:[#allocation3 + $0x50] sm:$0xff] }
 0x45b   : > { %v4673_v14 = vadd.f32 %v4530_v13, %v4316_v5  ;;  %v5042_v4 = vpop.permute.xlu0 %5041  ;;  %v5144_v55 = vsel %vm796_vm2, %v5112_v16, %v5044_v44  ;;  %v4325_v16 = vld [vmem:[#allocation3 + $0x68] sm:$0xff] }
 0x45c   : > { %4706 = vst.msk [vmem:[#allocation3 + $0x28] sm:$0xff] %vm284_vm0, %v4674_v0  ;;  %v5143_v35 = vsel %vm796_vm2, %v5111_v42, %v5042_v4 }
 0x45d   : > { %4705 = vst.msk [vmem:[#allocation3 + $0x20] sm:$0xff] %vm284_vm0, %v4673_v14  ;;  %6655 = vmatprep.mubr.msk.f32.mxu1 %vm864_vm3, %v5143_v35 }
 0x45e   : > { %6656 = vmatmul.mubr.msk.f32.gmra.mrb[90].mxu1 %vm864_vm3, %v5144_v55  ;;  %v4920_v58 = vpop.permute.xlu1 %4919 }
 0x45f   : > { %v4918_v43 = vpop.permute.xlu0 %4917  ;;  %v5114_v26 = vsel %vm284_vm0, %v3927_v28, %v4920_v58  ;;  %v4324_v58 = vld [vmem:[#allocation3 + $0x60] sm:$0xff] }
 0x460   : > { %v5113_v3 = vsel %vm284_vm0, %v3926_v1, %v4918_v43 }
 0x462   : > { %v5048_v56 = vpop.permute.xlu1 %5047 }
 0x463   : > { %v5046_v18 = vpop.permute.xlu0 %5045  ;;  %v5146_v61 = vsel %vm796_vm2, %v5114_v26, %v5048_v56  ;;  %v5154_v48 = vld [vmem:[#allocation3 + $0x28] sm:$0xff] }
 0x464   : > { %v5145_v47 = vsel %vm796_vm2, %v5113_v3, %v5046_v18  ;;  %v6618_v52 = vpop.f32.mrb[64].mxu1  ;;  %v5153_v40 = vld [vmem:[#allocation3 + $0x20] sm:$0xff]  ;;  %v5672_v3 = vld [vmem:[%s9341_s5] sm:$0xff] }
 0x465   : > { %v5507_v21 = vadd.f32 %v6618_v52, %v5150_v51  ;;  %v5347_v20 = vpop.f32.mrb[65].mxu1  ;;  %6658 = vmatprep.mubr.msk.f32.mxu1 %vm864_vm3, %v5145_v47  ;;  %6665 = vmatpush3.msra.mxu0 %v5672_v3 }
 0x466   : > { %v5506_v2 = vadd.f32 %v5347_v20, %v5149_v36  ;;  %6659 = vmatmul.mubr.msk.f32.gmra.mrb[92].mxu1 %vm864_vm3, %v5146_v61  ;;  %v4924_v46 = vpop.permute.xlu1 %4923 }
 0x467   : > { %5539 = vst.msk [vmem:[#allocation3 + $0x8] sm:$0xff] %vm284_vm0, %v5507_v21  ;;  %v4922_v23 = vpop.permute.xlu0 %4921  ;;  %v5116_v39 = vsel %vm284_vm0, %v4764_v22, %v4924_v46  ;;  %v4327_v21 = vld [vmem:[#allocation3 + $0x78] sm:$0xff] }
 0x468   : > { %5538 = vst.msk [vmem:[#allocation3] sm:$0xff] %vm284_vm0, %v5506_v2  ;;  %v5115_v57 = vsel %vm284_vm0, %v4763_v41, %v4922_v23  ;;  %v4326_v2 = vld [vmem:[#allocation3 + $0x70] sm:$0xff] }
 0x469   : > { %v6573_v29 = vpop.f32.mrb[70].mxu0 }
 0x46a   : > { %v4676_v25 = vadd.f32 %v6573_v29, %v4319_v27  ;;  %v4540_v45 = vpop.f32.mrb[71].mxu0  ;;  %v5052_v8 = vpop.permute.xlu1 %5051 }
 0x46b   : > { %v4675_v62 = vadd.f32 %v4540_v45, %v4318_v37  ;;  %v5050_v17 = vpop.permute.xlu0 %5049  ;;  %v5148_v11 = vsel %vm796_vm2, %v5116_v39, %v5052_v8  ;;  %v4329_v37 = vld [vmem:[#allocation3 + $0x88] sm:$0xff] }
 0x46c   : > { %4708 = vst.msk [vmem:[#allocation3 + $0x38] sm:$0xff] %vm284_vm0, %v4676_v25  ;;  %v5147_v50 = vsel %vm796_vm2, %v5115_v57, %v5050_v17  ;;  %v4328_v57 = vld [vmem:[#allocation3 + $0x80] sm:$0xff] }
 0x46d   : > { %4707 = vst.msk [vmem:[#allocation3 + $0x30] sm:$0xff] %vm284_vm0, %v4675_v62  ;;  %6661 = vmatprep.mubr.msk.f32.mxu1 %vm864_vm3, %v5147_v50 }
 0x46e   : > { %6662 = vmatmul.mubr.msk.f32.gmra.mrb[94].mxu1 %vm864_vm3, %v5148_v11 }
 0x473   : > { %v5156_v5 = vld [vmem:[#allocation3 + $0x38] sm:$0xff] }
 0x474   : > { %v6621_v30 = vpop.f32.mrb[66].mxu1  ;;  %v5155_v42 = vld [vmem:[#allocation3 + $0x30] sm:$0xff] }
 0x475   : > { %v5509_v32 = vadd.f32 %v6621_v30, %v5152_v9  ;;  %v5357_v34 = vpop.f32.mrb[67].mxu1 }
 0x476   : > { %v5508_v24 = vadd.f32 %v5357_v34, %v5151_v31  ;;  %v4331_v34 = vld [vmem:[#allocation3 + $0x98] sm:$0xff] }
 0x477   : > { %5541 = vst.msk [vmem:[#allocation3 + $0x18] sm:$0xff] %vm284_vm0, %v5509_v32 }
 0x478   : > { %5540 = vst.msk [vmem:[#allocation3 + $0x10] sm:$0xff] %vm284_vm0, %v5508_v24 }
 0x479   : > { %v6576_v38 = vpop.f32.mrb[72].mxu0 }
 0x47a   : > { %v4678_v1 = vadd.f32 %v6576_v38, %v4321_v7  ;;  %v4550_v63 = vpop.f32.mrb[73].mxu0  ;;  %v4330_v38 = vld [vmem:[#allocation3 + $0x90] sm:$0xff] }
 0x47b   : > { %v4677_v53 = vadd.f32 %v4550_v63, %v4320_v33 }
 0x47c   : > { %4710 = vst.msk [vmem:[#allocation3 + $0x48] sm:$0xff] %vm284_vm0, %v4678_v1 }
 0x47d   : > { %4709 = vst.msk [vmem:[#allocation3 + $0x40] sm:$0xff] %vm284_vm0, %v4677_v53 }
 0x483   : > { %v5158_v18 = vld [vmem:[#allocation3 + $0x48] sm:$0xff] }
 0x484   : > { %v6624_v28 = vpop.f32.mrb[68].mxu1  ;;  %v5157_v51 = vld [vmem:[#allocation3 + $0x40] sm:$0xff] }
 0x485   : > { %v5511_v15 = vadd.f32 %v6624_v28, %v5154_v48  ;;  %v5367_v6 = vpop.f32.mrb[69].mxu1 }
 0x486   : > { %v5510_v59 = vadd.f32 %v5367_v6, %v5153_v40  ;;  %v4333_v40 = vld [vmem:[#allocation3 + $0xa8] sm:$0xff] }
 0x487   : > { %5543 = vst.msk [vmem:[#allocation3 + $0x28] sm:$0xff] %vm284_vm0, %v5511_v15 }
 0x488   : > { %5542 = vst.msk [vmem:[#allocation3 + $0x20] sm:$0xff] %vm284_vm0, %v5510_v59 }
 0x489   : > { %v6579_v12 = vpop.f32.mrb[74].mxu0 }
 0x48a   : > { %v4680_v60 = vadd.f32 %v6579_v12, %v4323_v54  ;;  %v4560_v19 = vpop.f32.mrb[75].mxu0  ;;  %v4332_v54 = vld [vmem:[#allocation3 + $0xa0] sm:$0xff] }
 0x48b   : > { %v4679_v0 = vadd.f32 %v4560_v19, %v4322_v10 }
 0x48c   : > { %4712 = vst.msk [vmem:[#allocation3 + $0x58] sm:$0xff] %vm284_vm0, %v4680_v60 }
 0x48d   : > { %4711 = vst.msk [vmem:[#allocation3 + $0x50] sm:$0xff] %vm284_vm0, %v4679_v0 }
 0x493   : > { %v5160_v23 = vld [vmem:[#allocation3 + $0x58] sm:$0xff] }
 0x494   : > { %v6627_v13 = vpop.f32.mrb[70].mxu1  ;;  %v5159_v29 = vld [vmem:[#allocation3 + $0x50] sm:$0xff] }
 0x495   : > { %v5513_v44 = vadd.f32 %v6627_v13, %v5156_v5  ;;  %v5377_v14 = vpop.f32.mrb[71].mxu1 }
 0x496   : > { %v5512_v4 = vadd.f32 %v5377_v14, %v5155_v42  ;;  %v4335_v42 = vld [vmem:[#allocation3 + $0xb8] sm:$0xff] }
 0x497   : > { %5545 = vst.msk [vmem:[#allocation3 + $0x38] sm:$0xff] %vm284_vm0, %v5513_v44 }
 0x498   : > { %5544 = vst.msk [vmem:[#allocation3 + $0x30] sm:$0xff] %vm284_vm0, %v5512_v4 }
 0x499   : > { %v6582_v35 = vpop.f32.mrb[76].mxu0 }
 0x49a   : > { %v4682_v55 = vadd.f32 %v6582_v35, %v4325_v16  ;;  %v4570_v43 = vpop.f32.mrb[77].mxu0  ;;  %v4334_v16 = vld [vmem:[#allocation3 + $0xb0] sm:$0xff] }
 0x49b   : > { %v4681_v56 = vadd.f32 %v4570_v43, %v4324_v58  ;;  %v9059_v58 = vld [vmem:[#allocation3 + $0x8] sm:$0xff]  ;;  %v9061_v43 = vld [vmem:[#allocation3] sm:$0xff] }
 0x49c   : > { %4714 = vst.msk [vmem:[#allocation3 + $0x68] sm:$0xff] %vm284_vm0, %v4682_v55 }
 0x49d   : > { %4713 = vst.msk [vmem:[#allocation3 + $0x60] sm:$0xff] %vm284_vm0, %v4681_v56  ;;  %v9063_v56 = vld [vmem:[#allocation3 + $0x10] sm:$0xff] }
 0x4a3   : > { %v5162_v50 = vld [vmem:[#allocation3 + $0x68] sm:$0xff] }
 0x4a4   : > { %v6630_v26 = vpop.f32.mrb[72].mxu1  ;;  %v5161_v30 = vld [vmem:[#allocation3 + $0x60] sm:$0xff] }
 0x4a5   : > { %v5515_v47 = vadd.f32 %v6630_v26, %v5158_v18  ;;  %v5387_v52 = vpop.f32.mrb[73].mxu1  ;;  %v5603_v26 = vsel %vm284_vm0, %v9059_v58, 0.0 }
 0x4a6   : > { %v5514_v61 = vadd.f32 %v5387_v52, %v5157_v51 }
 0x4a7   : > { %5547 = vst.msk [vmem:[#allocation3 + $0x48] sm:$0xff] %vm284_vm0, %v5515_v47  ;;  %v5602_v47 = vsel %vm284_vm0, %v9061_v43, 0.0 }
 0x4a8   : > { %5546 = vst.msk [vmem:[#allocation3 + $0x40] sm:$0xff] %vm284_vm0, %v5514_v61 }
 0x4a9   : > { %v6585_v36 = vpop.f32.mrb[78].mxu0 }
 0x4aa   : > { %v4684_v20 = vadd.f32 %v6585_v36, %v4327_v21  ;;  %v4580_v46 = vpop.f32.mrb[79].mxu0  ;;  %v5605_v36 = vsel %vm284_vm0, %v9063_v56, 0.0 }
 0x4ab   : > { %v4683_v22 = vadd.f32 %v4580_v46, %v4326_v2  ;;  %v4337_v2 = vld [vmem:[#allocation3 + $0xc8] sm:$0xff] }
 0x4ac   : > { %4716 = vst.msk [vmem:[#allocation3 + $0x78] sm:$0xff] %vm284_vm0, %v4684_v20  ;;  %v5604_v20 = vadd.f32 %v5603_v26, %v5602_v47 }
 0x4ad   : > { %4715 = vst.msk [vmem:[#allocation3 + $0x70] sm:$0xff] %vm284_vm0, %v4683_v22  ;;  %v9073_v22 = vld [vmem:[#allocation3 + $0x18] sm:$0xff] }
 0x4b3   : > { %v5164_v63 = vld [vmem:[#allocation3 + $0x78] sm:$0xff] }
 0x4b4   : > { %v6633_v41 = vpop.f32.mrb[74].mxu1  ;;  %v5163_v28 = vld [vmem:[#allocation3 + $0x70] sm:$0xff] }
 0x4b5   : > { %v5517_v27 = vadd.f32 %v6633_v41, %v5160_v23  ;;  %v5397_v39 = vpop.f32.mrb[75].mxu1  ;;  %v5606_v23 = vadd.f32 %v5605_v36, %v5604_v20  ;;  %v9075_v41 = vld [vmem:[#allocation3 + $0x20] sm:$0xff] }
 0x4b6   : > { %v5516_v25 = vadd.f32 %v5397_v39, %v5159_v29  ;;  %v4336_v29 = vld [vmem:[#allocation3 + $0xc0] sm:$0xff] }
 0x4b7   : > { %5549 = vst.msk [vmem:[#allocation3 + $0x58] sm:$0xff] %vm284_vm0, %v5517_v27  ;;  %v4340_v20 = vld [vmem:[#allocation3 + $0xe0] sm:$0xff] }
 0x4b8   : > { %5548 = vst.msk [vmem:[#allocation3 + $0x50] sm:$0xff] %vm284_vm0, %v5516_v25 }
 0x4b9   : > { %v6588_v45 = vpop.f32.mrb[80].mxu0 }
 0x4ba   : > { %v4686_v8 = vadd.f32 %v6588_v45, %v4329_v37  ;;  %v4590_v62 = vpop.f32.mrb[81].mxu0  ;;  %v5607_v37 = vsel %vm284_vm0, %v9073_v22, 0.0  ;;  %v5609_v45 = vsel %vm284_vm0, %v9075_v41, 0.0 }
 0x4bb   : > { %v4685_v17 = vadd.f32 %v4590_v62, %v4328_v57  ;;  %v9083_v57 = vld [vmem:[#allocation3 + $0x28] sm:$0xff] }
 0x4bc   : > { %4718 = vst.msk [vmem:[#allocation3 + $0x88] sm:$0xff] %vm284_vm0, %v4686_v8  ;;  %v5608_v8 = vadd.f32 %v5607_v37, %v5606_v23 }
 0x4bd   : > { %4717 = vst.msk [vmem:[#allocation3 + $0x80] sm:$0xff] %vm284_vm0, %v4685_v17  ;;  %v9085_v17 = vld [vmem:[#allocation3 + $0x30] sm:$0xff] }
 0x4be   : > { %v5610_v62 = vadd.f32 %v5609_v45, %v5608_v8 }
 0x4c3   : > { %v5166_v10 = vld [vmem:[#allocation3 + $0x88] sm:$0xff] }
 0x4c4   : > { %v6636_v11 = vpop.f32.mrb[76].mxu1  ;;  %v5165_v5 = vld [vmem:[#allocation3 + $0x80] sm:$0xff] }
 0x4c5   : > { %v5519_v9 = vadd.f32 %v6636_v11, %v5162_v50  ;;  %v5407_v32 = vpop.f32.mrb[77].mxu1  ;;  %v5611_v50 = vsel %vm284_vm0, %v9083_v57, 0.0  ;;  %v5613_v11 = vsel %vm284_vm0, %v9085_v17, 0.0 }
 0x4c6   : > { %v5518_v31 = vadd.f32 %v5407_v32, %v5161_v30 }
 0x4c7   : > { %5551 = vst.msk [vmem:[#allocation3 + $0x68] sm:$0xff] %vm284_vm0, %v5519_v9  ;;  %v5612_v9 = vadd.f32 %v5611_v50, %v5610_v62 }
 0x4c8   : > { %5550 = vst.msk [vmem:[#allocation3 + $0x60] sm:$0xff] %vm284_vm0, %v5518_v31 }
 0x4c9   : > { %v6591_v24 = vpop.f32.mrb[82].mxu0 }
 0x4ca   : > { %v4688_v7 = vadd.f32 %v6591_v24, %v4331_v34  ;;  %v4600_v1 = vpop.f32.mrb[83].mxu0 }
 0x4cb   : > { %v4687_v33 = vadd.f32 %v4600_v1, %v4330_v38  ;;  %v5614_v38 = vadd.f32 %v5613_v11, %v5612_v9  ;;  %v9093_v1 = vld [vmem:[#allocation3 + $0x40] sm:$0xff] }
 0x4cc   : > { %4720 = vst.msk [vmem:[#allocation3 + $0x98] sm:$0xff] %vm284_vm0, %v4688_v7  ;;  %v9091_v7 = vld [vmem:[#allocation3 + $0x38] sm:$0xff] }
 0x4cd   : > { %4719 = vst.msk [vmem:[#allocation3 + $0x90] sm:$0xff] %vm284_vm0, %v4687_v33 }
 0x4ce   : > { %v9120_v47 = vld [vmem:[#allocation3 + $0x68] sm:$0xff] }
 0x4d3   : > { %v5168_v3 = vld [vmem:[#allocation3 + $0x98] sm:$0xff] }
 0x4d4   : > { %v6639_v53 = vpop.f32.mrb[78].mxu1  ;;  %v5167_v52 = vld [vmem:[#allocation3 + $0x90] sm:$0xff] }
 0x4d5   : > { %v5521_v48 = vadd.f32 %v6639_v53, %v5164_v63  ;;  %v5417_v15 = vpop.f32.mrb[79].mxu1  ;;  %v5615_v63 = vsel %vm284_vm0, %v9091_v7, 0.0  ;;  %v5617_v53 = vsel %vm284_vm0, %v9093_v1, 0.0 }
 0x4d6   : > { %v5520_v49 = vadd.f32 %v5417_v15, %v5163_v28  ;;  %v5616_v15 = vadd.f32 %v5615_v63, %v5614_v38 }
 0x4d7   : > { %5553 = vst.msk [vmem:[#allocation3 + $0x78] sm:$0xff] %vm284_vm0, %v5521_v48  ;;  %v4339_v48 = vld [vmem:[#allocation3 + $0xd8] sm:$0xff] }
 0x4d8   : > { %5552 = vst.msk [vmem:[#allocation3 + $0x70] sm:$0xff] %vm284_vm0, %v5520_v49 }
 0x4d9   : > { %v6594_v6 = vpop.f32.mrb[84].mxu0 }
 0x4da   : > { %v4690_v59 = vadd.f32 %v6594_v6, %v4333_v40  ;;  %v4610_v12 = vpop.f32.mrb[85].mxu0  ;;  %v4338_v40 = vld [vmem:[#allocation3 + $0xd0] sm:$0xff] }
 0x4db   : > { %v4689_v60 = vadd.f32 %v4610_v12, %v4332_v54  ;;  %v9101_v54 = vld [vmem:[#allocation3 + $0x48] sm:$0xff]  ;;  %v5618_v12 = vadd.f32 %v5617_v53, %v5616_v15 }
 0x4dc   : > { %4722 = vst.msk [vmem:[#allocation3 + $0xa8] sm:$0xff] %vm284_vm0, %v4690_v59 }
 0x4dd   : > { %4721 = vst.msk [vmem:[#allocation3 + $0xa0] sm:$0xff] %vm284_vm0, %v4689_v60  ;;  %v9103_v60 = vld [vmem:[#allocation3 + $0x50] sm:$0xff] }
 0x4e3   : > { %v5170_v30 = vld [vmem:[#allocation3 + $0xa8] sm:$0xff] }
 0x4e4   : > { %v6642_v19 = vpop.f32.mrb[80].mxu1  ;;  %v5169_v34 = vld [vmem:[#allocation3 + $0xa0] sm:$0xff] }
 0x4e5   : > { %v5523_v0 = vadd.f32 %v6642_v19, %v5166_v10  ;;  %v5427_v13 = vpop.f32.mrb[81].mxu1  ;;  %v5619_v10 = vsel %vm284_vm0, %v9101_v54, 0.0  ;;  %v5621_v19 = vsel %vm284_vm0, %v9103_v60, 0.0 }
 0x4e6   : > { %v5522_v44 = vadd.f32 %v5427_v13, %v5165_v5  ;;  %v9111_v5 = vld [vmem:[#allocation3 + $0x58] sm:$0xff] }
 0x4e7   : > { %5555 = vst.msk [vmem:[#allocation3 + $0x88] sm:$0xff] %vm284_vm0, %v5523_v0  ;;  %v5620_v0 = vadd.f32 %v5619_v10, %v5618_v12 }
 0x4e8   : > { %5554 = vst.msk [vmem:[#allocation3 + $0x80] sm:$0xff] %vm284_vm0, %v5522_v44  ;;  %v9113_v44 = vld [vmem:[#allocation3 + $0x60] sm:$0xff] }
 0x4e9   : > { %v6597_v14 = vpop.f32.mrb[86].mxu0  ;;  %v5622_v13 = vadd.f32 %v5621_v19, %v5620_v0 }
 0x4ea   : > { %v4692_v4 = vadd.f32 %v6597_v14, %v4335_v42  ;;  %v4620_v35 = vpop.f32.mrb[87].mxu0 }
 0x4eb   : > { %v4691_v55 = vadd.f32 %v4620_v35, %v4334_v16  ;;  %v5625_v16 = vsel %vm284_vm0, %v9113_v44, 0.0 }
 0x4ec   : > { %4724 = vst.msk [vmem:[#allocation3 + $0xb8] sm:$0xff] %vm284_vm0, %v4692_v4  ;;  %v5623_v4 = vsel %vm284_vm0, %v9111_v5, 0.0 }
 0x4ed   : > { %4723 = vst.msk [vmem:[#allocation3 + $0xb0] sm:$0xff] %vm284_vm0, %v4691_v55 }
 0x4ee   : > { %v9139_v50 = vld [vmem:[#allocation3 + $0x88] sm:$0xff] }
 0x4ef   : > { %v9133_v37 = vld [vmem:[#allocation3 + $0x80] sm:$0xff] }
 0x4f0   : > { %v5633_v8 = vsel %vm284_vm0, %v9133_v37, 0.0 }
 0x4f3   : > { %v5172_v42 = vld [vmem:[#allocation3 + $0xb8] sm:$0xff] }
 0x4f4   : > { %v6645_v18 = vpop.f32.mrb[82].mxu1  ;;  %v5171_v55 = vld [vmem:[#allocation3 + $0xb0] sm:$0xff] }
 0x4f5   : > { %v5525_v51 = vadd.f32 %v6645_v18, %v5168_v3  ;;  %v5437_v61 = vpop.f32.mrb[83].mxu1  ;;  %v5624_v18 = vadd.f32 %v5623_v4, %v5622_v13 }
 0x4f6   : > { %v5524_v21 = vadd.f32 %v5437_v61, %v5167_v52  ;;  %v9122_v52 = vld [vmem:[#allocation3 + $0x70] sm:$0xff]  ;;  %v4341_v61 = vld [vmem:[#allocation3 + $0xe8] sm:$0xff] }
 0x4f7   : > { %5557 = vst.msk [vmem:[#allocation3 + $0x98] sm:$0xff] %vm284_vm0, %v5525_v51  ;;  %v5626_v51 = vadd.f32 %v5625_v16, %v5624_v18  ;;  %v5629_v23 = vsel %vm284_vm0, %v9122_v52, 0.0 }
 0x4f8   : > { %5556 = vst.msk [vmem:[#allocation3 + $0x90] sm:$0xff] %vm284_vm0, %v5524_v21 }
 0x4f9   : > { %v6600_v46 = vpop.f32.mrb[88].mxu0 }
 0x4fa   : > { %v4694_v27 = vadd.f32 %v6600_v46, %v4337_v2  ;;  %v4630_v39 = vpop.f32.mrb[89].mxu0  ;;  %v5627_v46 = vsel %vm284_vm0, %v9120_v47, 0.0 }
 0x4fb   : > { %v4693_v25 = vadd.f32 %v4630_v39, %v4336_v29  ;;  %v5628_v29 = vadd.f32 %v5627_v46, %v5626_v51  ;;  %v9131_v39 = vld [vmem:[#allocation3 + $0x78] sm:$0xff] }
 0x4fc   : > { %4726 = vst.msk [vmem:[#allocation3 + $0xc8] sm:$0xff] %vm284_vm0, %v4694_v27  ;;  %v5631_v45 = vsel %vm284_vm0, %v9131_v39, 0.0 }
 0x4fd   : > { %4725 = vst.msk [vmem:[#allocation3 + $0xc0] sm:$0xff] %vm284_vm0, %v4693_v25  ;;  %v5630_v25 = vadd.f32 %v5629_v23, %v5628_v29 }
 0x4fe   : > { %v9149_v15 = vld [vmem:[#allocation3 + $0x98] sm:$0xff] }
 0x4ff   : > { %v5632_v62 = vadd.f32 %v5631_v45, %v5630_v25  ;;  %v9141_v9 = vld [vmem:[#allocation3 + $0x90] sm:$0xff]  ;;  %v5639_v19 = vsel %vm284_vm0, %v9149_v15, 0.0 }
 0x500   : > { %v5637_v63 = vsel %vm284_vm0, %v9141_v9, 0.0 }
 0x501   : > { %v5634_v11 = vadd.f32 %v5633_v8, %v5632_v62 }
 0x504   : > { %v6648_v32 = vpop.f32.mrb[84].mxu1 }
 0x505   : > { %v5527_v31 = vadd.f32 %v6648_v32, %v5170_v30  ;;  %v5447_v24 = vpop.f32.mrb[85].mxu1  ;;  %v5174_v30 = vld [vmem:[#allocation3 + $0xc8] sm:$0xff] }
 0x506   : > { %v5526_v33 = vadd.f32 %v5447_v24, %v5169_v34  ;;  %v5173_v34 = vld [vmem:[#allocation3 + $0xc0] sm:$0xff] }
 0x507   : > { %5559 = vst.msk [vmem:[#allocation3 + $0xa8] sm:$0xff] %vm284_vm0, %v5527_v31 }
 0x508   : > { %5558 = vst.msk [vmem:[#allocation3 + $0xa0] sm:$0xff] %vm284_vm0, %v5526_v33  ;;  %v5635_v33 = vsel %vm284_vm0, %v9139_v50, 0.0 }
 0x509   : > { %v6603_v28 = vpop.f32.mrb[90].mxu0  ;;  %v5636_v53 = vadd.f32 %v5635_v33, %v5634_v11 }
 0x50a   : > { %v4696_v49 = vadd.f32 %v6603_v28, %v4339_v48  ;;  %v4640_v6 = vpop.f32.mrb[91].mxu0  ;;  %v4343_v48 = vld [vmem:[#allocation3 + $0xf8] sm:$0xff] }
 0x50b   : > { %v4695_v59 = vadd.f32 %v4640_v6, %v4338_v40 }
 0x50c   : > { %4728 = vst.msk [vmem:[#allocation3 + $0xd8] sm:$0xff] %vm284_vm0, %v4696_v49  ;;  %v5638_v49 = vadd.f32 %v5637_v63, %v5636_v53 }
 0x50d   : > { %4727 = vst.msk [vmem:[#allocation3 + $0xd0] sm:$0xff] %vm284_vm0, %v4695_v59  ;;  %v4342_v59 = vld [vmem:[#allocation3 + $0xf0] sm:$0xff] }
 0x50e   : > { %v5640_v13 = vadd.f32 %v5639_v19, %v5638_v49 }
 0x50f   : > { %v9151_v40 = vld [vmem:[#allocation3 + $0xa0] sm:$0xff] }
 0x510   : > { %v5641_v0 = vsel %vm284_vm0, %v9151_v40, 0.0 }
 0x513   : > { %v5176_v16 = vld [vmem:[#allocation3 + $0xd8] sm:$0xff] }
 0x514   : > { %v6651_v14 = vpop.f32.mrb[86].mxu1 }
 0x515   : > { %v5529_v35 = vadd.f32 %v6651_v14, %v5172_v42  ;;  %v5457_v3 = vpop.f32.mrb[87].mxu1  ;;  %v9159_v42 = vld [vmem:[#allocation3 + $0xa8] sm:$0xff]  ;;  %v5642_v14 = vadd.f32 %v5641_v0, %v5640_v13 }
 0x516   : > { %v5528_v26 = vadd.f32 %v5457_v3, %v5171_v55  ;;  %v5175_v3 = vld [vmem:[#allocation3 + $0xd0] sm:$0xff] }
 0x517   : > { %5561 = vst.msk [vmem:[#allocation3 + $0xb8] sm:$0xff] %vm284_vm0, %v5529_v35 }
 0x518   : > { %5560 = vst.msk [vmem:[#allocation3 + $0xb0] sm:$0xff] %vm284_vm0, %v5528_v26  ;;  %v5643_v26 = vsel %vm284_vm0, %v9159_v42, 0.0 }
 0x519   : > { %v6606_v21 = vpop.f32.mrb[92].mxu0 }
 0x51a   : > { %v4698_v36 = vadd.f32 %v6606_v21, %v4341_v61  ;;  %v4650_v2 = vpop.f32.mrb[93].mxu0  ;;  %v5644_v21 = vadd.f32 %v5643_v26, %v5642_v14 }
 0x51b   : > { %v4697_v27 = vadd.f32 %v4650_v2, %v4340_v20 }
 0x51c   : > { %4730 = vst.msk [vmem:[#allocation3 + $0xe8] sm:$0xff] %vm284_vm0, %v4698_v36 }
 0x51d   : > { %4729 = vst.msk [vmem:[#allocation3 + $0xe0] sm:$0xff] %vm284_vm0, %v4697_v27 }
 0x51e   : > { %v9169_v36 = vld [vmem:[#allocation3 + $0xb8] sm:$0xff] }
 0x51f   : > { %v9161_v4 = vld [vmem:[#allocation3 + $0xb0] sm:$0xff]  ;;  %v5647_v46 = vsel %vm284_vm0, %v9169_v36, 0.0 }
 0x520   : > { %v5645_v51 = vsel %vm284_vm0, %v9161_v4, 0.0 }
 0x521   : > { %v5646_v20 = vadd.f32 %v5645_v51, %v5644_v21 }
 0x523   : > { %v5178_v27 = vld [vmem:[#allocation3 + $0xe8] sm:$0xff]  ;;  %v5648_v62 = vadd.f32 %v5647_v46, %v5646_v20 }
 0x524   : > { %v6654_v32 = vpop.f32.mrb[88].mxu1  ;;  %v5177_v45 = vld [vmem:[#allocation3 + $0xe0] sm:$0xff] }
 0x525   : > { %v5531_v31 = vadd.f32 %v6654_v32, %v5174_v30  ;;  %v5467_v24 = vpop.f32.mrb[89].mxu1 }
 0x526   : > { %v5530_v38 = vadd.f32 %v5467_v24, %v5173_v34 }
 0x527   : > { %5563 = vst.msk [vmem:[#allocation3 + $0xc8] sm:$0xff] %vm284_vm0, %v5531_v31 }
 0x528   : > { %5562 = vst.msk [vmem:[#allocation3 + $0xc0] sm:$0xff] %vm284_vm0, %v5530_v38 }
 0x529   : > { %v6609_v28 = vpop.f32.mrb[94].mxu0 }
 0x52a   : > { %v4700_v6 = vadd.f32 %v6609_v28, %v4343_v48  ;;  %v4660_v12 = vpop.f32.mrb[95].mxu0 }
 0x52b   : > { %v4699_v10 = vadd.f32 %v4660_v12, %v4342_v59 }
 0x52c   : > { %4732 = vst.msk [vmem:[#allocation3 + $0xf8] sm:$0xff] %vm284_vm0, %v4700_v6 }
 0x52d   : > { %4731 = vst.msk [vmem:[#allocation3 + $0xf0] sm:$0xff] %vm284_vm0, %v4699_v10 }
 0x52e   : > { %v9177_v30 = vld [vmem:[#allocation3 + $0xc8] sm:$0xff] }
 0x52f   : > { %v9171_v2 = vld [vmem:[#allocation3 + $0xc0] sm:$0xff]  ;;  %v5651_v34 = vsel %vm284_vm0, %v9177_v30, 0.0 }
 0x530   : > { %v5649_v23 = vsel %vm284_vm0, %v9171_v2, 0.0 }
 0x531   : > { %v6657_v35 = vpop.f32.mrb[90].mxu1  ;;  %v5650_v31 = vadd.f32 %v5649_v23, %v5648_v62 }
 0x532   : > { %v5533_v55 = vadd.f32 %v6657_v35, %v5176_v16  ;;  %v5477_v18 = vpop.f32.mrb[91].mxu1 }
 0x533   : > { %v5532_v61 = vadd.f32 %v5477_v18, %v5175_v3  ;;  %v5652_v38 = vadd.f32 %v5651_v34, %v5650_v31  ;;  %v5180_v33 = vld [vmem:[#allocation3 + $0xf8] sm:$0xff]  ;;  %v5752_v34 = vlaneseq }
 0x534   : > { %5565 = vst.msk [vmem:[#allocation3 + $0xd8] sm:$0xff] %vm284_vm0, %v5533_v55  ;;  %v5179_v48 = vld [vmem:[#allocation3 + $0xf0] sm:$0xff] }
 0x535   : > { %5564 = vst.msk [vmem:[#allocation3 + $0xd0] sm:$0xff] %vm284_vm0, %v5532_v61 }
 0x539   : > { %v6660_v29 = vpop.f32.mrb[92].mxu1 }
 0x53a   : > { %v5535_v25 = vadd.f32 %v6660_v29, %v5178_v27  ;;  %v5487_v8 = vpop.f32.mrb[93].mxu1 }
 0x53b   : > { %v5534_v11 = vadd.f32 %v5487_v8, %v5177_v45  ;;  %v9187_v49 = vld [vmem:[#allocation3 + $0xd8] sm:$0xff] }
 0x53c   : > { %5567 = vst.msk [vmem:[#allocation3 + $0xe8] sm:$0xff] %vm284_vm0, %v5535_v25  ;;  %v9180_v32 = vld [vmem:[#allocation3 + $0xd0] sm:$0xff]  ;;  %v5655_v10 = vsel %vm284_vm0, %v9187_v49, 0.0 }
 0x53d   : > { %5566 = vst.msk [vmem:[#allocation3 + $0xe0] sm:$0xff] %vm284_vm0, %v5534_v11  ;;  %v5653_v24 = vsel %vm284_vm0, %v9180_v32, 0.0 }
 0x53e   : > { %v5654_v6 = vadd.f32 %v5653_v24, %v5652_v38  ;;  %v5753_v24 = vshrl.u32 %v5752_v34, 7 }
 0x540   : > { %v5656_v0 = vadd.f32 %v5655_v10, %v5654_v6  ;;  %v5754_v38 = vsub.s32 0, %v5753_v24  ;;  %v9445_v24 = vld [vmem:[#allocation19_spill] sm:$0xff] }
 0x541   : > { %v6663_v63 = vpop.f32.mrb[94].mxu1 }
 0x542   : > { %v5537_v53 = vadd.f32 %v6663_v63, %v5180_v33  ;;  %v5497_v28 = vpop.f32.mrb[95].mxu1 }
 0x543   : > { %v5536_v59 = vadd.f32 %v5497_v28, %v5179_v48  ;;  %v5599_v13 = vld [vmem:[#allocation3 + $0xe8] sm:$0xff] }
 0x544   : > { %5569 = vst.msk [vmem:[#allocation3 + $0xf8] sm:$0xff] %vm284_vm0, %v5537_v53  ;;  %v9190_v12 = vld [vmem:[#allocation3 + $0xe0] sm:$0xff]  ;;  %v5659_v16 = vsel %vm284_vm0, %v5599_v13, 0.0 }
 0x545   : > { %5568 = vst.msk [vmem:[#allocation3 + $0xf0] sm:$0xff] %vm284_vm0, %v5536_v59  ;;  %v5657_v19 = vsel %vm284_vm0, %v9190_v12, 0.0 }
 0x546   : > { %v5658_v14 = vadd.f32 %v5657_v19, %v5656_v0 }
 0x548   : > { %v5660_v3 = vadd.f32 %v5659_v16, %v5658_v14 }
 0x54b   : > { %v5601_v55 = vld [vmem:[#allocation3 + $0xf8] sm:$0xff] }
 0x54c   : > { %v5600_v35 = vld [vmem:[#allocation3 + $0xf0] sm:$0xff]  ;;  %v5663_v51 = vsel %vm284_vm0, %v5601_v55, 0.0 }
 0x54d   : > { %v5661_v18 = vsel %vm284_vm0, %v5600_v35, 0.0 }
 0x54e   : > { %v5662_v26 = vadd.f32 %v5661_v18, %v5660_v3  ;;  %v9434_v3 = vld [vmem:[#allocation6_spill] sm:$0xff] }
 0x550   : > { %v5664_v61 = vadd.f32 %v5663_v51, %v5662_v26  ;;  %v9435_v26 = vld [vmem:[#allocation9_spill] sm:$0xff] }
 0x552   : > { %v5665_v21 = vrot.slane %v5664_v61, 4 }
 0x554   : > { %v5666_v20 = vadd.f32 %v5665_v21, %v5664_v61  ;;  %v9436_v61 = vld [vmem:[#allocation8_spill] sm:$0xff]  ;;  %v9437_v21 = vld [vmem:[#allocation11_spill] sm:$0xff] }
 0x556   : > { %v5667_v46 = vrot.slane %v5666_v20, 2 }
 0x558   : > { %v5668_v23 = vadd.f32 %v5667_v46, %v5666_v20  ;;  %v9439_v20 = vld [vmem:[#allocation13_spill] sm:$0xff] }
 0x55a   : > { %v5669_v27 = vrot.slane %v5668_v23, 1 }
 0x55c   : > { %v5670_v29 = vadd.f32 %v5669_v27, %v5668_v23  ;;  %v9440_v23 = vld [vmem:[#allocation12_spill] sm:$0xff] }
 0x55e   : > { %v5671_v25 = vmul.f32 0.00390625, %v5670_v29  ;;  %v9441_v29 = vld [vmem:[#allocation15_spill] sm:$0xff] }
 0x560   : > { %6667 = vmatmul.mubr.msk.f32.vlgmr.msra.gmra.mrb[96].mxu0 %vm284_vm0, %v5671_v25 }
 0x633   : > { %v5742_v45 = vpop.f32.mrb[96].mxu0 }
 0x634   : > { %v6123_v8 = vmul.f32 -1.442695, %v5742_v45  ;;  %v6668_v62 = vpop.f32.mrb[97].mxu0  ;;  %v9442_v45 = vld [vmem:[#allocation14_spill] sm:$0xff] }
 0x635   : > { %v9443_v62 = vld [vmem:[#allocation17_spill] sm:$0xff] }
 0x636   : > { %6705 = vpow2.f32 %v6123_v8 }
 0x640   : > { %v6706_v11 = vpop.eup %6705 }
 0x641   : > { %v5749_v31 = vadd.f32 1.0, %v6706_v11 }
 0x643   : > { %6707 = vrcp.f32 %v5749_v31  ;;  %v9444_v31 = vld [vmem:[#allocation16_spill] sm:$0xff] }
 0x64d   : > { %v6708_v33 = vpop.eup %6707 }
 0x64e   : > { %v5755_v63 = vrot.slane %v6708_v33, %v5754_v38  ;;  %v9446_v33 = vld [vmem:[#allocation18_spill] sm:$0xff] }
 0x650   : > { %v5756_v53 = vmul.f32 %v5755_v63, %v9061_v43  ;;  %v5757_v48 = vmul.f32 %v5755_v63, %v9059_v58  ;;  %v5758_v28 = vmul.f32 %v5755_v63, %v9063_v56  ;;  %v5759_v6 = vmul.f32 %v5755_v63, %v9073_v22 }
 0x651   : > { %v5760_v59 = vmul.f32 %v5755_v63, %v9075_v41  ;;  %v5761_v10 = vmul.f32 %v5755_v63, %v9083_v57  ;;  %v5762_v19 = vmul.f32 %v5755_v63, %v9085_v17  ;;  %v5763_v0 = vmul.f32 %v5755_v63, %v9091_v7 }
 0x652   : > { %v5764_v14 = vmul.f32 %v5755_v63, %v9093_v1  ;;  %v5765_v16 = vmul.f32 %v5755_v63, %v9101_v54  ;;  %v5766_v43 = vmul.f32 %v5755_v63, %v9103_v60  ;;  %v5767_v58 = vmul.f32 %v5755_v63, %v9111_v5 }
 0x653   : > { %v5768_v56 = vmul.f32 %v5755_v63, %v9113_v44  ;;  %v5769_v22 = vmul.f32 %v5755_v63, %v9120_v47  ;;  %v5770_v41 = vmul.f32 %v5755_v63, %v9122_v52  ;;  %v5771_v57 = vmul.f32 %v5755_v63, %v9131_v39 }
 0x654   : > { %v5772_v17 = vmul.f32 %v5755_v63, %v9133_v37  ;;  %v5773_v7 = vmul.f32 %v5755_v63, %v9139_v50  ;;  %v5774_v1 = vmul.f32 %v5755_v63, %v9141_v9  ;;  %v5775_v54 = vmul.f32 %v5755_v63, %v9149_v15 }
 0x655   : > { %v5776_v60 = vmul.f32 %v5755_v63, %v9151_v40  ;;  %v5777_v5 = vmul.f32 %v5755_v63, %v9159_v42  ;;  %v5778_v44 = vmul.f32 %v5755_v63, %v9161_v4  ;;  %v5779_v47 = vmul.f32 %v5755_v63, %v9169_v36  ;;  %v9431_v4 = vld [vmem:[#allocation5_spill] sm:$0xff] }
 0x656   : > { %v5780_v52 = vmul.f32 %v5755_v63, %v9171_v2  ;;  %v5781_v39 = vmul.f32 %v5755_v63, %v9177_v30  ;;  %v5782_v37 = vmul.f32 %v5755_v63, %v9180_v32  ;;  %v5783_v50 = vmul.f32 %v5755_v63, %v9187_v49  ;;  %v9432_v2 = vld [vmem:[#allocation4_spill] sm:$0xff]  ;;  %v9433_v32 = vld [vmem:[#allocation7_spill] sm:$0xff] }
 0x657   : > { %v5784_v9 = vmul.f32 %v5755_v63, %v9190_v12  ;;  %v5785_v15 = vmul.f32 %v5755_v63, %v5599_v13  ;;  %v5786_v40 = vmul.f32 %v5755_v63, %v5600_v35  ;;  %v5787_v42 = vmul.f32 %v5755_v63, %v5601_v55  ;;  %v9438_v35 = vld [vmem:[#allocation10_spill] sm:$0xff] }
 0x658   : > { %v5788_v36 = vadd.f32 %v5756_v53, %v9431_v4  ;;  %v5789_v30 = vadd.f32 %v5757_v48, %v9432_v2  ;;  %v5790_v49 = vadd.f32 %v5758_v28, %v9433_v32  ;;  %v5791_v18 = vadd.f32 %v5759_v6, %v9434_v3  ;;  %v9447_v53 = vld [vmem:[#allocation21_spill] sm:$0xff]  ;;  %v9448_v28 = vld [vmem:[#allocation20_spill] sm:$0xff] }
 0x659   : > { %v5792_v51 = vadd.f32 %v5760_v59, %v9435_v26  ;;  %v5793_v12 = vadd.f32 %v5761_v10, %v9436_v61  ;;  %v5794_v13 = vadd.f32 %v5762_v19, %v9437_v21  ;;  %v5795_v55 = vadd.f32 %v5763_v0, %v9438_v35  ;;  %v9449_v59 = vld [vmem:[#allocation23_spill] sm:$0xff]  ;;  %v9450_v19 = vld [vmem:[#allocation22_spill] sm:$0xff]  ;;  %v9460_v4 = vld [vmem:[#allocation33_spill] sm:$0xff] }
 0x65a   : > { %v5796_v46 = vadd.f32 %v5764_v14, %v9439_v20  ;;  %v5797_v27 = vadd.f32 %v5765_v16, %v9440_v23  ;;  %v5798_v25 = vadd.f32 %v5766_v43, %v9441_v29  ;;  %v5799_v8 = vadd.f32 %v5767_v58, %v9442_v45  ;;  %5820 = vst.msk [vmem:[%s9234_s7] sm:$0xff] %vm284_vm0, %v5788_v36  ;;  %v9451_v14 = vld [vmem:[#allocation25_spill] sm:$0xff]  ;;  %v9452_v43 = vld [vmem:[#allocation24_spill] sm:$0xff]  ;;  %v9461_v36 = vld [vmem:[#allocation34_spill] sm:$0xff] }
 0x65b   : > { %5821 = vst.msk [vmem:[%s9234_s7 + $0x8] sm:$0xff] %vm284_vm0, %v5789_v30  ;;  %5822 = vst.msk [vmem:[%s9234_s7 + $0x10] sm:$0xff] %vm284_vm0, %v5790_v49  ;;  %v5800_v11 = vadd.f32 %v5768_v56, %v9443_v62  ;;  %v5801_v34 = vadd.f32 %v5769_v22, %v9444_v31  ;;  %v5802_v38 = vadd.f32 %v5770_v41, %v9445_v24  ;;  %v9453_v56 = vld [vmem:[#allocation27_spill] sm:$0xff]  ;;  %v9454_v41 = vld [vmem:[#allocation26_spill] sm:$0xff] }
 0x65c   : > { %5823 = vst.msk [vmem:[%s9234_s7 + $0x18] sm:$0xff] %vm284_vm0, %v5791_v18  ;;  %v5803_v63 = vadd.f32 %v5771_v57, %v9446_v33  ;;  %5824 = vst.msk [vmem:[%s9234_s7 + $0x20] sm:$0xff] %vm284_vm0, %v5792_v51  ;;  %v5804_v48 = vadd.f32 %v5772_v17, %v9447_v53  ;;  %v5805_v6 = vadd.f32 %v5773_v7, %v9448_v28  ;;  %v9455_v17 = vld [vmem:[#allocation29_spill] sm:$0xff] }
 0x65d   : > { %5825 = vst.msk [vmem:[%s9234_s7 + $0x28] sm:$0xff] %vm284_vm0, %v5793_v12  ;;  %5826 = vst.msk [vmem:[%s9234_s7 + $0x30] sm:$0xff] %vm284_vm0, %v5794_v13  ;;  %v5806_v10 = vadd.f32 %v5774_v1, %v9449_v59  ;;  %v5807_v0 = vadd.f32 %v5775_v54, %v9450_v19  ;;  %v5808_v16 = vadd.f32 %v5776_v60, %v9451_v14  ;;  %v9456_v1 = vld [vmem:[#allocation28_spill] sm:$0xff]  ;;  %v9457_v60 = vld [vmem:[#allocation30_spill] sm:$0xff] }
 0x65e   : > { %5827 = vst.msk [vmem:[%s9234_s7 + $0x38] sm:$0xff] %vm284_vm0, %v5795_v55  ;;  %5828 = vst.msk [vmem:[%s9234_s7 + $0x40] sm:$0xff] %vm284_vm0, %v5796_v46  ;;  %v5809_v58 = vadd.f32 %v5777_v5, %v9452_v43  ;;  %v5810_v22 = vadd.f32 %v5778_v44, %v9453_v56  ;;  %v5811_v57 = vadd.f32 %v5779_v47, %v9454_v41  ;;  %v9458_v44 = vld [vmem:[#allocation31_spill] sm:$0xff] }
 0x65f   : > { %5829 = vst.msk [vmem:[%s9234_s7 + $0x48] sm:$0xff] %vm284_vm0, %v5797_v27  ;;  %5830 = vst.msk [vmem:[%s9234_s7 + $0x50] sm:$0xff] %vm284_vm0, %v5798_v25  ;;  %v5812_v7 = vadd.f32 %v5780_v52, %v9455_v17  ;;  %v5813_v54 = vadd.f32 %v5781_v39, %v9456_v1  ;;  %v5814_v5 = vadd.f32 %v5782_v37, %v9457_v60  ;;  %v9459_v52 = vld [vmem:[#allocation32_spill] sm:$0xff] }
 0x660   : > { %5831 = vst.msk [vmem:[%s9234_s7 + $0x58] sm:$0xff] %vm284_vm0, %v5799_v8  ;;  %5832 = vst.msk [vmem:[%s9234_s7 + $0x60] sm:$0xff] %vm284_vm0, %v5800_v11  ;;  %v5815_v47 = vadd.f32 %v5783_v50, %v9458_v44  ;;  %v5816_v39 = vadd.f32 %v5784_v9, %v9459_v52  ;;  %v5817_v37 = vadd.f32 %v5785_v15, %v9460_v4  ;;  %v9462_v50 = vld [vmem:[#allocation35_spill] sm:$0xff] }
 0x661   : > { %5833 = vst.msk [vmem:[%s9234_s7 + $0x68] sm:$0xff] %vm284_vm0, %v5801_v34  ;;  %5834 = vst.msk [vmem:[%s9234_s7 + $0x70] sm:$0xff] %vm284_vm0, %v5802_v38  ;;  %v5818_v2 = vadd.f32 %v5786_v40, %v9461_v36  ;;  %v5819_v30 = vadd.f32 %v5787_v42, %v9462_v50 }
 0x662   : > { %5835 = vst.msk [vmem:[%s9234_s7 + $0x78] sm:$0xff] %vm284_vm0, %v5803_v63  ;;  %5836 = vst.msk [vmem:[%s9234_s7 + $0x80] sm:$0xff] %vm284_vm0, %v5804_v48 }
 0x663   : > { %5837 = vst.msk [vmem:[%s9234_s7 + $0x88] sm:$0xff] %vm284_vm0, %v5805_v6  ;;  %5838 = vst.msk [vmem:[%s9234_s7 + $0x90] sm:$0xff] %vm284_vm0, %v5806_v10 }
 0x664   : > { %5839 = vst.msk [vmem:[%s9234_s7 + $0x98] sm:$0xff] %vm284_vm0, %v5807_v0  ;;  %5840 = vst.msk [vmem:[%s9234_s7 + $0xa0] sm:$0xff] %vm284_vm0, %v5808_v16 }
 0x665   : > { %5841 = vst.msk [vmem:[%s9234_s7 + $0xa8] sm:$0xff] %vm284_vm0, %v5809_v58  ;;  %5842 = vst.msk [vmem:[%s9234_s7 + $0xb0] sm:$0xff] %vm284_vm0, %v5810_v22 }
 0x666   : > { %5843 = vst.msk [vmem:[%s9234_s7 + $0xb8] sm:$0xff] %vm284_vm0, %v5811_v57  ;;  %5844 = vst.msk [vmem:[%s9234_s7 + $0xc0] sm:$0xff] %vm284_vm0, %v5812_v7 }
 0x667   : > { %5845 = vst.msk [vmem:[%s9234_s7 + $0xc8] sm:$0xff] %vm284_vm0, %v5813_v54  ;;  %5846 = vst.msk [vmem:[%s9234_s7 + $0xd0] sm:$0xff] %vm284_vm0, %v5814_v5 }
 0x668   : > { %5847 = vst.msk [vmem:[%s9234_s7 + $0xd8] sm:$0xff] %vm284_vm0, %v5815_v47  ;;  %5848 = vst.msk [vmem:[%s9234_s7 + $0xe0] sm:$0xff] %vm284_vm0, %v5816_v39 }
 0x669   : > { %5849 = vst.msk [vmem:[%s9234_s7 + $0xe8] sm:$0xff] %vm284_vm0, %v5817_v37  ;;  %5850 = vst.msk [vmem:[%s9234_s7 + $0xf0] sm:$0xff] %vm284_vm0, %v5818_v2 }
 0x66a   : > { %5851 = vst.msk [vmem:[%s9234_s7 + $0xf8] sm:$0xff] %vm284_vm0, %v5819_v30 }
 0x66b PF: > { %s16_s21 = sadd.s32 1, %s6724_s21  }
 0x66c   : > { %p13_p4 = scmp.ge.s32.totalorder %s16_s21, 4  }
 0x66e   :  { %15 = sbr.rel (!%p13_p4) target bundleno = 1 (0x1), region = 80 }

</bundles_post_ra>
